<compile_context>
chip_gen: v7x
topology: tpu7x:2x2x1
jax: 0.10.0
libtpu: 0.0.40
codegen_flags: <defaults>
</compile_context>

<pallas_src>
import functools
import math

import jax
import jax.numpy as jnp
from jax.experimental import pallas as pl
from jax.experimental.pallas import tpu as pltpu

NUM_ENCODER_BLOCKS = 2
TOKEN_VEC_DIM = 32
NUM_HEADS = 4
FFN_MULT = 4
LN_EPS = 1e-5
NEG_INF = -1e30


def _vmem_spec():
    # KB-scale problem: keep whole arrays resident in VMEM, no grid tiling.
    return pl.BlockSpec(memory_space=pltpu.MemorySpace.VMEM)


# ---------------------------------------------------------------------------
# Single fused kernel: x <- x + PE ; then NUM_ENCODER_BLOCKS x encoder block.
#   block:  y   = LN1(x + MHA(x))
#           out = LN2(y + W2 @ relu(W1 @ y))
# Weight refs are stacked across blocks (leading axis NB or NB*H) and indexed
# with static Python ints inside the fully unrolled loops.
# ---------------------------------------------------------------------------
def encoder_kernel(x_ref, pe_ref, mask_ref,
                   wq_ref, bq_ref, wk_ref, bk_ref, wv_ref, bv_ref,
                   wo_ref, bo_ref, g1_ref, be1_ref,
                   w1_ref, b1_ref, w2_ref, b2_ref, g2_ref, be2_ref,
                   o_ref, *, num_blocks, num_heads):
    f32 = jnp.float32
    x = x_ref[...].astype(f32) + pe_ref[...].astype(f32)          # (BS, D)
    mask = mask_ref[...]                                          # (BS, BS) additive

    def layernorm(y, gamma, beta):
        mu = jnp.mean(y, axis=-1, keepdims=True)
        var = jnp.mean((y - mu) ** 2, axis=-1, keepdims=True)
        return (y - mu) * jax.lax.rsqrt(var + LN_EPS) * gamma + beta

    for blk in range(num_blocks):
        # ----- multi-head self-attention (per-head weight slices, accumulate
        #       the output projection -> no lane slicing, no concat) -----
        attn = jnp.broadcast_to(bo_ref[blk], x.shape).astype(f32)  # start from bo
        for h in range(num_heads):
            idx = blk * num_heads + h
            # NOTE: 1/sqrt(head_dim) is already folded into wq/bq at pack time.
            qh = jnp.dot(x, wq_ref[idx], preferred_element_type=f32) + bq_ref[idx]
            kh = jnp.dot(x, wk_ref[idx], preferred_element_type=f32) + bk_ref[idx]
            vh = jnp.dot(x, wv_ref[idx], preferred_element_type=f32) + bv_ref[idx]
            s = jnp.einsum('qd,kd->qk', qh, kh,
                           preferred_element_type=f32) + mask
            s = s - jnp.max(s, axis=-1, keepdims=True)
            p = jnp.exp(s)
            p = p * pl.reciprocal(jnp.sum(p, axis=-1, keepdims=True), approx=True)
            ctx = jnp.dot(p, vh, preferred_element_type=f32)        # (BS, hd)
            attn = attn + jnp.dot(ctx, wo_ref[idx],
                                  preferred_element_type=f32)       # (BS, D)

        # TODO(synk): dropout is identity in eval mode -> omitted.
        h1 = layernorm(x + attn, g1_ref[blk], be1_ref[blk])

        # ----- position-wise feed-forward with ReLU -----
        f = jnp.dot(h1, w1_ref[blk], preferred_element_type=f32) + b1_ref[blk]
        f = jnp.maximum(f, 0.0)
        f = jnp.dot(f, w2_ref[blk], preferred_element_type=f32) + b2_ref[blk]
        x = layernorm(h1 + f, g2_ref[blk], be2_ref[blk])

    o_ref[...] = x.astype(o_ref.dtype)


# ---------------------------------------------------------------------------
# Wrappers
# ---------------------------------------------------------------------------
@jax.jit
def encoder_forward(x, pe, mask, packed):
    B, S, D = x.shape
    x2 = x.reshape(B * S, D)                                       # free plumbing
    pe2 = jnp.broadcast_to(pe, (B, S, D)).reshape(B * S, D)
    kern = functools.partial(encoder_kernel,
                             num_blocks=NUM_ENCODER_BLOCKS,
                             num_heads=NUM_HEADS)
    out = pl.pallas_call(
        kern,
        out_shape=jax.ShapeDtypeStruct((B * S, D), x.dtype),
        in_specs=[_vmem_spec()] * (3 + len(packed)),
        out_specs=_vmem_spec(),
    )(x2, pe2, mask, *packed)
    return out.reshape(B, S, D)


def pack_params(params, num_heads):
    """Repack per-block params into block-stacked, per-head-split arrays.

    The attention scale 1/sqrt(head_dim) is folded into wq/bq here (one-time
    host-side cost) so the kernel never multiplies the score matrix.
    """
    H = num_heads
    acc = {k: [] for k in ('wq', 'bq', 'wk', 'bk', 'wv', 'bv', 'wo', 'bo',
                           'g1', 'be1', 'w1', 'b1', 'w2', 'b2', 'g2', 'be2')}
    for (wq, bq, wk, bk, wv, bv, wo, bo, g1, be1,
         w1, b1, w2, b2, g2, be2) in params:
        D = wq.shape[0]
        hd = D // H
        scale = 1.0 / math.sqrt(hd)

        def split_out(w):      # (D, D) -> (H, D, hd): per-head output columns
            return w.reshape(D, H, hd).transpose(1, 0, 2)

        def split_bias(b):     # (1, D) -> (H, 1, hd)
            return b.reshape(H, hd)[:, None, :]

        acc['wq'].append(split_out(wq) * scale)
        acc['bq'].append(split_bias(bq) * scale)
        acc['wk'].append(split_out(wk)); acc['bk'].append(split_bias(bk))
        acc['wv'].append(split_out(wv)); acc['bv'].append(split_bias(bv))
        acc['wo'].append(wo.reshape(H, hd, D))        # sublane-axis row slices
        acc['bo'].append(bo)
        acc['g1'].append(g1); acc['be1'].append(be1)
        acc['w1'].append(w1); acc['b1'].append(b1)
        acc['w2'].append(w2); acc['b2'].append(b2)
        acc['g2'].append(g2); acc['be2'].append(be2)

    cat = lambda k: jnp.concatenate(acc[k], axis=0)   # (NB*H, ...)
    stk = lambda k: jnp.stack(acc[k], axis=0)         # (NB, ...)
    return (cat('wq'), cat('bq'), cat('wk'), cat('bk'), cat('wv'), cat('bv'),
            cat('wo'), stk('bo'), stk('g1'), stk('be1'),
            stk('w1'), stk('b1'), stk('w2'), stk('b2'), stk('g2'), stk('be2'))


def batch_block_mask(batch, seq_len):
    """Additive mask that forbids cross-batch attention on flattened (B*S)."""
    idx = jnp.arange(batch * seq_len) // seq_len
    same = idx[:, None] == idx[None, :]
    return jnp.where(same, 0.0, NEG_INF).astype(jnp.float32)


# ---------------------------------------------------------------------------
# Deterministic parameter / input construction
# ---------------------------------------------------------------------------
def sinusoidal_pe(seq_len, d):
    pos = jnp.arange(seq_len, dtype=jnp.float32)[:, None]           # (S, 1)
    i = jnp.arange(0, d, 2, dtype=jnp.float32)                      # (D/2,)
    angles = pos / jnp.power(10000.0, i / d)                        # (S, D/2)
    pe = jnp.zeros((seq_len, d), jnp.float32)
    pe = pe.at[:, 0::2].set(jnp.sin(angles))
    pe = pe.at[:, 1::2].set(jnp.cos(angles))
    return pe


def init_encoder_params(key, num_blocks, d, ffn_mult):
    def lin(k, din, dout):
        w = jax.random.normal(k, (din, dout), jnp.float32) / math.sqrt(din)
        b = jnp.zeros((1, dout), jnp.float32)
        return w, b

    params = []
    for blk in range(num_blocks):
        keys = jax.random.split(jax.random.fold_in(key, blk), 6)
        wq, bq = lin(keys[0], d, d)
        wk, bk = lin(keys[1], d, d)
        wv, bv = lin(keys[2], d, d)
        wo, bo = lin(keys[3], d, d)
        g1 = jnp.ones((1, d), jnp.float32)
        be1 = jnp.zeros((1, d), jnp.float32)
        w1, b1 = lin(keys[4], d, ffn_mult * d)
        w2, b2 = lin(keys[5], ffn_mult * d, d)
        g2 = jnp.ones((1, d), jnp.float32)
        be2 = jnp.zeros((1, d), jnp.float32)
        params.append((wq, bq, wk, bk, wv, bv, wo, bo, g1, be1,
                       w1, b1, w2, b2, g2, be2))
    return tuple(params)


if __name__ == "__main__":
    B, S, D = 2, 8, TOKEN_VEC_DIM
    root = jax.random.PRNGKey(0)
    x = jax.random.normal(jax.random.fold_in(root, 123), (B, S, D), jnp.float32)
    pe = sinusoidal_pe(S, D)[None]                                   # (1, S, D)
    params = init_encoder_params(jax.random.fold_in(root, 7),
                                 NUM_ENCODER_BLOCKS, D, FFN_MULT)
    packed = pack_params(params, NUM_HEADS)
    mask = batch_block_mask(B, S)

    y = encoder_forward(x, pe, mask, packed)
    jax.block_until_ready(y)
    assert y.shape == (B, S, D) and y.dtype == jnp.float32
    assert bool(jnp.all(jnp.isfinite(y)))
    print("KERNEL_OK")
</pallas_src>

<mosaic_0001>
module attributes {stable_mosaic.version = 11 : i64} {
  func.func @encoder_kernel(%arg0: memref<16x32xf32, #tpu.memory_space<vmem>>, %arg1: memref<16x32xf32, #tpu.memory_space<vmem>>, %arg2: memref<16x16xf32, #tpu.memory_space<vmem>>, %arg3: memref<8x32x8xf32, #tpu.memory_space<vmem>>, %arg4: memref<8x1x8xf32, #tpu.memory_space<vmem>>, %arg5: memref<8x32x8xf32, #tpu.memory_space<vmem>>, %arg6: memref<8x1x8xf32, #tpu.memory_space<vmem>>, %arg7: memref<8x32x8xf32, #tpu.memory_space<vmem>>, %arg8: memref<8x1x8xf32, #tpu.memory_space<vmem>>, %arg9: memref<8x8x32xf32, #tpu.memory_space<vmem>>, %arg10: memref<2x1x32xf32, #tpu.memory_space<vmem>>, %arg11: memref<2x1x32xf32, #tpu.memory_space<vmem>>, %arg12: memref<2x1x32xf32, #tpu.memory_space<vmem>>, %arg13: memref<2x32x128xf32, #tpu.memory_space<vmem>>, %arg14: memref<2x1x128xf32, #tpu.memory_space<vmem>>, %arg15: memref<2x128x32xf32, #tpu.memory_space<vmem>>, %arg16: memref<2x1x32xf32, #tpu.memory_space<vmem>>, %arg17: memref<2x1x32xf32, #tpu.memory_space<vmem>>, %arg18: memref<2x1x32xf32, #tpu.memory_space<vmem>>, %arg19: memref<16x32xf32, #tpu.memory_space<vmem>>) attributes {dimension_semantics = [], scalar_prefetch = 0 : i64, scratch_operands = 0 : i64, tpu.core_type = #tpu.core_type<tc>} {
    %c0 = arith.constant 0 : index
    %c0_0 = arith.constant 0 : index
    %0 = vector.load %arg0[%c0, %c0_0] : memref<16x32xf32, #tpu.memory_space<vmem>>, vector<16x32xf32>
    %c0_1 = arith.constant 0 : index
    %c0_2 = arith.constant 0 : index
    %1 = vector.load %arg1[%c0_1, %c0_2] : memref<16x32xf32, #tpu.memory_space<vmem>>, vector<16x32xf32>
    %2 = arith.addf %0, %1 : vector<16x32xf32>
    %c0_3 = arith.constant 0 : index
    %c0_4 = arith.constant 0 : index
    %3 = vector.load %arg2[%c0_3, %c0_4] : memref<16x16xf32, #tpu.memory_space<vmem>>, vector<16x16xf32>
    %c0_5 = arith.constant 0 : index
    %c0_6 = arith.constant 0 : index
    %c0_7 = arith.constant 0 : index
    %4 = vector.load %arg10[%c0_5, %c0_6, %c0_7] : memref<2x1x32xf32, #tpu.memory_space<vmem>>, vector<1x1x32xf32>
    %5 = vector.shape_cast %4 : vector<1x1x32xf32> to vector<1x32xf32>
    %6 = vector.shape_cast %5 : vector<1x32xf32> to vector<1x32xf32>
    %7 = vector.broadcast %6 : vector<1x32xf32> to vector<16x32xf32>
    %c0_8 = arith.constant 0 : index
    %c0_9 = arith.constant 0 : index
    %c0_10 = arith.constant 0 : index
    %8 = vector.load %arg3[%c0_8, %c0_9, %c0_10] : memref<8x32x8xf32, #tpu.memory_space<vmem>>, vector<1x32x8xf32>
    %9 = vector.shape_cast %8 : vector<1x32x8xf32> to vector<32x8xf32>
    %cst = arith.constant dense<0.000000e+00> : vector<16x8xf32>
    %10 = tpu.matmul %2, %9, %cst {dimension_numbers = #tpu.dot_dimension_numbers<[1], [0], [0], [1], [0, 0, 1, 1], [], []>} : vector<16x32xf32>, vector<32x8xf32>, vector<16x8xf32> -> vector<16x8xf32>
    %c0_11 = arith.constant 0 : index
    %c0_12 = arith.constant 0 : index
    %c0_13 = arith.constant 0 : index
    %11 = vector.load %arg4[%c0_11, %c0_12, %c0_13] : memref<8x1x8xf32, #tpu.memory_space<vmem>>, vector<1x1x8xf32>
    %12 = vector.shape_cast %11 : vector<1x1x8xf32> to vector<1x8xf32>
    %13 = vector.broadcast %12 : vector<1x8xf32> to vector<16x8xf32>
    %14 = arith.addf %10, %13 : vector<16x8xf32>
    %c0_14 = arith.constant 0 : index
    %c0_15 = arith.constant 0 : index
    %c0_16 = arith.constant 0 : index
    %15 = vector.load %arg5[%c0_14, %c0_15, %c0_16] : memref<8x32x8xf32, #tpu.memory_space<vmem>>, vector<1x32x8xf32>
    %16 = vector.shape_cast %15 : vector<1x32x8xf32> to vector<32x8xf32>
    %cst_17 = arith.constant dense<0.000000e+00> : vector<16x8xf32>
    %17 = tpu.matmul %2, %16, %cst_17 {dimension_numbers = #tpu.dot_dimension_numbers<[1], [0], [0], [1], [0, 0, 1, 1], [], []>} : vector<16x32xf32>, vector<32x8xf32>, vector<16x8xf32> -> vector<16x8xf32>
    %c0_18 = arith.constant 0 : index
    %c0_19 = arith.constant 0 : index
    %c0_20 = arith.constant 0 : index
    %18 = vector.load %arg6[%c0_18, %c0_19, %c0_20] : memref<8x1x8xf32, #tpu.memory_space<vmem>>, vector<1x1x8xf32>
    %19 = vector.shape_cast %18 : vector<1x1x8xf32> to vector<1x8xf32>
    %20 = vector.broadcast %19 : vector<1x8xf32> to vector<16x8xf32>
    %21 = arith.addf %17, %20 : vector<16x8xf32>
    %c0_21 = arith.constant 0 : index
    %c0_22 = arith.constant 0 : index
    %c0_23 = arith.constant 0 : index
    %22 = vector.load %arg7[%c0_21, %c0_22, %c0_23] : memref<8x32x8xf32, #tpu.memory_space<vmem>>, vector<1x32x8xf32>
    %23 = vector.shape_cast %22 : vector<1x32x8xf32> to vector<32x8xf32>
    %cst_24 = arith.constant dense<0.000000e+00> : vector<16x8xf32>
    %24 = tpu.matmul %2, %23, %cst_24 {dimension_numbers = #tpu.dot_dimension_numbers<[1], [0], [0], [1], [0, 0, 1, 1], [], []>} : vector<16x32xf32>, vector<32x8xf32>, vector<16x8xf32> -> vector<16x8xf32>
    %c0_25 = arith.constant 0 : index
    %c0_26 = arith.constant 0 : index
    %c0_27 = arith.constant 0 : index
    %25 = vector.load %arg8[%c0_25, %c0_26, %c0_27] : memref<8x1x8xf32, #tpu.memory_space<vmem>>, vector<1x1x8xf32>
    %26 = vector.shape_cast %25 : vector<1x1x8xf32> to vector<1x8xf32>
    %27 = vector.broadcast %26 : vector<1x8xf32> to vector<16x8xf32>
    %28 = arith.addf %24, %27 : vector<16x8xf32>
    "tpu.trace_start"() <{level = 10 : i32, message = "qd,kd->qk"}> : () -> ()
    %cst_28 = arith.constant dense<0.000000e+00> : vector<16x16xf32>
    %29 = tpu.matmul %14, %21, %cst_28 {dimension_numbers = #tpu.dot_dimension_numbers<[1], [1], [0], [0], [0, 0, 1, 0], [], []>} : vector<16x8xf32>, vector<16x8xf32>, vector<16x16xf32> -> vector<16x16xf32>
    "tpu.trace_stop"() : () -> ()
    %30 = arith.addf %29, %3 : vector<16x16xf32>
    %cst_29 = arith.constant dense<0xFF800000> : vector<16xf32>
    %31 = vector.multi_reduction <maximumf>, %30, %cst_29 [1] : vector<16x16xf32> to vector<16xf32>
    %32 = vector.shape_cast %31 : vector<16xf32> to vector<16x1xf32>
    %33 = vector.broadcast %32 : vector<16x1xf32> to vector<16x16xf32>
    %34 = arith.subf %30, %33 : vector<16x16xf32>
    %35 = math.exp %34 : vector<16x16xf32>
    %cst_30 = arith.constant dense<0.000000e+00> : vector<16xf32>
    %36 = vector.multi_reduction <add>, %35, %cst_30 [1] : vector<16x16xf32> to vector<16xf32>
    %37 = vector.shape_cast %36 : vector<16xf32> to vector<16x1xf32>
    %38 = tpu.reciprocal %37 {approx = true} : vector<16x1xf32> -> vector<16x1xf32>
    %39 = vector.broadcast %38 : vector<16x1xf32> to vector<16x16xf32>
    %40 = arith.mulf %35, %39 : vector<16x16xf32>
    %cst_31 = arith.constant dense<0.000000e+00> : vector<16x8xf32>
    %41 = tpu.matmul %40, %28, %cst_31 {dimension_numbers = #tpu.dot_dimension_numbers<[1], [0], [0], [1], [0, 0, 1, 1], [], []>} : vector<16x16xf32>, vector<16x8xf32>, vector<16x8xf32> -> vector<16x8xf32>
    %c0_32 = arith.constant 0 : index
    %c0_33 = arith.constant 0 : index
    %c0_34 = arith.constant 0 : index
    %42 = vector.load %arg9[%c0_32, %c0_33, %c0_34] : memref<8x8x32xf32, #tpu.memory_space<vmem>>, vector<1x8x32xf32>
    %43 = vector.shape_cast %42 : vector<1x8x32xf32> to vector<8x32xf32>
    %cst_35 = arith.constant dense<0.000000e+00> : vector<16x32xf32>
    %44 = tpu.matmul %41, %43, %cst_35 {dimension_numbers = #tpu.dot_dimension_numbers<[1], [0], [0], [1], [0, 0, 1, 1], [], []>} : vector<16x8xf32>, vector<8x32xf32>, vector<16x32xf32> -> vector<16x32xf32>
    %45 = arith.addf %7, %44 : vector<16x32xf32>
    %c1 = arith.constant 1 : index
    %c0_36 = arith.constant 0 : index
    %c0_37 = arith.constant 0 : index
    %46 = vector.load %arg3[%c1, %c0_36, %c0_37] : memref<8x32x8xf32, #tpu.memory_space<vmem>>, vector<1x32x8xf32>
    %47 = vector.shape_cast %46 : vector<1x32x8xf32> to vector<32x8xf32>
    %cst_38 = arith.constant dense<0.000000e+00> : vector<16x8xf32>
    %48 = tpu.matmul %2, %47, %cst_38 {dimension_numbers = #tpu.dot_dimension_numbers<[1], [0], [0], [1], [0, 0, 1, 1], [], []>} : vector<16x32xf32>, vector<32x8xf32>, vector<16x8xf32> -> vector<16x8xf32>
    %c1_39 = arith.constant 1 : index
    %c0_40 = arith.constant 0 : index
    %c0_41 = arith.constant 0 : index
    %49 = vector.load %arg4[%c1_39, %c0_40, %c0_41] : memref<8x1x8xf32, #tpu.memory_space<vmem>>, vector<1x1x8xf32>
    %50 = vector.shape_cast %49 : vector<1x1x8xf32> to vector<1x8xf32>
    %51 = vector.broadcast %50 : vector<1x8xf32> to vector<16x8xf32>
    %52 = arith.addf %48, %51 : vector<16x8xf32>
    %c1_42 = arith.constant 1 : index
    %c0_43 = arith.constant 0 : index
    %c0_44 = arith.constant 0 : index
    %53 = vector.load %arg5[%c1_42, %c0_43, %c0_44] : memref<8x32x8xf32, #tpu.memory_space<vmem>>, vector<1x32x8xf32>
    %54 = vector.shape_cast %53 : vector<1x32x8xf32> to vector<32x8xf32>
    %cst_45 = arith.constant dense<0.000000e+00> : vector<16x8xf32>
    %55 = tpu.matmul %2, %54, %cst_45 {dimension_numbers = #tpu.dot_dimension_numbers<[1], [0], [0], [1], [0, 0, 1, 1], [], []>} : vector<16x32xf32>, vector<32x8xf32>, vector<16x8xf32> -> vector<16x8xf32>
    %c1_46 = arith.constant 1 : index
    %c0_47 = arith.constant 0 : index
    %c0_48 = arith.constant 0 : index
    %56 = vector.load %arg6[%c1_46, %c0_47, %c0_48] : memref<8x1x8xf32, #tpu.memory_space<vmem>>, vector<1x1x8xf32>
    %57 = vector.shape_cast %56 : vector<1x1x8xf32> to vector<1x8xf32>
    %58 = vector.broadcast %57 : vector<1x8xf32> to vector<16x8xf32>
    %59 = arith.addf %55, %58 : vector<16x8xf32>
    %c1_49 = arith.constant 1 : index
    %c0_50 = arith.constant 0 : index
    %c0_51 = arith.constant 0 : index
    %60 = vector.load %arg7[%c1_49, %c0_50, %c0_51] : memref<8x32x8xf32, #tpu.memory_space<vmem>>, vector<1x32x8xf32>
    %61 = vector.shape_cast %60 : vector<1x32x8xf32> to vector<32x8xf32>
    %cst_52 = arith.constant dense<0.000000e+00> : vector<16x8xf32>
    %62 = tpu.matmul %2, %61, %cst_52 {dimension_numbers = #tpu.dot_dimension_numbers<[1], [0], [0], [1], [0, 0, 1, 1], [], []>} : vector<16x32xf32>, vector<32x8xf32>, vector<16x8xf32> -> vector<16x8xf32>
    %c1_53 = arith.constant 1 : index
    %c0_54 = arith.constant 0 : index
    %c0_55 = arith.constant 0 : index
    %63 = vector.load %arg8[%c1_53, %c0_54, %c0_55] : memref<8x1x8xf32, #tpu.memory_space<vmem>>, vector<1x1x8xf32>
    %64 = vector.shape_cast %63 : vector<1x1x8xf32> to vector<1x8xf32>
    %65 = vector.broadcast %64 : vector<1x8xf32> to vector<16x8xf32>
    %66 = arith.addf %62, %65 : vector<16x8xf32>
    "tpu.trace_start"() <{level = 10 : i32, message = "qd,kd->qk"}> : () -> ()
    %cst_56 = arith.constant dense<0.000000e+00> : vector<16x16xf32>
    %67 = tpu.matmul %52, %59, %cst_56 {dimension_numbers = #tpu.dot_dimension_numbers<[1], [1], [0], [0], [0, 0, 1, 0], [], []>} : vector<16x8xf32>, vector<16x8xf32>, vector<16x16xf32> -> vector<16x16xf32>
    "tpu.trace_stop"() : () -> ()
    %68 = arith.addf %67, %3 : vector<16x16xf32>
    %cst_57 = arith.constant dense<0xFF800000> : vector<16xf32>
    %69 = vector.multi_reduction <maximumf>, %68, %cst_57 [1] : vector<16x16xf32> to vector<16xf32>
    %70 = vector.shape_cast %69 : vector<16xf32> to vector<16x1xf32>
    %71 = vector.broadcast %70 : vector<16x1xf32> to vector<16x16xf32>
    %72 = arith.subf %68, %71 : vector<16x16xf32>
    %73 = math.exp %72 : vector<16x16xf32>
    %cst_58 = arith.constant dense<0.000000e+00> : vector<16xf32>
    %74 = vector.multi_reduction <add>, %73, %cst_58 [1] : vector<16x16xf32> to vector<16xf32>
    %75 = vector.shape_cast %74 : vector<16xf32> to vector<16x1xf32>
    %76 = tpu.reciprocal %75 {approx = true} : vector<16x1xf32> -> vector<16x1xf32>
    %77 = vector.broadcast %76 : vector<16x1xf32> to vector<16x16xf32>
    %78 = arith.mulf %73, %77 : vector<16x16xf32>
    %cst_59 = arith.constant dense<0.000000e+00> : vector<16x8xf32>
    %79 = tpu.matmul %78, %66, %cst_59 {dimension_numbers = #tpu.dot_dimension_numbers<[1], [0], [0], [1], [0, 0, 1, 1], [], []>} : vector<16x16xf32>, vector<16x8xf32>, vector<16x8xf32> -> vector<16x8xf32>
    %c1_60 = arith.constant 1 : index
    %c0_61 = arith.constant 0 : index
    %c0_62 = arith.constant 0 : index
    %80 = vector.load %arg9[%c1_60, %c0_61, %c0_62] : memref<8x8x32xf32, #tpu.memory_space<vmem>>, vector<1x8x32xf32>
    %81 = vector.shape_cast %80 : vector<1x8x32xf32> to vector<8x32xf32>
    %cst_63 = arith.constant dense<0.000000e+00> : vector<16x32xf32>
    %82 = tpu.matmul %79, %81, %cst_63 {dimension_numbers = #tpu.dot_dimension_numbers<[1], [0], [0], [1], [0, 0, 1, 1], [], []>} : vector<16x8xf32>, vector<8x32xf32>, vector<16x32xf32> -> vector<16x32xf32>
    %83 = arith.addf %45, %82 : vector<16x32xf32>
    %c2 = arith.constant 2 : index
    %c0_64 = arith.constant 0 : index
    %c0_65 = arith.constant 0 : index
    %84 = vector.load %arg3[%c2, %c0_64, %c0_65] : memref<8x32x8xf32, #tpu.memory_space<vmem>>, vector<1x32x8xf32>
    %85 = vector.shape_cast %84 : vector<1x32x8xf32> to vector<32x8xf32>
    %cst_66 = arith.constant dense<0.000000e+00> : vector<16x8xf32>
    %86 = tpu.matmul %2, %85, %cst_66 {dimension_numbers = #tpu.dot_dimension_numbers<[1], [0], [0], [1], [0, 0, 1, 1], [], []>} : vector<16x32xf32>, vector<32x8xf32>, vector<16x8xf32> -> vector<16x8xf32>
    %c2_67 = arith.constant 2 : index
    %c0_68 = arith.constant 0 : index
    %c0_69 = arith.constant 0 : index
    %87 = vector.load %arg4[%c2_67, %c0_68, %c0_69] : memref<8x1x8xf32, #tpu.memory_space<vmem>>, vector<1x1x8xf32>
    %88 = vector.shape_cast %87 : vector<1x1x8xf32> to vector<1x8xf32>
    %89 = vector.broadcast %88 : vector<1x8xf32> to vector<16x8xf32>
    %90 = arith.addf %86, %89 : vector<16x8xf32>
    %c2_70 = arith.constant 2 : index
    %c0_71 = arith.constant 0 : index
    %c0_72 = arith.constant 0 : index
    %91 = vector.load %arg5[%c2_70, %c0_71, %c0_72] : memref<8x32x8xf32, #tpu.memory_space<vmem>>, vector<1x32x8xf32>
    %92 = vector.shape_cast %91 : vector<1x32x8xf32> to vector<32x8xf32>
    %cst_73 = arith.constant dense<0.000000e+00> : vector<16x8xf32>
    %93 = tpu.matmul %2, %92, %cst_73 {dimension_numbers = #tpu.dot_dimension_numbers<[1], [0], [0], [1], [0, 0, 1, 1], [], []>} : vector<16x32xf32>, vector<32x8xf32>, vector<16x8xf32> -> vector<16x8xf32>
    %c2_74 = arith.constant 2 : index
    %c0_75 = arith.constant 0 : index
    %c0_76 = arith.constant 0 : index
    %94 = vector.load %arg6[%c2_74, %c0_75, %c0_76] : memref<8x1x8xf32, #tpu.memory_space<vmem>>, vector<1x1x8xf32>
    %95 = vector.shape_cast %94 : vector<1x1x8xf32> to vector<1x8xf32>
    %96 = vector.broadcast %95 : vector<1x8xf32> to vector<16x8xf32>
    %97 = arith.addf %93, %96 : vector<16x8xf32>
    %c2_77 = arith.constant 2 : index
    %c0_78 = arith.constant 0 : index
    %c0_79 = arith.constant 0 : index
    %98 = vector.load %arg7[%c2_77, %c0_78, %c0_79] : memref<8x32x8xf32, #tpu.memory_space<vmem>>, vector<1x32x8xf32>
    %99 = vector.shape_cast %98 : vector<1x32x8xf32> to vector<32x8xf32>
    %cst_80 = arith.constant dense<0.000000e+00> : vector<16x8xf32>
    %100 = tpu.matmul %2, %99, %cst_80 {dimension_numbers = #tpu.dot_dimension_numbers<[1], [0], [0], [1], [0, 0, 1, 1], [], []>} : vector<16x32xf32>, vector<32x8xf32>, vector<16x8xf32> -> vector<16x8xf32>
    %c2_81 = arith.constant 2 : index
    %c0_82 = arith.constant 0 : index
    %c0_83 = arith.constant 0 : index
    %101 = vector.load %arg8[%c2_81, %c0_82, %c0_83] : memref<8x1x8xf32, #tpu.memory_space<vmem>>, vector<1x1x8xf32>
    %102 = vector.shape_cast %101 : vector<1x1x8xf32> to vector<1x8xf32>
    %103 = vector.broadcast %102 : vector<1x8xf32> to vector<16x8xf32>
    %104 = arith.addf %100, %103 : vector<16x8xf32>
    "tpu.trace_start"() <{level = 10 : i32, message = "qd,kd->qk"}> : () -> ()
    %cst_84 = arith.constant dense<0.000000e+00> : vector<16x16xf32>
    %105 = tpu.matmul %90, %97, %cst_84 {dimension_numbers = #tpu.dot_dimension_numbers<[1], [1], [0], [0], [0, 0, 1, 0], [], []>} : vector<16x8xf32>, vector<16x8xf32>, vector<16x16xf32> -> vector<16x16xf32>
    "tpu.trace_stop"() : () -> ()
    %106 = arith.addf %105, %3 : vector<16x16xf32>
    %cst_85 = arith.constant dense<0xFF800000> : vector<16xf32>
    %107 = vector.multi_reduction <maximumf>, %106, %cst_85 [1] : vector<16x16xf32> to vector<16xf32>
    %108 = vector.shape_cast %107 : vector<16xf32> to vector<16x1xf32>
    %109 = vector.broadcast %108 : vector<16x1xf32> to vector<16x16xf32>
    %110 = arith.subf %106, %109 : vector<16x16xf32>
    %111 = math.exp %110 : vector<16x16xf32>
    %cst_86 = arith.constant dense<0.000000e+00> : vector<16xf32>
    %112 = vector.multi_reduction <add>, %111, %cst_86 [1] : vector<16x16xf32> to vector<16xf32>
    %113 = vector.shape_cast %112 : vector<16xf32> to vector<16x1xf32>
    %114 = tpu.reciprocal %113 {approx = true} : vector<16x1xf32> -> vector<16x1xf32>
    %115 = vector.broadcast %114 : vector<16x1xf32> to vector<16x16xf32>
    %116 = arith.mulf %111, %115 : vector<16x16xf32>
    %cst_87 = arith.constant dense<0.000000e+00> : vector<16x8xf32>
    %117 = tpu.matmul %116, %104, %cst_87 {dimension_numbers = #tpu.dot_dimension_numbers<[1], [0], [0], [1], [0, 0, 1, 1], [], []>} : vector<16x16xf32>, vector<16x8xf32>, vector<16x8xf32> -> vector<16x8xf32>
    %c2_88 = arith.constant 2 : index
    %c0_89 = arith.constant 0 : index
    %c0_90 = arith.constant 0 : index
    %118 = vector.load %arg9[%c2_88, %c0_89, %c0_90] : memref<8x8x32xf32, #tpu.memory_space<vmem>>, vector<1x8x32xf32>
    %119 = vector.shape_cast %118 : vector<1x8x32xf32> to vector<8x32xf32>
    %cst_91 = arith.constant dense<0.000000e+00> : vector<16x32xf32>
    %120 = tpu.matmul %117, %119, %cst_91 {dimension_numbers = #tpu.dot_dimension_numbers<[1], [0], [0], [1], [0, 0, 1, 1], [], []>} : vector<16x8xf32>, vector<8x32xf32>, vector<16x32xf32> -> vector<16x32xf32>
    %121 = arith.addf %83, %120 : vector<16x32xf32>
    %c3 = arith.constant 3 : index
    %c0_92 = arith.constant 0 : index
    %c0_93 = arith.constant 0 : index
    %122 = vector.load %arg3[%c3, %c0_92, %c0_93] : memref<8x32x8xf32, #tpu.memory_space<vmem>>, vector<1x32x8xf32>
    %123 = vector.shape_cast %122 : vector<1x32x8xf32> to vector<32x8xf32>
    %cst_94 = arith.constant dense<0.000000e+00> : vector<16x8xf32>
    %124 = tpu.matmul %2, %123, %cst_94 {dimension_numbers = #tpu.dot_dimension_numbers<[1], [0], [0], [1], [0, 0, 1, 1], [], []>} : vector<16x32xf32>, vector<32x8xf32>, vector<16x8xf32> -> vector<16x8xf32>
    %c3_95 = arith.constant 3 : index
    %c0_96 = arith.constant 0 : index
    %c0_97 = arith.constant 0 : index
    %125 = vector.load %arg4[%c3_95, %c0_96, %c0_97] : memref<8x1x8xf32, #tpu.memory_space<vmem>>, vector<1x1x8xf32>
    %126 = vector.shape_cast %125 : vector<1x1x8xf32> to vector<1x8xf32>
    %127 = vector.broadcast %126 : vector<1x8xf32> to vector<16x8xf32>
    %128 = arith.addf %124, %127 : vector<16x8xf32>
    %c3_98 = arith.constant 3 : index
    %c0_99 = arith.constant 0 : index
    %c0_100 = arith.constant 0 : index
    %129 = vector.load %arg5[%c3_98, %c0_99, %c0_100] : memref<8x32x8xf32, #tpu.memory_space<vmem>>, vector<1x32x8xf32>
    %130 = vector.shape_cast %129 : vector<1x32x8xf32> to vector<32x8xf32>
    %cst_101 = arith.constant dense<0.000000e+00> : vector<16x8xf32>
    %131 = tpu.matmul %2, %130, %cst_101 {dimension_numbers = #tpu.dot_dimension_numbers<[1], [0], [0], [1], [0, 0, 1, 1], [], []>} : vector<16x32xf32>, vector<32x8xf32>, vector<16x8xf32> -> vector<16x8xf32>
    %c3_102 = arith.constant 3 : index
    %c0_103 = arith.constant 0 : index
    %c0_104 = arith.constant 0 : index
    %132 = vector.load %arg6[%c3_102, %c0_103, %c0_104] : memref<8x1x8xf32, #tpu.memory_space<vmem>>, vector<1x1x8xf32>
    %133 = vector.shape_cast %132 : vector<1x1x8xf32> to vector<1x8xf32>
    %134 = vector.broadcast %133 : vector<1x8xf32> to vector<16x8xf32>
    %135 = arith.addf %131, %134 : vector<16x8xf32>
    %c3_105 = arith.constant 3 : index
    %c0_106 = arith.constant 0 : index
    %c0_107 = arith.constant 0 : index
    %136 = vector.load %arg7[%c3_105, %c0_106, %c0_107] : memref<8x32x8xf32, #tpu.memory_space<vmem>>, vector<1x32x8xf32>
    %137 = vector.shape_cast %136 : vector<1x32x8xf32> to vector<32x8xf32>
    %cst_108 = arith.constant dense<0.000000e+00> : vector<16x8xf32>
    %138 = tpu.matmul %2, %137, %cst_108 {dimension_numbers = #tpu.dot_dimension_numbers<[1], [0], [0], [1], [0, 0, 1, 1], [], []>} : vector<16x32xf32>, vector<32x8xf32>, vector<16x8xf32> -> vector<16x8xf32>
    %c3_109 = arith.constant 3 : index
    %c0_110 = arith.constant 0 : index
    %c0_111 = arith.constant 0 : index
    %139 = vector.load %arg8[%c3_109, %c0_110, %c0_111] : memref<8x1x8xf32, #tpu.memory_space<vmem>>, vector<1x1x8xf32>
    %140 = vector.shape_cast %139 : vector<1x1x8xf32> to vector<1x8xf32>
    %141 = vector.broadcast %140 : vector<1x8xf32> to vector<16x8xf32>
    %142 = arith.addf %138, %141 : vector<16x8xf32>
    "tpu.trace_start"() <{level = 10 : i32, message = "qd,kd->qk"}> : () -> ()
    %cst_112 = arith.constant dense<0.000000e+00> : vector<16x16xf32>
    %143 = tpu.matmul %128, %135, %cst_112 {dimension_numbers = #tpu.dot_dimension_numbers<[1], [1], [0], [0], [0, 0, 1, 0], [], []>} : vector<16x8xf32>, vector<16x8xf32>, vector<16x16xf32> -> vector<16x16xf32>
    "tpu.trace_stop"() : () -> ()
    %144 = arith.addf %143, %3 : vector<16x16xf32>
    %cst_113 = arith.constant dense<0xFF800000> : vector<16xf32>
    %145 = vector.multi_reduction <maximumf>, %144, %cst_113 [1] : vector<16x16xf32> to vector<16xf32>
    %146 = vector.shape_cast %145 : vector<16xf32> to vector<16x1xf32>
    %147 = vector.broadcast %146 : vector<16x1xf32> to vector<16x16xf32>
    %148 = arith.subf %144, %147 : vector<16x16xf32>
    %149 = math.exp %148 : vector<16x16xf32>
    %cst_114 = arith.constant dense<0.000000e+00> : vector<16xf32>
    %150 = vector.multi_reduction <add>, %149, %cst_114 [1] : vector<16x16xf32> to vector<16xf32>
    %151 = vector.shape_cast %150 : vector<16xf32> to vector<16x1xf32>
    %152 = tpu.reciprocal %151 {approx = true} : vector<16x1xf32> -> vector<16x1xf32>
    %153 = vector.broadcast %152 : vector<16x1xf32> to vector<16x16xf32>
    %154 = arith.mulf %149, %153 : vector<16x16xf32>
    %cst_115 = arith.constant dense<0.000000e+00> : vector<16x8xf32>
    %155 = tpu.matmul %154, %142, %cst_115 {dimension_numbers = #tpu.dot_dimension_numbers<[1], [0], [0], [1], [0, 0, 1, 1], [], []>} : vector<16x16xf32>, vector<16x8xf32>, vector<16x8xf32> -> vector<16x8xf32>
    %c3_116 = arith.constant 3 : index
    %c0_117 = arith.constant 0 : index
    %c0_118 = arith.constant 0 : index
    %156 = vector.load %arg9[%c3_116, %c0_117, %c0_118] : memref<8x8x32xf32, #tpu.memory_space<vmem>>, vector<1x8x32xf32>
    %157 = vector.shape_cast %156 : vector<1x8x32xf32> to vector<8x32xf32>
    %cst_119 = arith.constant dense<0.000000e+00> : vector<16x32xf32>
    %158 = tpu.matmul %155, %157, %cst_119 {dimension_numbers = #tpu.dot_dimension_numbers<[1], [0], [0], [1], [0, 0, 1, 1], [], []>} : vector<16x8xf32>, vector<8x32xf32>, vector<16x32xf32> -> vector<16x32xf32>
    %159 = arith.addf %121, %158 : vector<16x32xf32>
    %160 = arith.addf %2, %159 : vector<16x32xf32>
    %c0_120 = arith.constant 0 : index
    %c0_121 = arith.constant 0 : index
    %c0_122 = arith.constant 0 : index
    %161 = vector.load %arg11[%c0_120, %c0_121, %c0_122] : memref<2x1x32xf32, #tpu.memory_space<vmem>>, vector<1x1x32xf32>
    %162 = vector.shape_cast %161 : vector<1x1x32xf32> to vector<1x32xf32>
    %c0_123 = arith.constant 0 : index
    %c0_124 = arith.constant 0 : index
    %c0_125 = arith.constant 0 : index
    %163 = vector.load %arg12[%c0_123, %c0_124, %c0_125] : memref<2x1x32xf32, #tpu.memory_space<vmem>>, vector<1x1x32xf32>
    %164 = vector.shape_cast %163 : vector<1x1x32xf32> to vector<1x32xf32>
    %cst_126 = arith.constant dense<0.000000e+00> : vector<16xf32>
    %165 = vector.multi_reduction <add>, %160, %cst_126 [1] : vector<16x32xf32> to vector<16xf32>
    %166 = vector.shape_cast %165 : vector<16xf32> to vector<16x1xf32>
    %cst_127 = arith.constant 3.200000e+01 : f32
    %167 = vector.broadcast %cst_127 : f32 to vector<16x1xf32>
    %168 = arith.divf %166, %167 : vector<16x1xf32>
    %169 = vector.broadcast %168 : vector<16x1xf32> to vector<16x32xf32>
    %170 = arith.subf %160, %169 : vector<16x32xf32>
    %171 = arith.mulf %170, %170 : vector<16x32xf32>
    %cst_128 = arith.constant dense<0.000000e+00> : vector<16xf32>
    %172 = vector.multi_reduction <add>, %171, %cst_128 [1] : vector<16x32xf32> to vector<16xf32>
    %173 = vector.shape_cast %172 : vector<16xf32> to vector<16x1xf32>
    %cst_129 = arith.constant 3.200000e+01 : f32
    %174 = vector.broadcast %cst_129 : f32 to vector<16x1xf32>
    %175 = arith.divf %173, %174 : vector<16x1xf32>
    %176 = vector.broadcast %168 : vector<16x1xf32> to vector<16x32xf32>
    %177 = arith.subf %160, %176 : vector<16x32xf32>
    %cst_130 = arith.constant 9.99999974E-6 : f32
    %178 = vector.broadcast %cst_130 : f32 to vector<16x1xf32>
    %179 = arith.addf %175, %178 : vector<16x1xf32>
    %180 = math.rsqrt %179 : vector<16x1xf32>
    %181 = vector.broadcast %180 : vector<16x1xf32> to vector<16x32xf32>
    %182 = arith.mulf %177, %181 : vector<16x32xf32>
    %183 = vector.broadcast %162 : vector<1x32xf32> to vector<16x32xf32>
    %184 = arith.mulf %182, %183 : vector<16x32xf32>
    %185 = vector.broadcast %164 : vector<1x32xf32> to vector<16x32xf32>
    %186 = arith.addf %184, %185 : vector<16x32xf32>
    %c0_131 = arith.constant 0 : index
    %c0_132 = arith.constant 0 : index
    %c0_133 = arith.constant 0 : index
    %187 = vector.load %arg13[%c0_131, %c0_132, %c0_133] : memref<2x32x128xf32, #tpu.memory_space<vmem>>, vector<1x32x128xf32>
    %188 = vector.shape_cast %187 : vector<1x32x128xf32> to vector<32x128xf32>
    %cst_134 = arith.constant dense<0.000000e+00> : vector<16x128xf32>
    %189 = tpu.matmul %186, %188, %cst_134 {dimension_numbers = #tpu.dot_dimension_numbers<[1], [0], [0], [1], [0, 0, 1, 1], [], []>} : vector<16x32xf32>, vector<32x128xf32>, vector<16x128xf32> -> vector<16x128xf32>
    %c0_135 = arith.constant 0 : index
    %c0_136 = arith.constant 0 : index
    %c0_137 = arith.constant 0 : index
    %190 = vector.load %arg14[%c0_135, %c0_136, %c0_137] : memref<2x1x128xf32, #tpu.memory_space<vmem>>, vector<1x1x128xf32>
    %191 = vector.shape_cast %190 : vector<1x1x128xf32> to vector<1x128xf32>
    %192 = vector.broadcast %191 : vector<1x128xf32> to vector<16x128xf32>
    %193 = arith.addf %189, %192 : vector<16x128xf32>
    %cst_138 = arith.constant 0.000000e+00 : f32
    %194 = vector.broadcast %cst_138 : f32 to vector<16x128xf32>
    %195 = arith.maximumf %193, %194 : vector<16x128xf32>
    %c0_139 = arith.constant 0 : index
    %c0_140 = arith.constant 0 : index
    %c0_141 = arith.constant 0 : index
    %196 = vector.load %arg15[%c0_139, %c0_140, %c0_141] : memref<2x128x32xf32, #tpu.memory_space<vmem>>, vector<1x128x32xf32>
    %197 = vector.shape_cast %196 : vector<1x128x32xf32> to vector<128x32xf32>
    %cst_142 = arith.constant dense<0.000000e+00> : vector<16x32xf32>
    %198 = tpu.matmul %195, %197, %cst_142 {dimension_numbers = #tpu.dot_dimension_numbers<[1], [0], [0], [1], [0, 0, 1, 1], [], []>} : vector<16x128xf32>, vector<128x32xf32>, vector<16x32xf32> -> vector<16x32xf32>
    %c0_143 = arith.constant 0 : index
    %c0_144 = arith.constant 0 : index
    %c0_145 = arith.constant 0 : index
    %199 = vector.load %arg16[%c0_143, %c0_144, %c0_145] : memref<2x1x32xf32, #tpu.memory_space<vmem>>, vector<1x1x32xf32>
    %200 = vector.shape_cast %199 : vector<1x1x32xf32> to vector<1x32xf32>
    %201 = vector.broadcast %200 : vector<1x32xf32> to vector<16x32xf32>
    %202 = arith.addf %198, %201 : vector<16x32xf32>
    %203 = arith.addf %186, %202 : vector<16x32xf32>
    %c0_146 = arith.constant 0 : index
    %c0_147 = arith.constant 0 : index
    %c0_148 = arith.constant 0 : index
    %204 = vector.load %arg17[%c0_146, %c0_147, %c0_148] : memref<2x1x32xf32, #tpu.memory_space<vmem>>, vector<1x1x32xf32>
    %205 = vector.shape_cast %204 : vector<1x1x32xf32> to vector<1x32xf32>
    %c0_149 = arith.constant 0 : index
    %c0_150 = arith.constant 0 : index
    %c0_151 = arith.constant 0 : index
    %206 = vector.load %arg18[%c0_149, %c0_150, %c0_151] : memref<2x1x32xf32, #tpu.memory_space<vmem>>, vector<1x1x32xf32>
    %207 = vector.shape_cast %206 : vector<1x1x32xf32> to vector<1x32xf32>
    %cst_152 = arith.constant dense<0.000000e+00> : vector<16xf32>
    %208 = vector.multi_reduction <add>, %203, %cst_152 [1] : vector<16x32xf32> to vector<16xf32>
    %209 = vector.shape_cast %208 : vector<16xf32> to vector<16x1xf32>
    %cst_153 = arith.constant 3.200000e+01 : f32
    %210 = vector.broadcast %cst_153 : f32 to vector<16x1xf32>
    %211 = arith.divf %209, %210 : vector<16x1xf32>
    %212 = vector.broadcast %211 : vector<16x1xf32> to vector<16x32xf32>
    %213 = arith.subf %203, %212 : vector<16x32xf32>
    %214 = arith.mulf %213, %213 : vector<16x32xf32>
    %cst_154 = arith.constant dense<0.000000e+00> : vector<16xf32>
    %215 = vector.multi_reduction <add>, %214, %cst_154 [1] : vector<16x32xf32> to vector<16xf32>
    %216 = vector.shape_cast %215 : vector<16xf32> to vector<16x1xf32>
    %cst_155 = arith.constant 3.200000e+01 : f32
    %217 = vector.broadcast %cst_155 : f32 to vector<16x1xf32>
    %218 = arith.divf %216, %217 : vector<16x1xf32>
    %219 = vector.broadcast %211 : vector<16x1xf32> to vector<16x32xf32>
    %220 = arith.subf %203, %219 : vector<16x32xf32>
    %cst_156 = arith.constant 9.99999974E-6 : f32
    %221 = vector.broadcast %cst_156 : f32 to vector<16x1xf32>
    %222 = arith.addf %218, %221 : vector<16x1xf32>
    %223 = math.rsqrt %222 : vector<16x1xf32>
    %224 = vector.broadcast %223 : vector<16x1xf32> to vector<16x32xf32>
    %225 = arith.mulf %220, %224 : vector<16x32xf32>
    %226 = vector.broadcast %205 : vector<1x32xf32> to vector<16x32xf32>
    %227 = arith.mulf %225, %226 : vector<16x32xf32>
    %228 = vector.broadcast %207 : vector<1x32xf32> to vector<16x32xf32>
    %229 = arith.addf %227, %228 : vector<16x32xf32>
    %c1_157 = arith.constant 1 : index
    %c0_158 = arith.constant 0 : index
    %c0_159 = arith.constant 0 : index
    %230 = vector.load %arg10[%c1_157, %c0_158, %c0_159] : memref<2x1x32xf32, #tpu.memory_space<vmem>>, vector<1x1x32xf32>
    %231 = vector.shape_cast %230 : vector<1x1x32xf32> to vector<1x32xf32>
    %232 = vector.shape_cast %231 : vector<1x32xf32> to vector<1x32xf32>
    %233 = vector.broadcast %232 : vector<1x32xf32> to vector<16x32xf32>
    %c4 = arith.constant 4 : index
    %c0_160 = arith.constant 0 : index
    %c0_161 = arith.constant 0 : index
    %234 = vector.load %arg3[%c4, %c0_160, %c0_161] : memref<8x32x8xf32, #tpu.memory_space<vmem>>, vector<1x32x8xf32>
    %235 = vector.shape_cast %234 : vector<1x32x8xf32> to vector<32x8xf32>
    %cst_162 = arith.constant dense<0.000000e+00> : vector<16x8xf32>
    %236 = tpu.matmul %229, %235, %cst_162 {dimension_numbers = #tpu.dot_dimension_numbers<[1], [0], [0], [1], [0, 0, 1, 1], [], []>} : vector<16x32xf32>, vector<32x8xf32>, vector<16x8xf32> -> vector<16x8xf32>
    %c4_163 = arith.constant 4 : index
    %c0_164 = arith.constant 0 : index
    %c0_165 = arith.constant 0 : index
    %237 = vector.load %arg4[%c4_163, %c0_164, %c0_165] : memref<8x1x8xf32, #tpu.memory_space<vmem>>, vector<1x1x8xf32>
    %238 = vector.shape_cast %237 : vector<1x1x8xf32> to vector<1x8xf32>
    %239 = vector.broadcast %238 : vector<1x8xf32> to vector<16x8xf32>
    %240 = arith.addf %236, %239 : vector<16x8xf32>
    %c4_166 = arith.constant 4 : index
    %c0_167 = arith.constant 0 : index
    %c0_168 = arith.constant 0 : index
    %241 = vector.load %arg5[%c4_166, %c0_167, %c0_168] : memref<8x32x8xf32, #tpu.memory_space<vmem>>, vector<1x32x8xf32>
    %242 = vector.shape_cast %241 : vector<1x32x8xf32> to vector<32x8xf32>
    %cst_169 = arith.constant dense<0.000000e+00> : vector<16x8xf32>
    %243 = tpu.matmul %229, %242, %cst_169 {dimension_numbers = #tpu.dot_dimension_numbers<[1], [0], [0], [1], [0, 0, 1, 1], [], []>} : vector<16x32xf32>, vector<32x8xf32>, vector<16x8xf32> -> vector<16x8xf32>
    %c4_170 = arith.constant 4 : index
    %c0_171 = arith.constant 0 : index
    %c0_172 = arith.constant 0 : index
    %244 = vector.load %arg6[%c4_170, %c0_171, %c0_172] : memref<8x1x8xf32, #tpu.memory_space<vmem>>, vector<1x1x8xf32>
    %245 = vector.shape_cast %244 : vector<1x1x8xf32> to vector<1x8xf32>
    %246 = vector.broadcast %245 : vector<1x8xf32> to vector<16x8xf32>
    %247 = arith.addf %243, %246 : vector<16x8xf32>
    %c4_173 = arith.constant 4 : index
    %c0_174 = arith.constant 0 : index
    %c0_175 = arith.constant 0 : index
    %248 = vector.load %arg7[%c4_173, %c0_174, %c0_175] : memref<8x32x8xf32, #tpu.memory_space<vmem>>, vector<1x32x8xf32>
    %249 = vector.shape_cast %248 : vector<1x32x8xf32> to vector<32x8xf32>
    %cst_176 = arith.constant dense<0.000000e+00> : vector<16x8xf32>
    %250 = tpu.matmul %229, %249, %cst_176 {dimension_numbers = #tpu.dot_dimension_numbers<[1], [0], [0], [1], [0, 0, 1, 1], [], []>} : vector<16x32xf32>, vector<32x8xf32>, vector<16x8xf32> -> vector<16x8xf32>
    %c4_177 = arith.constant 4 : index
    %c0_178 = arith.constant 0 : index
    %c0_179 = arith.constant 0 : index
    %251 = vector.load %arg8[%c4_177, %c0_178, %c0_179] : memref<8x1x8xf32, #tpu.memory_space<vmem>>, vector<1x1x8xf32>
    %252 = vector.shape_cast %251 : vector<1x1x8xf32> to vector<1x8xf32>
    %253 = vector.broadcast %252 : vector<1x8xf32> to vector<16x8xf32>
    %254 = arith.addf %250, %253 : vector<16x8xf32>
    "tpu.trace_start"() <{level = 10 : i32, message = "qd,kd->qk"}> : () -> ()
    %cst_180 = arith.constant dense<0.000000e+00> : vector<16x16xf32>
    %255 = tpu.matmul %240, %247, %cst_180 {dimension_numbers = #tpu.dot_dimension_numbers<[1], [1], [0], [0], [0, 0, 1, 0], [], []>} : vector<16x8xf32>, vector<16x8xf32>, vector<16x16xf32> -> vector<16x16xf32>
    "tpu.trace_stop"() : () -> ()
    %256 = arith.addf %255, %3 : vector<16x16xf32>
    %cst_181 = arith.constant dense<0xFF800000> : vector<16xf32>
    %257 = vector.multi_reduction <maximumf>, %256, %cst_181 [1] : vector<16x16xf32> to vector<16xf32>
    %258 = vector.shape_cast %257 : vector<16xf32> to vector<16x1xf32>
    %259 = vector.broadcast %258 : vector<16x1xf32> to vector<16x16xf32>
    %260 = arith.subf %256, %259 : vector<16x16xf32>
    %261 = math.exp %260 : vector<16x16xf32>
    %cst_182 = arith.constant dense<0.000000e+00> : vector<16xf32>
    %262 = vector.multi_reduction <add>, %261, %cst_182 [1] : vector<16x16xf32> to vector<16xf32>
    %263 = vector.shape_cast %262 : vector<16xf32> to vector<16x1xf32>
    %264 = tpu.reciprocal %263 {approx = true} : vector<16x1xf32> -> vector<16x1xf32>
    %265 = vector.broadcast %264 : vector<16x1xf32> to vector<16x16xf32>
    %266 = arith.mulf %261, %265 : vector<16x16xf32>
    %cst_183 = arith.constant dense<0.000000e+00> : vector<16x8xf32>
    %267 = tpu.matmul %266, %254, %cst_183 {dimension_numbers = #tpu.dot_dimension_numbers<[1], [0], [0], [1], [0, 0, 1, 1], [], []>} : vector<16x16xf32>, vector<16x8xf32>, vector<16x8xf32> -> vector<16x8xf32>
    %c4_184 = arith.constant 4 : index
    %c0_185 = arith.constant 0 : index
    %c0_186 = arith.constant 0 : index
    %268 = vector.load %arg9[%c4_184, %c0_185, %c0_186] : memref<8x8x32xf32, #tpu.memory_space<vmem>>, vector<1x8x32xf32>
    %269 = vector.shape_cast %268 : vector<1x8x32xf32> to vector<8x32xf32>
    %cst_187 = arith.constant dense<0.000000e+00> : vector<16x32xf32>
    %270 = tpu.matmul %267, %269, %cst_187 {dimension_numbers = #tpu.dot_dimension_numbers<[1], [0], [0], [1], [0, 0, 1, 1], [], []>} : vector<16x8xf32>, vector<8x32xf32>, vector<16x32xf32> -> vector<16x32xf32>
    %271 = arith.addf %233, %270 : vector<16x32xf32>
    %c5 = arith.constant 5 : index
    %c0_188 = arith.constant 0 : index
    %c0_189 = arith.constant 0 : index
    %272 = vector.load %arg3[%c5, %c0_188, %c0_189] : memref<8x32x8xf32, #tpu.memory_space<vmem>>, vector<1x32x8xf32>
    %273 = vector.shape_cast %272 : vector<1x32x8xf32> to vector<32x8xf32>
    %cst_190 = arith.constant dense<0.000000e+00> : vector<16x8xf32>
    %274 = tpu.matmul %229, %273, %cst_190 {dimension_numbers = #tpu.dot_dimension_numbers<[1], [0], [0], [1], [0, 0, 1, 1], [], []>} : vector<16x32xf32>, vector<32x8xf32>, vector<16x8xf32> -> vector<16x8xf32>
    %c5_191 = arith.constant 5 : index
    %c0_192 = arith.constant 0 : index
    %c0_193 = arith.constant 0 : index
    %275 = vector.load %arg4[%c5_191, %c0_192, %c0_193] : memref<8x1x8xf32, #tpu.memory_space<vmem>>, vector<1x1x8xf32>
    %276 = vector.shape_cast %275 : vector<1x1x8xf32> to vector<1x8xf32>
    %277 = vector.broadcast %276 : vector<1x8xf32> to vector<16x8xf32>
    %278 = arith.addf %274, %277 : vector<16x8xf32>
    %c5_194 = arith.constant 5 : index
    %c0_195 = arith.constant 0 : index
    %c0_196 = arith.constant 0 : index
    %279 = vector.load %arg5[%c5_194, %c0_195, %c0_196] : memref<8x32x8xf32, #tpu.memory_space<vmem>>, vector<1x32x8xf32>
    %280 = vector.shape_cast %279 : vector<1x32x8xf32> to vector<32x8xf32>
    %cst_197 = arith.constant dense<0.000000e+00> : vector<16x8xf32>
    %281 = tpu.matmul %229, %280, %cst_197 {dimension_numbers = #tpu.dot_dimension_numbers<[1], [0], [0], [1], [0, 0, 1, 1], [], []>} : vector<16x32xf32>, vector<32x8xf32>, vector<16x8xf32> -> vector<16x8xf32>
    %c5_198 = arith.constant 5 : index
    %c0_199 = arith.constant 0 : index
    %c0_200 = arith.constant 0 : index
    %282 = vector.load %arg6[%c5_198, %c0_199, %c0_200] : memref<8x1x8xf32, #tpu.memory_space<vmem>>, vector<1x1x8xf32>
    %283 = vector.shape_cast %282 : vector<1x1x8xf32> to vector<1x8xf32>
    %284 = vector.broadcast %283 : vector<1x8xf32> to vector<16x8xf32>
    %285 = arith.addf %281, %284 : vector<16x8xf32>
    %c5_201 = arith.constant 5 : index
    %c0_202 = arith.constant 0 : index
    %c0_203 = arith.constant 0 : index
    %286 = vector.load %arg7[%c5_201, %c0_202, %c0_203] : memref<8x32x8xf32, #tpu.memory_space<vmem>>, vector<1x32x8xf32>
    %287 = vector.shape_cast %286 : vector<1x32x8xf32> to vector<32x8xf32>
    %cst_204 = arith.constant dense<0.000000e+00> : vector<16x8xf32>
    %288 = tpu.matmul %229, %287, %cst_204 {dimension_numbers = #tpu.dot_dimension_numbers<[1], [0], [0], [1], [0, 0, 1, 1], [], []>} : vector<16x32xf32>, vector<32x8xf32>, vector<16x8xf32> -> vector<16x8xf32>
    %c5_205 = arith.constant 5 : index
    %c0_206 = arith.constant 0 : index
    %c0_207 = arith.constant 0 : index
    %289 = vector.load %arg8[%c5_205, %c0_206, %c0_207] : memref<8x1x8xf32, #tpu.memory_space<vmem>>, vector<1x1x8xf32>
    %290 = vector.shape_cast %289 : vector<1x1x8xf32> to vector<1x8xf32>
    %291 = vector.broadcast %290 : vector<1x8xf32> to vector<16x8xf32>
    %292 = arith.addf %288, %291 : vector<16x8xf32>
    "tpu.trace_start"() <{level = 10 : i32, message = "qd,kd->qk"}> : () -> ()
    %cst_208 = arith.constant dense<0.000000e+00> : vector<16x16xf32>
    %293 = tpu.matmul %278, %285, %cst_208 {dimension_numbers = #tpu.dot_dimension_numbers<[1], [1], [0], [0], [0, 0, 1, 0], [], []>} : vector<16x8xf32>, vector<16x8xf32>, vector<16x16xf32> -> vector<16x16xf32>
    "tpu.trace_stop"() : () -> ()
    %294 = arith.addf %293, %3 : vector<16x16xf32>
    %cst_209 = arith.constant dense<0xFF800000> : vector<16xf32>
    %295 = vector.multi_reduction <maximumf>, %294, %cst_209 [1] : vector<16x16xf32> to vector<16xf32>
    %296 = vector.shape_cast %295 : vector<16xf32> to vector<16x1xf32>
    %297 = vector.broadcast %296 : vector<16x1xf32> to vector<16x16xf32>
    %298 = arith.subf %294, %297 : vector<16x16xf32>
    %299 = math.exp %298 : vector<16x16xf32>
    %cst_210 = arith.constant dense<0.000000e+00> : vector<16xf32>
    %300 = vector.multi_reduction <add>, %299, %cst_210 [1] : vector<16x16xf32> to vector<16xf32>
    %301 = vector.shape_cast %300 : vector<16xf32> to vector<16x1xf32>
    %302 = tpu.reciprocal %301 {approx = true} : vector<16x1xf32> -> vector<16x1xf32>
    %303 = vector.broadcast %302 : vector<16x1xf32> to vector<16x16xf32>
    %304 = arith.mulf %299, %303 : vector<16x16xf32>
    %cst_211 = arith.constant dense<0.000000e+00> : vector<16x8xf32>
    %305 = tpu.matmul %304, %292, %cst_211 {dimension_numbers = #tpu.dot_dimension_numbers<[1], [0], [0], [1], [0, 0, 1, 1], [], []>} : vector<16x16xf32>, vector<16x8xf32>, vector<16x8xf32> -> vector<16x8xf32>
    %c5_212 = arith.constant 5 : index
    %c0_213 = arith.constant 0 : index
    %c0_214 = arith.constant 0 : index
    %306 = vector.load %arg9[%c5_212, %c0_213, %c0_214] : memref<8x8x32xf32, #tpu.memory_space<vmem>>, vector<1x8x32xf32>
    %307 = vector.shape_cast %306 : vector<1x8x32xf32> to vector<8x32xf32>
    %cst_215 = arith.constant dense<0.000000e+00> : vector<16x32xf32>
    %308 = tpu.matmul %305, %307, %cst_215 {dimension_numbers = #tpu.dot_dimension_numbers<[1], [0], [0], [1], [0, 0, 1, 1], [], []>} : vector<16x8xf32>, vector<8x32xf32>, vector<16x32xf32> -> vector<16x32xf32>
    %309 = arith.addf %271, %308 : vector<16x32xf32>
    %c6 = arith.constant 6 : index
    %c0_216 = arith.constant 0 : index
    %c0_217 = arith.constant 0 : index
    %310 = vector.load %arg3[%c6, %c0_216, %c0_217] : memref<8x32x8xf32, #tpu.memory_space<vmem>>, vector<1x32x8xf32>
    %311 = vector.shape_cast %310 : vector<1x32x8xf32> to vector<32x8xf32>
    %cst_218 = arith.constant dense<0.000000e+00> : vector<16x8xf32>
    %312 = tpu.matmul %229, %311, %cst_218 {dimension_numbers = #tpu.dot_dimension_numbers<[1], [0], [0], [1], [0, 0, 1, 1], [], []>} : vector<16x32xf32>, vector<32x8xf32>, vector<16x8xf32> -> vector<16x8xf32>
    %c6_219 = arith.constant 6 : index
    %c0_220 = arith.constant 0 : index
    %c0_221 = arith.constant 0 : index
    %313 = vector.load %arg4[%c6_219, %c0_220, %c0_221] : memref<8x1x8xf32, #tpu.memory_space<vmem>>, vector<1x1x8xf32>
    %314 = vector.shape_cast %313 : vector<1x1x8xf32> to vector<1x8xf32>
    %315 = vector.broadcast %314 : vector<1x8xf32> to vector<16x8xf32>
    %316 = arith.addf %312, %315 : vector<16x8xf32>
    %c6_222 = arith.constant 6 : index
    %c0_223 = arith.constant 0 : index
    %c0_224 = arith.constant 0 : index
    %317 = vector.load %arg5[%c6_222, %c0_223, %c0_224] : memref<8x32x8xf32, #tpu.memory_space<vmem>>, vector<1x32x8xf32>
    %318 = vector.shape_cast %317 : vector<1x32x8xf32> to vector<32x8xf32>
    %cst_225 = arith.constant dense<0.000000e+00> : vector<16x8xf32>
    %319 = tpu.matmul %229, %318, %cst_225 {dimension_numbers = #tpu.dot_dimension_numbers<[1], [0], [0], [1], [0, 0, 1, 1], [], []>} : vector<16x32xf32>, vector<32x8xf32>, vector<16x8xf32> -> vector<16x8xf32>
    %c6_226 = arith.constant 6 : index
    %c0_227 = arith.constant 0 : index
    %c0_228 = arith.constant 0 : index
    %320 = vector.load %arg6[%c6_226, %c0_227, %c0_228] : memref<8x1x8xf32, #tpu.memory_space<vmem>>, vector<1x1x8xf32>
    %321 = vector.shape_cast %320 : vector<1x1x8xf32> to vector<1x8xf32>
    %322 = vector.broadcast %321 : vector<1x8xf32> to vector<16x8xf32>
    %323 = arith.addf %319, %322 : vector<16x8xf32>
    %c6_229 = arith.constant 6 : index
    %c0_230 = arith.constant 0 : index
    %c0_231 = arith.constant 0 : index
    %324 = vector.load %arg7[%c6_229, %c0_230, %c0_231] : memref<8x32x8xf32, #tpu.memory_space<vmem>>, vector<1x32x8xf32>
    %325 = vector.shape_cast %324 : vector<1x32x8xf32> to vector<32x8xf32>
    %cst_232 = arith.constant dense<0.000000e+00> : vector<16x8xf32>
    %326 = tpu.matmul %229, %325, %cst_232 {dimension_numbers = #tpu.dot_dimension_numbers<[1], [0], [0], [1], [0, 0, 1, 1], [], []>} : vector<16x32xf32>, vector<32x8xf32>, vector<16x8xf32> -> vector<16x8xf32>
    %c6_233 = arith.constant 6 : index
    %c0_234 = arith.constant 0 : index
    %c0_235 = arith.constant 0 : index
    %327 = vector.load %arg8[%c6_233, %c0_234, %c0_235] : memref<8x1x8xf32, #tpu.memory_space<vmem>>, vector<1x1x8xf32>
    %328 = vector.shape_cast %327 : vector<1x1x8xf32> to vector<1x8xf32>
    %329 = vector.broadcast %328 : vector<1x8xf32> to vector<16x8xf32>
    %330 = arith.addf %326, %329 : vector<16x8xf32>
    "tpu.trace_start"() <{level = 10 : i32, message = "qd,kd->qk"}> : () -> ()
    %cst_236 = arith.constant dense<0.000000e+00> : vector<16x16xf32>
    %331 = tpu.matmul %316, %323, %cst_236 {dimension_numbers = #tpu.dot_dimension_numbers<[1], [1], [0], [0], [0, 0, 1, 0], [], []>} : vector<16x8xf32>, vector<16x8xf32>, vector<16x16xf32> -> vector<16x16xf32>
    "tpu.trace_stop"() : () -> ()
    %332 = arith.addf %331, %3 : vector<16x16xf32>
    %cst_237 = arith.constant dense<0xFF800000> : vector<16xf32>
    %333 = vector.multi_reduction <maximumf>, %332, %cst_237 [1] : vector<16x16xf32> to vector<16xf32>
    %334 = vector.shape_cast %333 : vector<16xf32> to vector<16x1xf32>
    %335 = vector.broadcast %334 : vector<16x1xf32> to vector<16x16xf32>
    %336 = arith.subf %332, %335 : vector<16x16xf32>
    %337 = math.exp %336 : vector<16x16xf32>
    %cst_238 = arith.constant dense<0.000000e+00> : vector<16xf32>
    %338 = vector.multi_reduction <add>, %337, %cst_238 [1] : vector<16x16xf32> to vector<16xf32>
    %339 = vector.shape_cast %338 : vector<16xf32> to vector<16x1xf32>
    %340 = tpu.reciprocal %339 {approx = true} : vector<16x1xf32> -> vector<16x1xf32>
    %341 = vector.broadcast %340 : vector<16x1xf32> to vector<16x16xf32>
    %342 = arith.mulf %337, %341 : vector<16x16xf32>
    %cst_239 = arith.constant dense<0.000000e+00> : vector<16x8xf32>
    %343 = tpu.matmul %342, %330, %cst_239 {dimension_numbers = #tpu.dot_dimension_numbers<[1], [0], [0], [1], [0, 0, 1, 1], [], []>} : vector<16x16xf32>, vector<16x8xf32>, vector<16x8xf32> -> vector<16x8xf32>
    %c6_240 = arith.constant 6 : index
    %c0_241 = arith.constant 0 : index
    %c0_242 = arith.constant 0 : index
    %344 = vector.load %arg9[%c6_240, %c0_241, %c0_242] : memref<8x8x32xf32, #tpu.memory_space<vmem>>, vector<1x8x32xf32>
    %345 = vector.shape_cast %344 : vector<1x8x32xf32> to vector<8x32xf32>
    %cst_243 = arith.constant dense<0.000000e+00> : vector<16x32xf32>
    %346 = tpu.matmul %343, %345, %cst_243 {dimension_numbers = #tpu.dot_dimension_numbers<[1], [0], [0], [1], [0, 0, 1, 1], [], []>} : vector<16x8xf32>, vector<8x32xf32>, vector<16x32xf32> -> vector<16x32xf32>
    %347 = arith.addf %309, %346 : vector<16x32xf32>
    %c7 = arith.constant 7 : index
    %c0_244 = arith.constant 0 : index
    %c0_245 = arith.constant 0 : index
    %348 = vector.load %arg3[%c7, %c0_244, %c0_245] : memref<8x32x8xf32, #tpu.memory_space<vmem>>, vector<1x32x8xf32>
    %349 = vector.shape_cast %348 : vector<1x32x8xf32> to vector<32x8xf32>
    %cst_246 = arith.constant dense<0.000000e+00> : vector<16x8xf32>
    %350 = tpu.matmul %229, %349, %cst_246 {dimension_numbers = #tpu.dot_dimension_numbers<[1], [0], [0], [1], [0, 0, 1, 1], [], []>} : vector<16x32xf32>, vector<32x8xf32>, vector<16x8xf32> -> vector<16x8xf32>
    %c7_247 = arith.constant 7 : index
    %c0_248 = arith.constant 0 : index
    %c0_249 = arith.constant 0 : index
    %351 = vector.load %arg4[%c7_247, %c0_248, %c0_249] : memref<8x1x8xf32, #tpu.memory_space<vmem>>, vector<1x1x8xf32>
    %352 = vector.shape_cast %351 : vector<1x1x8xf32> to vector<1x8xf32>
    %353 = vector.broadcast %352 : vector<1x8xf32> to vector<16x8xf32>
    %354 = arith.addf %350, %353 : vector<16x8xf32>
    %c7_250 = arith.constant 7 : index
    %c0_251 = arith.constant 0 : index
    %c0_252 = arith.constant 0 : index
    %355 = vector.load %arg5[%c7_250, %c0_251, %c0_252] : memref<8x32x8xf32, #tpu.memory_space<vmem>>, vector<1x32x8xf32>
    %356 = vector.shape_cast %355 : vector<1x32x8xf32> to vector<32x8xf32>
    %cst_253 = arith.constant dense<0.000000e+00> : vector<16x8xf32>
    %357 = tpu.matmul %229, %356, %cst_253 {dimension_numbers = #tpu.dot_dimension_numbers<[1], [0], [0], [1], [0, 0, 1, 1], [], []>} : vector<16x32xf32>, vector<32x8xf32>, vector<16x8xf32> -> vector<16x8xf32>
    %c7_254 = arith.constant 7 : index
    %c0_255 = arith.constant 0 : index
    %c0_256 = arith.constant 0 : index
    %358 = vector.load %arg6[%c7_254, %c0_255, %c0_256] : memref<8x1x8xf32, #tpu.memory_space<vmem>>, vector<1x1x8xf32>
    %359 = vector.shape_cast %358 : vector<1x1x8xf32> to vector<1x8xf32>
    %360 = vector.broadcast %359 : vector<1x8xf32> to vector<16x8xf32>
    %361 = arith.addf %357, %360 : vector<16x8xf32>
    %c7_257 = arith.constant 7 : index
    %c0_258 = arith.constant 0 : index
    %c0_259 = arith.constant 0 : index
    %362 = vector.load %arg7[%c7_257, %c0_258, %c0_259] : memref<8x32x8xf32, #tpu.memory_space<vmem>>, vector<1x32x8xf32>
    %363 = vector.shape_cast %362 : vector<1x32x8xf32> to vector<32x8xf32>
    %cst_260 = arith.constant dense<0.000000e+00> : vector<16x8xf32>
    %364 = tpu.matmul %229, %363, %cst_260 {dimension_numbers = #tpu.dot_dimension_numbers<[1], [0], [0], [1], [0, 0, 1, 1], [], []>} : vector<16x32xf32>, vector<32x8xf32>, vector<16x8xf32> -> vector<16x8xf32>
    %c7_261 = arith.constant 7 : index
    %c0_262 = arith.constant 0 : index
    %c0_263 = arith.constant 0 : index
    %365 = vector.load %arg8[%c7_261, %c0_262, %c0_263] : memref<8x1x8xf32, #tpu.memory_space<vmem>>, vector<1x1x8xf32>
    %366 = vector.shape_cast %365 : vector<1x1x8xf32> to vector<1x8xf32>
    %367 = vector.broadcast %366 : vector<1x8xf32> to vector<16x8xf32>
    %368 = arith.addf %364, %367 : vector<16x8xf32>
    "tpu.trace_start"() <{level = 10 : i32, message = "qd,kd->qk"}> : () -> ()
    %cst_264 = arith.constant dense<0.000000e+00> : vector<16x16xf32>
    %369 = tpu.matmul %354, %361, %cst_264 {dimension_numbers = #tpu.dot_dimension_numbers<[1], [1], [0], [0], [0, 0, 1, 0], [], []>} : vector<16x8xf32>, vector<16x8xf32>, vector<16x16xf32> -> vector<16x16xf32>
    "tpu.trace_stop"() : () -> ()
    %370 = arith.addf %369, %3 : vector<16x16xf32>
    %cst_265 = arith.constant dense<0xFF800000> : vector<16xf32>
    %371 = vector.multi_reduction <maximumf>, %370, %cst_265 [1] : vector<16x16xf32> to vector<16xf32>
    %372 = vector.shape_cast %371 : vector<16xf32> to vector<16x1xf32>
    %373 = vector.broadcast %372 : vector<16x1xf32> to vector<16x16xf32>
    %374 = arith.subf %370, %373 : vector<16x16xf32>
    %375 = math.exp %374 : vector<16x16xf32>
    %cst_266 = arith.constant dense<0.000000e+00> : vector<16xf32>
    %376 = vector.multi_reduction <add>, %375, %cst_266 [1] : vector<16x16xf32> to vector<16xf32>
    %377 = vector.shape_cast %376 : vector<16xf32> to vector<16x1xf32>
    %378 = tpu.reciprocal %377 {approx = true} : vector<16x1xf32> -> vector<16x1xf32>
    %379 = vector.broadcast %378 : vector<16x1xf32> to vector<16x16xf32>
    %380 = arith.mulf %375, %379 : vector<16x16xf32>
    %cst_267 = arith.constant dense<0.000000e+00> : vector<16x8xf32>
    %381 = tpu.matmul %380, %368, %cst_267 {dimension_numbers = #tpu.dot_dimension_numbers<[1], [0], [0], [1], [0, 0, 1, 1], [], []>} : vector<16x16xf32>, vector<16x8xf32>, vector<16x8xf32> -> vector<16x8xf32>
    %c7_268 = arith.constant 7 : index
    %c0_269 = arith.constant 0 : index
    %c0_270 = arith.constant 0 : index
    %382 = vector.load %arg9[%c7_268, %c0_269, %c0_270] : memref<8x8x32xf32, #tpu.memory_space<vmem>>, vector<1x8x32xf32>
    %383 = vector.shape_cast %382 : vector<1x8x32xf32> to vector<8x32xf32>
    %cst_271 = arith.constant dense<0.000000e+00> : vector<16x32xf32>
    %384 = tpu.matmul %381, %383, %cst_271 {dimension_numbers = #tpu.dot_dimension_numbers<[1], [0], [0], [1], [0, 0, 1, 1], [], []>} : vector<16x8xf32>, vector<8x32xf32>, vector<16x32xf32> -> vector<16x32xf32>
    %385 = arith.addf %347, %384 : vector<16x32xf32>
    %386 = arith.addf %229, %385 : vector<16x32xf32>
    %c1_272 = arith.constant 1 : index
    %c0_273 = arith.constant 0 : index
    %c0_274 = arith.constant 0 : index
    %387 = vector.load %arg11[%c1_272, %c0_273, %c0_274] : memref<2x1x32xf32, #tpu.memory_space<vmem>>, vector<1x1x32xf32>
    %388 = vector.shape_cast %387 : vector<1x1x32xf32> to vector<1x32xf32>
    %c1_275 = arith.constant 1 : index
    %c0_276 = arith.constant 0 : index
    %c0_277 = arith.constant 0 : index
    %389 = vector.load %arg12[%c1_275, %c0_276, %c0_277] : memref<2x1x32xf32, #tpu.memory_space<vmem>>, vector<1x1x32xf32>
    %390 = vector.shape_cast %389 : vector<1x1x32xf32> to vector<1x32xf32>
    %cst_278 = arith.constant dense<0.000000e+00> : vector<16xf32>
    %391 = vector.multi_reduction <add>, %386, %cst_278 [1] : vector<16x32xf32> to vector<16xf32>
    %392 = vector.shape_cast %391 : vector<16xf32> to vector<16x1xf32>
    %cst_279 = arith.constant 3.200000e+01 : f32
    %393 = vector.broadcast %cst_279 : f32 to vector<16x1xf32>
    %394 = arith.divf %392, %393 : vector<16x1xf32>
    %395 = vector.broadcast %394 : vector<16x1xf32> to vector<16x32xf32>
    %396 = arith.subf %386, %395 : vector<16x32xf32>
    %397 = arith.mulf %396, %396 : vector<16x32xf32>
    %cst_280 = arith.constant dense<0.000000e+00> : vector<16xf32>
    %398 = vector.multi_reduction <add>, %397, %cst_280 [1] : vector<16x32xf32> to vector<16xf32>
    %399 = vector.shape_cast %398 : vector<16xf32> to vector<16x1xf32>
    %cst_281 = arith.constant 3.200000e+01 : f32
    %400 = vector.broadcast %cst_281 : f32 to vector<16x1xf32>
    %401 = arith.divf %399, %400 : vector<16x1xf32>
    %402 = vector.broadcast %394 : vector<16x1xf32> to vector<16x32xf32>
    %403 = arith.subf %386, %402 : vector<16x32xf32>
    %cst_282 = arith.constant 9.99999974E-6 : f32
    %404 = vector.broadcast %cst_282 : f32 to vector<16x1xf32>
    %405 = arith.addf %401, %404 : vector<16x1xf32>
    %406 = math.rsqrt %405 : vector<16x1xf32>
    %407 = vector.broadcast %406 : vector<16x1xf32> to vector<16x32xf32>
    %408 = arith.mulf %403, %407 : vector<16x32xf32>
    %409 = vector.broadcast %388 : vector<1x32xf32> to vector<16x32xf32>
    %410 = arith.mulf %408, %409 : vector<16x32xf32>
    %411 = vector.broadcast %390 : vector<1x32xf32> to vector<16x32xf32>
    %412 = arith.addf %410, %411 : vector<16x32xf32>
    %c1_283 = arith.constant 1 : index
    %c0_284 = arith.constant 0 : index
    %c0_285 = arith.constant 0 : index
    %413 = vector.load %arg13[%c1_283, %c0_284, %c0_285] : memref<2x32x128xf32, #tpu.memory_space<vmem>>, vector<1x32x128xf32>
    %414 = vector.shape_cast %413 : vector<1x32x128xf32> to vector<32x128xf32>
    %cst_286 = arith.constant dense<0.000000e+00> : vector<16x128xf32>
    %415 = tpu.matmul %412, %414, %cst_286 {dimension_numbers = #tpu.dot_dimension_numbers<[1], [0], [0], [1], [0, 0, 1, 1], [], []>} : vector<16x32xf32>, vector<32x128xf32>, vector<16x128xf32> -> vector<16x128xf32>
    %c1_287 = arith.constant 1 : index
    %c0_288 = arith.constant 0 : index
    %c0_289 = arith.constant 0 : index
    %416 = vector.load %arg14[%c1_287, %c0_288, %c0_289] : memref<2x1x128xf32, #tpu.memory_space<vmem>>, vector<1x1x128xf32>
    %417 = vector.shape_cast %416 : vector<1x1x128xf32> to vector<1x128xf32>
    %418 = vector.broadcast %417 : vector<1x128xf32> to vector<16x128xf32>
    %419 = arith.addf %415, %418 : vector<16x128xf32>
    %cst_290 = arith.constant 0.000000e+00 : f32
    %420 = vector.broadcast %cst_290 : f32 to vector<16x128xf32>
    %421 = arith.maximumf %419, %420 : vector<16x128xf32>
    %c1_291 = arith.constant 1 : index
    %c0_292 = arith.constant 0 : index
    %c0_293 = arith.constant 0 : index
    %422 = vector.load %arg15[%c1_291, %c0_292, %c0_293] : memref<2x128x32xf32, #tpu.memory_space<vmem>>, vector<1x128x32xf32>
    %423 = vector.shape_cast %422 : vector<1x128x32xf32> to vector<128x32xf32>
    %cst_294 = arith.constant dense<0.000000e+00> : vector<16x32xf32>
    %424 = tpu.matmul %421, %423, %cst_294 {dimension_numbers = #tpu.dot_dimension_numbers<[1], [0], [0], [1], [0, 0, 1, 1], [], []>} : vector<16x128xf32>, vector<128x32xf32>, vector<16x32xf32> -> vector<16x32xf32>
    %c1_295 = arith.constant 1 : index
    %c0_296 = arith.constant 0 : index
    %c0_297 = arith.constant 0 : index
    %425 = vector.load %arg16[%c1_295, %c0_296, %c0_297] : memref<2x1x32xf32, #tpu.memory_space<vmem>>, vector<1x1x32xf32>
    %426 = vector.shape_cast %425 : vector<1x1x32xf32> to vector<1x32xf32>
    %427 = vector.broadcast %426 : vector<1x32xf32> to vector<16x32xf32>
    %428 = arith.addf %424, %427 : vector<16x32xf32>
    %429 = arith.addf %412, %428 : vector<16x32xf32>
    %c1_298 = arith.constant 1 : index
    %c0_299 = arith.constant 0 : index
    %c0_300 = arith.constant 0 : index
    %430 = vector.load %arg17[%c1_298, %c0_299, %c0_300] : memref<2x1x32xf32, #tpu.memory_space<vmem>>, vector<1x1x32xf32>
    %431 = vector.shape_cast %430 : vector<1x1x32xf32> to vector<1x32xf32>
    %c1_301 = arith.constant 1 : index
    %c0_302 = arith.constant 0 : index
    %c0_303 = arith.constant 0 : index
    %432 = vector.load %arg18[%c1_301, %c0_302, %c0_303] : memref<2x1x32xf32, #tpu.memory_space<vmem>>, vector<1x1x32xf32>
    %433 = vector.shape_cast %432 : vector<1x1x32xf32> to vector<1x32xf32>
    %cst_304 = arith.constant dense<0.000000e+00> : vector<16xf32>
    %434 = vector.multi_reduction <add>, %429, %cst_304 [1] : vector<16x32xf32> to vector<16xf32>
    %435 = vector.shape_cast %434 : vector<16xf32> to vector<16x1xf32>
    %cst_305 = arith.constant 3.200000e+01 : f32
    %436 = vector.broadcast %cst_305 : f32 to vector<16x1xf32>
    %437 = arith.divf %435, %436 : vector<16x1xf32>
    %438 = vector.broadcast %437 : vector<16x1xf32> to vector<16x32xf32>
    %439 = arith.subf %429, %438 : vector<16x32xf32>
    %440 = arith.mulf %439, %439 : vector<16x32xf32>
    %cst_306 = arith.constant dense<0.000000e+00> : vector<16xf32>
    %441 = vector.multi_reduction <add>, %440, %cst_306 [1] : vector<16x32xf32> to vector<16xf32>
    %442 = vector.shape_cast %441 : vector<16xf32> to vector<16x1xf32>
    %cst_307 = arith.constant 3.200000e+01 : f32
    %443 = vector.broadcast %cst_307 : f32 to vector<16x1xf32>
    %444 = arith.divf %442, %443 : vector<16x1xf32>
    %445 = vector.broadcast %437 : vector<16x1xf32> to vector<16x32xf32>
    %446 = arith.subf %429, %445 : vector<16x32xf32>
    %cst_308 = arith.constant 9.99999974E-6 : f32
    %447 = vector.broadcast %cst_308 : f32 to vector<16x1xf32>
    %448 = arith.addf %444, %447 : vector<16x1xf32>
    %449 = math.rsqrt %448 : vector<16x1xf32>
    %450 = vector.broadcast %449 : vector<16x1xf32> to vector<16x32xf32>
    %451 = arith.mulf %446, %450 : vector<16x32xf32>
    %452 = vector.broadcast %431 : vector<1x32xf32> to vector<16x32xf32>
    %453 = arith.mulf %451, %452 : vector<16x32xf32>
    %454 = vector.broadcast %433 : vector<1x32xf32> to vector<16x32xf32>
    %455 = arith.addf %453, %454 : vector<16x32xf32>
    %c0_309 = arith.constant 0 : index
    %c0_310 = arith.constant 0 : index
    %456 = vector.load %arg19[%c0_309, %c0_310] : memref<16x32xf32, #tpu.memory_space<vmem>>, vector<16x32xf32>
    tpu.vector_store %arg19[%c0_309, %c0_310], %455 {strides = array<i32>} : memref<16x32xf32, #tpu.memory_space<vmem>>, vector<16x32xf32>,
    return
  }
}

</mosaic_0001>

<bundles_post_ra>
// kernel: encoder_forward.1
= control target key start
LH: loop header
LB: loop body
LE: loop exit
PB: predicated region body
PF: predicated region fallthrough
CT: control target
= control target key end

     0   :  { %s7545_s0 = inlined_call_operand.vmem [shape: f32[16,32], index: 0, kind: input, shape index: {}]   ;;  %s7546_s1 = inlined_call_operand.vmem [shape: f32[16,32], index: 1, kind: input, shape index: {}]   ;;  %s7547_s2 = inlined_call_operand.vmem [shape: f32[16,16], index: 2, kind: input, shape index: {}]   ;;  %s7548_s3 = inlined_call_operand.vmem [shape: f32[8,32,8], index: 3, kind: input, shape index: {}]   ;;  %s7549_s4 = inlined_call_operand.vmem [shape: f32[8,1,8], index: 4, kind: input, shape index: {}]   ;;  %s7550_s5 = inlined_call_operand.vmem [shape: f32[8,32,8], index: 5, kind: input, shape index: {}]   ;;  %s7551_s6 = inlined_call_operand.vmem [shape: f32[8,1,8], index: 6, kind: input, shape index: {}]   ;;  %s7552_s7 = inlined_call_operand.vmem [shape: f32[8,32,8], index: 7, kind: input, shape index: {}]   ;;  %s7553_s8 = inlined_call_operand.vmem [shape: f32[8,1,8], index: 8, kind: input, shape index: {}]   ;;  %s7554_s9 = inlined_call_operand.vmem [shape: f32[8,8,32], index: 9, kind: input, shape index: {}]   ;;  %s7555_s10 = inlined_call_operand.vmem [shape: f32[2,1,32], index: 10, kind: input, shape index: {}]   ;;  %s7556_s11 = inlined_call_operand.vmem [shape: f32[2,1,32], index: 11, kind: input, shape index: {}]   ;;  %s7557_s12 = inlined_call_operand.vmem [shape: f32[2,1,32], index: 12, kind: input, shape index: {}]   ;;  %s7558_s13 = inlined_call_operand.vmem [shape: f32[2,32,128], index: 13, kind: input, shape index: {}]   ;;  %s7559_s14 = inlined_call_operand.vmem [shape: f32[2,1,128], index: 14, kind: input, shape index: {}]   ;;  %s7560_s15 = inlined_call_operand.vmem [shape: f32[2,128,32], index: 15, kind: input, shape index: {}]   ;;  %s7561_s16 = inlined_call_operand.vmem [shape: f32[2,1,32], index: 16, kind: input, shape index: {}]   ;;  %s7562_s17 = inlined_call_operand.vmem [shape: f32[2,1,32], index: 17, kind: input, shape index: {}]   ;;  %s7563_s18 = inlined_call_operand.vmem [shape: f32[2,1,32], index: 18, kind: input, shape index: {}]   ;;  %s7564_s19 = inlined_call_operand.hbm [shape: f32[16,32], index: 19, kind: output, shape index: {}]  }
   0x1   :  { %7569 = sst [smem:[#allocation5_spill]] %s7545_s0 }
   0x2   :  { %7570 = sst [smem:[#allocation6_spill]] %s7546_s1 }
   0x3   :  { %7571 = sst [smem:[#allocation7_spill]] %s7547_s2 }
   0x4   :  { %7572 = sst [smem:[#allocation8_spill]] %s7548_s3 }
   0x5   :  { %s7573_s20 = sld [smem:[#allocation8_spill]]  ;;  %s7574_s26 = sld [smem:[#allocation5_spill]]  ;;  %vm89_vm0 = vcmask 261120   ;;  %v171_v9 = vld [vmem:[%s7550_s5] sm:$0xff]  ;;  %v172_v10 = vld [vmem:[%s7550_s5 + $0x8] sm:$0xff] }
   0x6   :  { %s7575_s29 = sld [smem:[#allocation6_spill]] }
   0xb   :  { %v78_v0 = vld [vmem:[%s7573_s20] sm:$0xff]  ;;  %v79_v1 = vld [vmem:[%s7573_s20 + $0x8] sm:$0xff]  ;;  %v80_v2 = vld [vmem:[%s7573_s20 + $0x10] sm:$0xff] }
   0xc   :  { %v6082_v3 = vpack.c.bf16 %v79_v1, %v78_v0  ;;  %v81_v4 = vld [vmem:[%s7573_s20 + $0x18] sm:$0xff]  ;;  %v63_v5 = vld [vmem:[%s7574_s26] sm:$0xff]  ;;  %v64_v11 = vld [vmem:[%s7574_s26 + $0x8] sm:$0xff] }
   0xd   :  { %v65_v6 = vld [vmem:[%s7575_s29] sm:$0xff]  ;;  %v6086_v7 = vpack.c.bf16 %v81_v4, %v80_v2  ;;  %v66_v12 = vld [vmem:[%s7575_s29 + $0x8] sm:$0xff] }
   0xe   :  { %v6680_v8 = vadd.f32 %v65_v6, %v63_v5  ;;  %6083 = vmatprep.subr.bf16.mxu0 %v6082_v3 }
   0xf   :  { %6085 = vmatpush3.bf16.msra.mxu0 %v6082_v3 }
  0x10   :  { %5582 = vmatprep.mubr.msk.f32.mxu0 %vm89_vm0, %v6680_v8 }
  0x11   :  { %24 = vsyncpa [#allocation3], 0  ;;  %6087 = vmatprep.subr.bf16.mxu0 %v6086_v7  ;;  %v6090_v13 = vpack.c.bf16 %v172_v10, %v171_v9  ;;  %v173_v14 = vld [vmem:[%s7550_s5 + $0x10] sm:$0xff]  ;;  %v174_v15 = vld [vmem:[%s7550_s5 + $0x18] sm:$0xff]  ;;  %v6702_v16 = vadd.f32 %v66_v12, %v64_v11  ;;  %vm343_vm1 = vcmask 64512   ;;  %s7578_s26 = sld [smem:[#allocation7_spill]] }
  0x12   :  { %v6094_v17 = vpack.c.bf16 %v174_v15, %v173_v14  ;;  %v5002_v18 = vld [vmem:[%s7549_s4] ss:$0 sm:$0xff]  ;;  %vm6721_vm2 = vmpackc.low %vm343_vm1, %vm343_vm1  ;;  %v258_v31 = vld [vmem:[%s7552_s7 + $0x8] sm:$0xff]  ;;  %vm431_vm3 = vcmask 130048   ;;  %s6559_s21 = smov [#allocation2]  }
  0x13   :  { %6089 = vmatpush3.bf16.msra.mxu0 %v6086_v7  ;;  %v5005_v22 = vld [vmem:[%s7551_s6] ss:$0 sm:$0xff]  ;;  %v259_v32 = vld [vmem:[%s7552_s7 + $0x10] sm:$0xff]  ;;  %v260_v34 = vld [vmem:[%s7552_s7 + $0x18] sm:$0xff]  ;;  %s4990_s1 = sshll.u32 %s6559_s21, 4  ;;  %s4991_s1 = int_to_ptr.vmem [resolvable:$true] %s4990_s1 }
  0x14   :  { %6091 = vmatprep.subr.bf16.mxu0 %v6090_v13  ;;  %v257_v30 = vld [vmem:[%s7552_s7] sm:$0xff]  ;;  %v6102_v35 = vpack.c.bf16 %v260_v34, %v259_v32  ;;  %v5028_v61 = vld [vmem:[%s7550_s5 + $0x28] sm:$0xff]  ;;  %v5029_v62 = vld [vmem:[%s7550_s5 + $0x30] sm:$0xff]  ;;  %s6535_s22 = scalar_lea.vmem %s4991_s1, 256  ;;  %p6540_p1 = scmp.lt.s32.totalorder %s4991_s1, %s4991_s1 }
  0x15   :  { %v6098_v33 = vpack.c.bf16 %v258_v31, %v257_v30  ;;  %v5008_v55 = vld [vmem:[%s7553_s8] ss:$0 sm:$0xff]  ;;  %v5030_v0 = vld [vmem:[%s7550_s5 + $0x38] sm:$0xff]  ;;  %v5020_v11 = vld [vmem:[%s7573_s20 + $0x28] sm:$0xff]  ;;  %p6536_p0 = scmp.ne.s32.totalorder %s4991_s1, %s6535_s22  ;;  %p6541_p2 = scmp.lt.s32.totalorder %s6535_s22, %s6535_s22 }
  0x16   :  { %5583 = vmatmul.mubr.msk.f32.vlgmr.msra.gmra.mrb[0].mxu0 %vm89_vm0, %v6702_v16  ;;  %v5027_v60 = vld [vmem:[%s7550_s5 + $0x20] sm:$0xff]  ;;  %v6128_v2 = vpack.c.bf16 %v5030_v0, %v5029_v62  ;;  %v5036_v34 = vld [vmem:[%s7552_s7 + $0x28] sm:$0xff] }
  0x17   :  { %6093 = vmatpush3.bf16.msra.mxu0 %v6090_v13  ;;  %5593 = vmatprep.mubr.msk.f32.mxu0 %vm89_vm0, %v6680_v8  ;;  %v6749_v36 = vld [vmem:[%s7578_s26] sm:$0xff]  ;;  %v6754_v38 = vld [vmem:[%s7578_s26 + $0x8] sm:$0xff]  ;;  %v6124_v63 = vpack.c.bf16 %v5028_v61, %v5027_v60  ;;  %p6542_p3 = por %p6541_p2, %p6540_p1 }
  0x18   :  { %6095 = vmatprep.subr.bf16.mxu0 %v6094_v17  ;;  %v535_v1 = vld [vmem:[%s7554_s9] sm:$0xff] }
  0x19   :  { %v5019_v10 = vld [vmem:[%s7573_s20 + $0x20] sm:$0xff]  ;;  %p6543_p4 = pnand %p6542_p3, %p6536_p0 }
  0x1a   :  { %v6116_v12 = vpack.c.bf16 %v5020_v11, %v5019_v10  ;;  %v5032_v14 = vld [vmem:[%s7551_s6 + $0x1] ss:$0 sm:$0xff]  ;;  %v5053_v11 = vld [vmem:[%s7573_s20 + $0x48] sm:$0xff] }
  0x1b   :  { %6097 = vmatpush3.bf16.msra.mxu0 %v6094_v17  ;;  %v5052_v10 = vld [vmem:[%s7573_s20 + $0x40] sm:$0xff] }
  0x1c   :  { %6099 = vmatprep.subr.bf16.mxu0 %v6098_v33 }
  0x1e   :  { %5594 = vmatmul.mubr.msk.f32.vlgmr.msra.gmra.mrb[2].mxu0 %vm89_vm0, %v6702_v16 }
  0x1f   :  { %5604 = vmatprep.mubr.msk.f32.mxu0 %vm89_vm0, %v6680_v8  ;;  %6101 = vmatpush3.bf16.msra.mxu0 %v6098_v33  ;;  %v5035_v33 = vld [vmem:[%s7552_s7 + $0x20] sm:$0xff] }
  0x20   :  { %6103 = vmatprep.subr.bf16.mxu0 %v6102_v35 }
  0x23   :  { %6105 = vmatpush3.bf16.msra.mxu0 %v6102_v35  ;;  %v5037_v35 = vld [vmem:[%s7552_s7 + $0x30] sm:$0xff] }
  0x26   :  { %5605 = vmatmul.mubr.msk.f32.vlgmr.msra.gmra.mrb[4].mxu0 %vm89_vm0, %v6702_v16 }
  0xe9   :  { %v5584_v19 = vpop.f32.mrb[0].mxu0 }
  0xea   :  { %v162_v20 = vpop.f32.mrb[1].mxu0  ;;  %v168_v29 = vadd.f32 %v5584_v19, %v5002_v18 }
  0xeb   :  { %v163_v21 = vadd.f32 %v5002_v18, %v162_v20  ;;  %v5021_v20 = vld [vmem:[%s7573_s20 + $0x30] sm:$0xff] }
  0xed   :  { %5611 = vmatprep.mubr.msk.f32.mxu1 %vm343_vm1, %v163_v21  ;;  %v5022_v21 = vld [vmem:[%s7573_s20 + $0x38] sm:$0xff] }
  0xf1   :  { %v5595_v23 = vpop.f32.mrb[2].mxu0 }
  0xf2   :  { %v254_v24 = vadd.f32 %v5595_v23, %v5005_v22  ;;  %v248_v25 = vpop.f32.mrb[3].mxu0 }
  0xf3   :  { %v249_v26 = vadd.f32 %v5005_v22, %v248_v25 }
  0xf5   :  { %v6106_v28 = vpack.c.bf16 %v254_v24, %v249_v26  ;;  %v6120_v24 = vpack.c.bf16 %v5022_v21, %v5021_v20 }
  0xf7   :  { %6108 = vmatprep.subr.msk.bf16.mxu1 %vm6721_vm2, %v6106_v28 }
  0xf8   :  { %6111 = vmatpush3.bf16.xpose.msk.msra.mxu1 %vm6721_vm2, %v6106_v28  ;;  %v5024_v28 = vld [vmem:[%s7549_s4 + $0x1] ss:$0 sm:$0xff] }
  0xf9   :  { %v5606_v54 = vpop.f32.mrb[4].mxu0  ;;  %6125 = vmatprep.subr.bf16.mxu1 %v6124_v63 }
  0xfa   :  { %v334_v56 = vpop.f32.mrb[5].mxu0  ;;  %v340_v57 = vadd.f32 %v5606_v54, %v5008_v55 }
  0xfb   :  { %v335_v58 = vadd.f32 %v5008_v55, %v334_v56 }
  0xfd   :  { %v6112_v59 = vpack.c.bf16 %v340_v57, %v335_v58  ;;  %v5040_v58 = vld [vmem:[%s7553_s8 + $0x1] ss:$0 sm:$0xff] }
  0xff   :  { %5612 = vmatmul.mubr.msk.f32.vlgmr.msra.gmra.mrb[0].mxu1 %vm343_vm1, %v168_v29  ;;  %6113 = vmatprep.subr.bf16.mxu0 %v6112_v59 }
 0x100   :  { %5645 = vmatprep.mubr.msk.f32.mxu1 %vm89_vm0, %v6680_v8  ;;  %6115 = vmatpush3.bf16.msra.mxu0 %v6112_v59 }
 0x101   :  { %5621 = vmatprep.subr.mxu0 %v535_v1  ;;  %6127 = vmatpush3.bf16.msra.mxu1 %v6124_v63  ;;  %v5049_v63 = vld [vmem:[%s7554_s9 + $0x8] sm:$0xff] }
 0x102   :  { %6129 = vmatprep.subr.bf16.mxu1 %v6128_v2 }
 0x105   :  { %6131 = vmatpush3.bf16.msra.mxu1 %v6128_v2 }
 0x108   :  { %5646 = vmatmul.mubr.msk.f32.vlgmr.msra.gmra.mrb[2].mxu1 %vm89_vm0, %v6702_v16 }
 0x1d2   :  { %v5613_v37 = vpop.f32.mrb[0].mxu1 }
 0x1d3   :  { %v422_v39 = vpop.f32.mrb[1].mxu1  ;;  %v428_v41 = vadd.f32 %v5613_v37, %v6754_v38  ;;  %v6132_v37 = vpack.c.bf16 %v5036_v34, %v5035_v33 }
 0x1d4   :  { %v423_v40 = vadd.f32 %v422_v39, %v6749_v36  ;;  %v5038_v39 = vld [vmem:[%s7552_s7 + $0x38] sm:$0xff] }
 0x1d5   :  { %v435_v43 = vsel %vm431_vm3, %v428_v41, -inf }
 0x1d6   :  { %v432_v42 = vsel %vm431_vm3, %v423_v40, -inf }
 0x1d7   :  { %433 = vmax.xlane.f32.xlu0 %v432_v42 }
 0x1db   :  { %436 = vmax.xlane.f32.xlu0 %v435_v43  ;;  %v5647_v13 = vpop.f32.mrb[2].mxu1 }
 0x1dc   :  { %v792_v15 = vadd.f32 %v5647_v13, %v5032_v14  ;;  %v786_v17 = vpop.f32.mrb[3].mxu1  ;;  %v5054_v13 = vld [vmem:[%s7573_s20 + $0x50] sm:$0xff] }
 0x1dd   :  { %v787_v18 = vadd.f32 %v5032_v14, %v786_v17  ;;  %v5055_v14 = vld [vmem:[%s7573_s20 + $0x58] sm:$0xff]  ;;  %v5062_v17 = vld [vmem:[%s7550_s5 + $0x50] sm:$0xff] }
 0x1df   :  { %v6140_v19 = vpack.c.bf16 %v792_v15, %v787_v18  ;;  %v6154_v15 = vpack.c.bf16 %v5055_v14, %v5054_v13  ;;  %v5063_v18 = vld [vmem:[%s7550_s5 + $0x58] sm:$0xff]  ;;  %v5085_v13 = vld [vmem:[%s7573_s20 + $0x60] sm:$0xff]  ;;  %v5086_v14 = vld [vmem:[%s7573_s20 + $0x68] sm:$0xff] }
 0x1e0   :  { %v6162_v21 = vpack.c.bf16 %v5063_v18, %v5062_v17  ;;  %v5087_v17 = vld [vmem:[%s7573_s20 + $0x70] sm:$0xff]  ;;  %v5088_v18 = vld [vmem:[%s7573_s20 + $0x78] sm:$0xff] }
 0x1e1   :  { %6142 = vmatprep.subr.msk.bf16.mxu1 %vm6721_vm2, %v6140_v19 }
 0x1e2   :  { %6145 = vmatpush3.bf16.xpose.msk.msra.mxu1 %vm6721_vm2, %v6140_v19 }
 0x1e3   :  { %5673 = vmatprep.subr.mxu1 %v5049_v63 }
 0x264   :  { %v434_v44 = vpop.xlane.xlu0 %433 }
 0x265   :  { %v438_v45 = vsub.f32 %v423_v40, %v434_v44  ;;  %v6136_v40 = vpack.c.bf16 %v5038_v39, %v5037_v35  ;;  %v5069_v39 = vld [vmem:[%s7552_s7 + $0x48] sm:$0xff] }
 0x267   :  { %v440_v46 = vmul.f32 1.442695, %v438_v45 }
 0x268   :  { %v437_v47 = vpop.xlane.xlu0 %436 }
 0x269   :  { %6453 = vpow2.f32 %v440_v46  ;;  %v439_v48 = vsub.f32 %v428_v41, %v437_v47 }
 0x26b   :  { %v442_v49 = vmul.f32 1.442695, %v439_v48 }
 0x26d   :  { %6455 = vpow2.f32 %v442_v49 }
 0x273   :  { %v6454_v50 = vpop.eup %6453 }
 0x274   :  { %v444_v51 = vsel %vm431_vm3, %v6454_v50, 0.0 }
 0x275   :  { %445 = vadd.xlane.f32.xlu1 %v444_v51 }
 0x277   :  { %v6456_v52 = vpop.eup %6455 }
 0x278   :  { %v447_v53 = vsel %vm431_vm3, %v6456_v52, 0.0 }
 0x279   :  { %448 = vadd.xlane.f32.xlu1 %v447_v53 }
 0x302   :  { %v446_v3 = vpop.xlane.xlu1 %445 }
 0x303   :  { %6457 = vrcp.f32 %v446_v3 }
 0x306   :  { %v449_v4 = vpop.xlane.xlu1 %448 }
 0x307   :  { %6459 = vrcp.f32 %v449_v4 }
 0x30d   :  { %v6458_v5 = vpop.eup %6457 }
 0x30e   :  { %v452_v6 = vmul.f32 %v6458_v5, %v6454_v50 }
 0x310   :  { %5618 = vmatprep.mubr.msk.f32.mxu0 %vm431_vm3, %v452_v6  ;;  %v5060_v6 = vld [vmem:[%s7550_s5 + $0x40] sm:$0xff] }
 0x311   :  { %v6460_v7 = vpop.eup %6459 }
 0x312   :  { %v453_v9 = vmul.f32 %v6460_v7, %v6456_v52  ;;  %v5061_v7 = vld [vmem:[%s7550_s5 + $0x48] sm:$0xff] }
 0x314   :  { %5619 = vmatmul.mubr.msk.f32.vlgmr.msra.gmra.mrb[6].mxu0 %vm431_vm3, %v453_v9  ;;  %v6158_v9 = vpack.c.bf16 %v5061_v7, %v5060_v6 }
 0x315   :  { %5622 = vmatpush3.msra.mxu0 %v535_v1 }
 0x316   :  { %6117 = vmatprep.subr.bf16.mxu0 %v6116_v12 }
 0x3e7   :  { %v5620_v22 = vpop.f32.mrb[6].mxu0 }
 0x3e8   :  { %v526_v23 = vpop.f32.mrb[7].mxu0 }
 0x3e9   :  { %5623 = vmatprep.mubr.msk.f32.mxu0 %vm343_vm1, %v526_v23 }
 0x3ea   :  { %5624 = vmatmul.mubr.msk.f32.vlgmr.msra.gmra.mrb[8].mxu0 %vm343_vm1, %v5620_v22  ;;  %v5057_v22 = vld [vmem:[%s7549_s4 + $0x2] ss:$0 sm:$0xff] }
 0x3eb   :  { %6119 = vmatpush3.bf16.msra.mxu0 %v6116_v12  ;;  %5634 = vmatprep.mubr.msk.f32.mxu0 %vm89_vm0, %v6680_v8  ;;  %v6150_v12 = vpack.c.bf16 %v5053_v11, %v5052_v10  ;;  %v5093_v10 = vld [vmem:[%s7550_s5 + $0x60] sm:$0xff]  ;;  %v5094_v11 = vld [vmem:[%s7550_s5 + $0x68] sm:$0xff] }
 0x3ec   :  { %6121 = vmatprep.subr.bf16.mxu0 %v6120_v24 }
 0x3ef   :  { %6123 = vmatpush3.bf16.msra.mxu0 %v6120_v24 }
 0x3f0   :  { %6133 = vmatprep.subr.bf16.mxu0 %v6132_v37 }
 0x3f2   :  { %5635 = vmatmul.mubr.msk.f32.vlgmr.msra.gmra.mrb[10].mxu0 %vm89_vm0, %v6702_v16 }
 0x3f3   :  { %5656 = vmatprep.mubr.msk.f32.mxu0 %vm89_vm0, %v6680_v8  ;;  %6135 = vmatpush3.bf16.msra.mxu0 %v6132_v37  ;;  %v5068_v37 = vld [vmem:[%s7552_s7 + $0x40] sm:$0xff] }
 0x3f4   :  { %6137 = vmatprep.subr.bf16.mxu0 %v6136_v40 }
 0x3f7   :  { %6139 = vmatpush3.bf16.msra.mxu0 %v6136_v40  ;;  %v5070_v40 = vld [vmem:[%s7552_s7 + $0x50] sm:$0xff] }
 0x3fa   :  { %5657 = vmatmul.mubr.msk.f32.vlgmr.msra.gmra.mrb[12].mxu0 %vm89_vm0, %v6702_v16 }
 0x4bd   :  { %v6811_v25 = vpop.f32.mrb[8].mxu0 }
 0x4be   :  { %v6813_v26 = vpop.f32.mrb[9].mxu0 }
 0x4c5   :  { %v5636_v29 = vpop.f32.mrb[10].mxu0 }
 0x4c6   :  { %v698_v30 = vpop.f32.mrb[11].mxu0  ;;  %v704_v32 = vadd.f32 %v5636_v29, %v5024_v28 }
 0x4c7   :  { %v699_v31 = vadd.f32 %v5024_v28, %v698_v30  ;;  %v5065_v30 = vld [vmem:[%s7551_s6 + $0x2] ss:$0 sm:$0xff] }
 0x4c9   :  { %5663 = vmatprep.mubr.msk.f32.mxu1 %vm343_vm1, %v699_v31 }
 0x4ca   :  { %5664 = vmatmul.mubr.msk.f32.vlgmr.msra.gmra.mrb[4].mxu1 %vm343_vm1, %v704_v32 }
 0x4cb   :  { %5674 = vmatpush3.msra.mxu1 %v5049_v63 }
 0x4cc   :  { %6159 = vmatprep.subr.bf16.mxu1 %v6158_v9 }
 0x4cd   :  { %v5658_v57 = vpop.f32.mrb[12].mxu0 }
 0x4ce   :  { %v874_v59 = vpop.f32.mrb[13].mxu0  ;;  %v880_v60 = vadd.f32 %v5658_v57, %v5040_v58 }
 0x4cf   :  { %v875_v61 = vadd.f32 %v5040_v58, %v874_v59 }
 0x4d1   :  { %v6146_v62 = vpack.c.bf16 %v880_v60, %v875_v61  ;;  %v5073_v61 = vld [vmem:[%s7553_s8 + $0x2] ss:$0 sm:$0xff] }
 0x4d3   :  { %6147 = vmatprep.subr.bf16.mxu0 %v6146_v62 }
 0x4d4   :  { %6149 = vmatpush3.bf16.msra.mxu0 %v6146_v62 }
 0x4d5   :  { %6151 = vmatprep.subr.bf16.mxu0 %v6150_v12 }
 0x59d   :  { %v5665_v41 = vpop.f32.mrb[4].mxu1 }
 0x59e   :  { %v967_v42 = vadd.f32 %v5665_v41, %v6754_v38  ;;  %v961_v43 = vpop.f32.mrb[5].mxu1  ;;  %v6166_v41 = vpack.c.bf16 %v5069_v39, %v5068_v37 }
 0x59f   :  { %v962_v44 = vadd.f32 %v961_v43, %v6749_v36 }
 0x5a0   :  { %v973_v45 = vsel %vm431_vm3, %v967_v42, -inf }
 0x5a1   :  { %974 = vmax.xlane.f32.xlu1 %v973_v45  ;;  %v970_v46 = vsel %vm431_vm3, %v962_v44, -inf }
 0x5a2   :  { %971 = vmax.xlane.f32.xlu0 %v970_v46 }
 0x62e   :  { %v975_v47 = vpop.xlane.xlu1 %974 }
 0x62f   :  { %v977_v48 = vsub.f32 %v967_v42, %v975_v47  ;;  %v972_v49 = vpop.xlane.xlu0 %971  ;;  %v5071_v42 = vld [vmem:[%s7552_s7 + $0x58] sm:$0xff] }
 0x630   :  { %v976_v50 = vsub.f32 %v962_v44, %v972_v49  ;;  %v6170_v43 = vpack.c.bf16 %v5071_v42, %v5070_v40  ;;  %v5102_v42 = vld [vmem:[%s7552_s7 + $0x68] sm:$0xff] }
 0x631   :  { %v980_v51 = vmul.f32 1.442695, %v977_v48 }
 0x632   :  { %v978_v52 = vmul.f32 1.442695, %v976_v50 }
 0x633   :  { %6461 = vpow2.f32 %v980_v51 }
 0x634   :  { %6463 = vpow2.f32 %v978_v52 }
 0x63d   :  { %v6462_v53 = vpop.eup %6461 }
 0x63e   :  { %v6464_v54 = vpop.eup %6463  ;;  %v985_v55 = vsel %vm431_vm3, %v6462_v53, 0.0 }
 0x63f   :  { %986 = vadd.xlane.f32.xlu1 %v985_v55  ;;  %v982_v56 = vsel %vm431_vm3, %v6464_v54, 0.0 }
 0x640   :  { %983 = vadd.xlane.f32.xlu0 %v982_v56 }
 0x6cc   :  { %v987_v0 = vpop.xlane.xlu1 %986 }
 0x6cd   :  { %6465 = vrcp.f32 %v987_v0  ;;  %v984_v1 = vpop.xlane.xlu0 %983 }
 0x6ce   :  { %6467 = vrcp.f32 %v984_v1 }
 0x6d7   :  { %v6466_v2 = vpop.eup %6465 }
 0x6d8   :  { %v6468_v3 = vpop.eup %6467  ;;  %v991_v5 = vmul.f32 %v6466_v2, %v6462_v53  ;;  %v5082_v2 = vld [vmem:[%s7554_s9 + $0x10] sm:$0xff] }
 0x6d9   :  { %v990_v4 = vmul.f32 %v6468_v3, %v6464_v54 }
 0x6db   :  { %5670 = vmatprep.mubr.msk.f32.mxu0 %vm431_vm3, %v990_v4 }
 0x6dc   :  { %5671 = vmatmul.mubr.msk.f32.vlgmr.msra.gmra.mrb[14].mxu0 %vm431_vm3, %v991_v5 }
 0x6dd   :  { %5686 = vmatprep.mubr.msk.f32.mxu0 %vm89_vm0, %v6680_v8  ;;  %6153 = vmatpush3.bf16.msra.mxu0 %v6150_v12  ;;  %v6192_v12 = vpack.c.bf16 %v5094_v11, %v5093_v10 }
 0x6de   :  { %6155 = vmatprep.subr.bf16.mxu0 %v6154_v15 }
 0x6e1   :  { %6157 = vmatpush3.bf16.msra.mxu0 %v6154_v15  ;;  %v6184_v15 = vpack.c.bf16 %v5086_v14, %v5085_v13  ;;  %v5001_v13 = vld [vmem:[%s7555_s10] ss:$0 sm:$0xff] }
 0x6e2   :  { %6167 = vmatprep.subr.bf16.mxu0 %v6166_v41  ;;  %v618_v14 = vadd.f32 %v6811_v25, %v5001_v13 }
 0x6e4   :  { %5687 = vmatmul.mubr.msk.f32.vlgmr.msra.gmra.mrb[16].mxu0 %vm89_vm0, %v6702_v16 }
 0x6e5   :  { %5708 = vmatprep.mubr.msk.f32.mxu0 %vm89_vm0, %v6680_v8  ;;  %6169 = vmatpush3.bf16.msra.mxu0 %v6166_v41  ;;  %v5101_v41 = vld [vmem:[%s7552_s7 + $0x60] sm:$0xff] }
 0x6e6   :  { %6171 = vmatprep.subr.bf16.mxu0 %v6170_v43 }
 0x6e9   :  { %6173 = vmatpush3.bf16.msra.mxu0 %v6170_v43  ;;  %v5103_v43 = vld [vmem:[%s7552_s7 + $0x70] sm:$0xff] }
 0x6ec   :  { %5709 = vmatmul.mubr.msk.f32.vlgmr.msra.gmra.mrb[18].mxu0 %vm89_vm0, %v6702_v16 }
 0x7af   :  { %v5672_v19 = vpop.f32.mrb[14].mxu0 }
 0x7b0   :  { %v1064_v20 = vpop.f32.mrb[15].mxu0 }
 0x7b1   :  { %5675 = vmatprep.mubr.msk.f32.mxu1 %vm343_vm1, %v1064_v20  ;;  %v5095_v20 = vld [vmem:[%s7550_s5 + $0x70] sm:$0xff] }
 0x7b2   :  { %5676 = vmatmul.mubr.msk.f32.vlgmr.msra.gmra.mrb[6].mxu1 %vm343_vm1, %v5672_v19  ;;  %v6188_v19 = vpack.c.bf16 %v5088_v18, %v5087_v17 }
 0x7b3   :  { %6161 = vmatpush3.bf16.msra.mxu1 %v6158_v9  ;;  %5697 = vmatprep.mubr.msk.f32.mxu1 %vm89_vm0, %v6680_v8 }
 0x7b4   :  { %6163 = vmatprep.subr.bf16.mxu1 %v6162_v21 }
 0x7b7   :  { %6165 = vmatpush3.bf16.msra.mxu1 %v6162_v21  ;;  %v5688_v23 = vpop.f32.mrb[16].mxu0  ;;  %v5096_v21 = vld [vmem:[%s7550_s5 + $0x78] sm:$0xff] }
 0x7b8   :  { %v1243_v24 = vadd.f32 %v5688_v23, %v5057_v22  ;;  %v1237_v28 = vpop.f32.mrb[17].mxu0 }
 0x7b9   :  { %v1238_v29 = vadd.f32 %v5057_v22, %v1237_v28  ;;  %v5090_v28 = vld [vmem:[%s7549_s4 + $0x3] ss:$0 sm:$0xff] }
 0x7ba   :  { %5698 = vmatmul.mubr.msk.f32.vlgmr.msra.gmra.mrb[8].mxu1 %vm89_vm0, %v6702_v16 }
 0x7bb   :  { %5715 = vmatprep.mubr.msk.f32.mxu1 %vm343_vm1, %v1238_v29 }
 0x7bf   :  { %v5710_v60 = vpop.f32.mrb[18].mxu0 }
 0x7c0   :  { %v1413_v62 = vpop.f32.mrb[19].mxu0  ;;  %v1419_v63 = vadd.f32 %v5710_v60, %v5073_v61 }
 0x7c1   :  { %v1414_v0 = vadd.f32 %v5073_v61, %v1413_v62  ;;  %v5106_v62 = vld [vmem:[%s7553_s8 + $0x3] ss:$0 sm:$0xff] }
 0x7c3   :  { %v6180_v1 = vpack.c.bf16 %v1419_v63, %v1414_v0 }
 0x7c5   :  { %6181 = vmatprep.subr.bf16.mxu0 %v6180_v1 }
 0x7c6   :  { %6183 = vmatpush3.bf16.msra.mxu0 %v6180_v1 }
 0x7c7   :  { %6185 = vmatprep.subr.bf16.mxu0 %v6184_v15 }
 0x88d   :  { %v5699_v31 = vpop.f32.mrb[8].mxu1 }
 0x88e   :  { %v1331_v32 = vadd.f32 %v5699_v31, %v5065_v30  ;;  %v1325_v33 = vpop.f32.mrb[9].mxu1 }
 0x88f   :  { %v1326_v34 = vadd.f32 %v5065_v30, %v1325_v33  ;;  %v5098_v33 = vld [vmem:[%s7551_s6 + $0x3] ss:$0 sm:$0xff] }
 0x891   :  { %v6174_v35 = vpack.c.bf16 %v1331_v32, %v1326_v34 }
 0x893   :  { %6176 = vmatprep.subr.msk.bf16.mxu1 %vm6721_vm2, %v6174_v35 }
 0x894   :  { %6179 = vmatpush3.bf16.xpose.msk.msra.mxu1 %vm6721_vm2, %v6174_v35 }
 0x895   :  { %5725 = vmatprep.subr.mxu1 %v5082_v2 }
 0x89b   :  { %5716 = vmatmul.mubr.msk.f32.vlgmr.msra.gmra.mrb[10].mxu1 %vm343_vm1, %v1243_v24  ;;  %v6196_v24 = vpack.c.bf16 %v5096_v21, %v5095_v20 }
 0x89c   :  { %5726 = vmatpush3.msra.mxu1 %v5082_v2 }
 0x89d   :  { %6193 = vmatprep.subr.bf16.mxu1 %v6192_v12 }
 0x96e   :  { %v5717_v44 = vpop.f32.mrb[10].mxu1 }
 0x96f   :  { %v1506_v45 = vadd.f32 %v5717_v44, %v6754_v38  ;;  %v1500_v46 = vpop.f32.mrb[11].mxu1  ;;  %v6200_v44 = vpack.c.bf16 %v5102_v42, %v5101_v41  ;;  %v2377_v42 = vld [vmem:[%s7560_s15] sm:$0xff] }
 0x970   :  { %v1501_v47 = vadd.f32 %v1500_v46, %v6749_v36 }
 0x971   :  { %v1512_v48 = vsel %vm431_vm3, %v1506_v45, -inf }
 0x972   :  { %1513 = vmax.xlane.f32.xlu1 %v1512_v48  ;;  %v1509_v49 = vsel %vm431_vm3, %v1501_v47, -inf }
 0x973   :  { %1510 = vmax.xlane.f32.xlu0 %v1509_v49 }
 0x9ff   :  { %v1514_v50 = vpop.xlane.xlu1 %1513 }
 0xa00   :  { %v1516_v51 = vsub.f32 %v1506_v45, %v1514_v50  ;;  %v1511_v52 = vpop.xlane.xlu0 %1510  ;;  %v5104_v45 = vld [vmem:[%s7552_s7 + $0x78] sm:$0xff] }
 0xa01   :  { %v1515_v53 = vsub.f32 %v1501_v47, %v1511_v52  ;;  %v6204_v46 = vpack.c.bf16 %v5104_v45, %v5103_v43  ;;  %v2378_v43 = vld [vmem:[%s7560_s15 + $0x8] sm:$0xff] }
 0xa02   :  { %v1519_v54 = vmul.f32 1.442695, %v1516_v51  ;;  %v6226_v45 = vpack.c.bf16 %v2378_v43, %v2377_v42 }
 0xa03   :  { %v1517_v55 = vmul.f32 1.442695, %v1515_v53 }
 0xa04   :  { %6469 = vpow2.f32 %v1519_v54 }
 0xa05   :  { %6471 = vpow2.f32 %v1517_v55 }
 0xa0e   :  { %v6470_v56 = vpop.eup %6469 }
 0xa0f   :  { %v6472_v57 = vpop.eup %6471  ;;  %v1524_v58 = vsel %vm431_vm3, %v6470_v56, 0.0 }
 0xa10   :  { %1525 = vadd.xlane.f32.xlu1 %v1524_v58  ;;  %v1521_v59 = vsel %vm431_vm3, %v6472_v57, 0.0 }
 0xa11   :  { %1522 = vadd.xlane.f32.xlu0 %v1521_v59 }
 0xa9d   :  { %v1526_v3 = vpop.xlane.xlu1 %1525 }
 0xa9e   :  { %6473 = vrcp.f32 %v1526_v3  ;;  %v1523_v4 = vpop.xlane.xlu0 %1522  ;;  %v5115_v3 = vld [vmem:[%s7554_s9 + $0x18] sm:$0xff] }
 0xa9f   :  { %6475 = vrcp.f32 %v1523_v4 }
 0xaa8   :  { %v6474_v5 = vpop.eup %6473 }
 0xaa9   :  { %v6476_v6 = vpop.eup %6475  ;;  %v1530_v9 = vmul.f32 %v6474_v5, %v6470_v56 }
 0xaaa   :  { %v1529_v7 = vmul.f32 %v6476_v6, %v6472_v57 }
 0xaac   :  { %5722 = vmatprep.mubr.msk.f32.mxu0 %vm431_vm3, %v1529_v7 }
 0xaad   :  { %5723 = vmatmul.mubr.msk.f32.vlgmr.msra.gmra.mrb[20].mxu0 %vm431_vm3, %v1530_v9 }
 0xaae   :  { %5738 = vmatprep.mubr.msk.f32.mxu0 %vm89_vm0, %v6680_v8  ;;  %6187 = vmatpush3.bf16.msra.mxu0 %v6184_v15  ;;  %v617_v15 = vadd.f32 %v5001_v13, %v6813_v26 }
 0xaaf   :  { %6189 = vmatprep.subr.bf16.mxu0 %v6188_v19 }
 0xab2   :  { %6191 = vmatpush3.bf16.msra.mxu0 %v6188_v19 }
 0xab3   :  { %6201 = vmatprep.subr.bf16.mxu0 %v6200_v44 }
 0xab5   :  { %5739 = vmatmul.mubr.msk.f32.vlgmr.msra.gmra.mrb[22].mxu0 %vm89_vm0, %v6702_v16 }
 0xab6   :  { %5760 = vmatprep.mubr.msk.f32.mxu0 %vm89_vm0, %v6680_v8  ;;  %6203 = vmatpush3.bf16.msra.mxu0 %v6200_v44  ;;  %v2379_v44 = vld [vmem:[%s7560_s15 + $0x10] sm:$0xff] }
 0xab7   :  { %6205 = vmatprep.subr.bf16.mxu0 %v6204_v46 }
 0xaba   :  { %6207 = vmatpush3.bf16.msra.mxu0 %v6204_v46  ;;  %v2380_v46 = vld [vmem:[%s7560_s15 + $0x18] sm:$0xff] }
 0xabd   :  { %5761 = vmatmul.mubr.msk.f32.vlgmr.msra.gmra.mrb[24].mxu0 %vm89_vm0, %v6702_v16 }
 0xb80   :  { %v5724_v22 = vpop.f32.mrb[20].mxu0 }
 0xb81   :  { %v1603_v23 = vpop.f32.mrb[21].mxu0 }
 0xb82   :  { %5727 = vmatprep.mubr.msk.f32.mxu1 %vm343_vm1, %v1603_v23 }
 0xb83   :  { %5728 = vmatmul.mubr.msk.f32.vlgmr.msra.gmra.mrb[6].mxu1 %vm343_vm1, %v5724_v22 }
 0xb84   :  { %6195 = vmatpush3.bf16.msra.mxu1 %v6192_v12  ;;  %5749 = vmatprep.mubr.msk.f32.mxu1 %vm89_vm0, %v6680_v8 }
 0xb85   :  { %6197 = vmatprep.subr.bf16.mxu1 %v6196_v24 }
 0xb88   :  { %6199 = vmatpush3.bf16.msra.mxu1 %v6196_v24  ;;  %v5740_v29 = vpop.f32.mrb[22].mxu0 }
 0xb89   :  { %v1782_v30 = vadd.f32 %v5740_v29, %v5090_v28  ;;  %v1776_v31 = vpop.f32.mrb[23].mxu0 }
 0xb8a   :  { %v1777_v32 = vadd.f32 %v5090_v28, %v1776_v31 }
 0xb8b   :  { %5750 = vmatmul.mubr.msk.f32.vlgmr.msra.gmra.mrb[12].mxu1 %vm89_vm0, %v6702_v16 }
 0xb8c   :  { %5767 = vmatprep.mubr.msk.f32.mxu1 %vm343_vm1, %v1777_v32 }
 0xb90   :  { %v5762_v61 = vpop.f32.mrb[24].mxu0 }
 0xb91   :  { %v1952_v63 = vpop.f32.mrb[25].mxu0  ;;  %v1958_v0 = vadd.f32 %v5762_v61, %v5106_v62 }
 0xb92   :  { %v1953_v1 = vadd.f32 %v5106_v62, %v1952_v63 }
 0xb94   :  { %v6214_v2 = vpack.c.bf16 %v1958_v0, %v1953_v1 }
 0xb96   :  { %6215 = vmatprep.subr.bf16.mxu0 %v6214_v2 }
 0xb97   :  { %6217 = vmatpush3.bf16.msra.mxu0 %v6214_v2 }
 0xc5e   :  { %v5751_v34 = vpop.f32.mrb[12].mxu1 }
 0xc5f   :  { %v1870_v35 = vadd.f32 %v5751_v34, %v5098_v33  ;;  %v1864_v37 = vpop.f32.mrb[13].mxu1  ;;  %v2283_v34 = vld [vmem:[%s7558_s13] sm:$0xff] }
 0xc60   :  { %v1865_v39 = vadd.f32 %v5098_v33, %v1864_v37 }
 0xc62   :  { %v6208_v40 = vpack.c.bf16 %v1870_v35, %v1865_v39  ;;  %v2284_v35 = vld [vmem:[%s7558_s13 + $0x8] sm:$0xff]  ;;  %v2285_v39 = vld [vmem:[%s7558_s13 + $0x10] sm:$0xff] }
 0xc63   :  { %v6218_v37 = vpack.c.bf16 %v2284_v35, %v2283_v34 }
 0xc64   :  { %6210 = vmatprep.subr.msk.bf16.mxu1 %vm6721_vm2, %v6208_v40 }
 0xc65   :  { %6213 = vmatpush3.bf16.xpose.msk.msra.mxu1 %vm6721_vm2, %v6208_v40  ;;  %6219 = vmatprep.subr.bf16.mxu0 %v6218_v37  ;;  %v2286_v40 = vld [vmem:[%s7558_s13 + $0x18] sm:$0xff] }
 0xc66   :  { %5777 = vmatprep.subr.mxu1 %v5115_v3  ;;  %v6222_v41 = vpack.c.bf16 %v2286_v40, %v2285_v39 }
 0xc6c   :  { %5768 = vmatmul.mubr.msk.f32.vlgmr.msra.gmra.mrb[14].mxu1 %vm343_vm1, %v1782_v30 }
 0xc6d   :  { %5778 = vmatpush3.msra.mxu1 %v5115_v3 }
 0xc6e   :  { %6227 = vmatprep.subr.bf16.mxu1 %v6226_v45 }
 0xd3f   :  { %v5769_v47 = vpop.f32.mrb[14].mxu1 }
 0xd40   :  { %v2045_v48 = vadd.f32 %v5769_v47, %v6754_v38  ;;  %v2039_v49 = vpop.f32.mrb[15].mxu1  ;;  %v6230_v47 = vpack.c.bf16 %v2380_v46, %v2379_v44  ;;  %v5129_v46 = vld [vmem:[%s7573_s20 + $0x88] sm:$0xff] }
 0xd41   :  { %v2040_v50 = vadd.f32 %v2039_v49, %v6749_v36  ;;  %v2382_v49 = vld [vmem:[%s7560_s15 + $0x28] sm:$0xff] }
 0xd42   :  { %v2051_v51 = vsel %vm431_vm3, %v2045_v48, -inf }
 0xd43   :  { %2052 = vmax.xlane.f32.xlu1 %v2051_v51  ;;  %v2048_v52 = vsel %vm431_vm3, %v2040_v50, -inf  ;;  %v2383_v51 = vld [vmem:[%s7560_s15 + $0x30] sm:$0xff] }
 0xd44   :  { %2049 = vmax.xlane.f32.xlu0 %v2048_v52  ;;  %v2384_v52 = vld [vmem:[%s7560_s15 + $0x38] sm:$0xff] }
 0xdd0   :  { %v2053_v53 = vpop.xlane.xlu1 %2052 }
 0xdd1   :  { %v2055_v54 = vsub.f32 %v2045_v48, %v2053_v53  ;;  %v2050_v55 = vpop.xlane.xlu0 %2049  ;;  %v2381_v48 = vld [vmem:[%s7560_s15 + $0x20] sm:$0xff]  ;;  %v6238_v53 = vpack.c.bf16 %v2384_v52, %v2383_v51  ;;  %v5137_v52 = vld [vmem:[%s7550_s5 + $0x88] sm:$0xff] }
 0xdd2   :  { %v2054_v56 = vsub.f32 %v2040_v50, %v2050_v55  ;;  %v6234_v50 = vpack.c.bf16 %v2382_v49, %v2381_v48  ;;  %v2386_v55 = vld [vmem:[%s7560_s15 + $0x48] sm:$0xff]  ;;  %v5130_v48 = vld [vmem:[%s7573_s20 + $0x90] sm:$0xff]  ;;  %v5131_v49 = vld [vmem:[%s7573_s20 + $0x98] sm:$0xff] }
 0xdd3   :  { %v2058_v57 = vmul.f32 1.442695, %v2055_v54  ;;  %v2385_v54 = vld [vmem:[%s7560_s15 + $0x40] sm:$0xff] }
 0xdd4   :  { %v2056_v58 = vmul.f32 1.442695, %v2054_v56  ;;  %v6242_v56 = vpack.c.bf16 %v2386_v55, %v2385_v54  ;;  %v5136_v51 = vld [vmem:[%s7550_s5 + $0x80] sm:$0xff] }
 0xdd5   :  { %6477 = vpow2.f32 %v2058_v57  ;;  %v2387_v57 = vld [vmem:[%s7560_s15 + $0x50] sm:$0xff] }
 0xdd6   :  { %6479 = vpow2.f32 %v2056_v58  ;;  %v2388_v58 = vld [vmem:[%s7560_s15 + $0x58] sm:$0xff] }
 0xddf   :  { %v6478_v59 = vpop.eup %6477 }
 0xde0   :  { %v6480_v60 = vpop.eup %6479  ;;  %v2063_v38 = vsel %vm431_vm3, %v6478_v59, 0.0 }
 0xde1   :  { %2064 = vadd.xlane.f32.xlu1 %v2063_v38  ;;  %v2060_v36 = vsel %vm431_vm3, %v6480_v60, 0.0  ;;  %v2390_v38 = vld [vmem:[%s7560_s15 + $0x68] sm:$0xff] }
 0xde2   :  { %2061 = vadd.xlane.f32.xlu0 %v2060_v36 }
 0xe6e   :  { %v2065_v4 = vpop.xlane.xlu1 %2064 }
 0xe6f   :  { %6481 = vrcp.f32 %v2065_v4  ;;  %v2062_v5 = vpop.xlane.xlu0 %2061  ;;  %v5118_v4 = vld [vmem:[%s7556_s11] ss:$0 sm:$0xff] }
 0xe70   :  { %6483 = vrcp.f32 %v2062_v5 }
 0xe79   :  { %v6482_v6 = vpop.eup %6481 }
 0xe7a   :  { %v6484_v7 = vpop.eup %6483  ;;  %v2069_v10 = vmul.f32 %v6482_v6, %v6478_v59  ;;  %v6246_v59 = vpack.c.bf16 %v2388_v58, %v2387_v57 }
 0xe7b   :  { %v2068_v9 = vmul.f32 %v6484_v7, %v6480_v60  ;;  %v2389_v60 = vld [vmem:[%s7560_s15 + $0x60] sm:$0xff] }
 0xe7c   :  { %v6250_v36 = vpack.c.bf16 %v2390_v38, %v2389_v60  ;;  %v5124_v38 = vld [vmem:[%s7562_s17] ss:$0 sm:$0xff] }
 0xe7d   :  { %5774 = vmatprep.mubr.msk.f32.mxu0 %vm431_vm3, %v2068_v9  ;;  %v5119_v9 = vld [vmem:[%s7557_s12] ss:$0 sm:$0xff] }
 0xe7e   :  { %5775 = vmatmul.mubr.msk.f32.vlgmr.msra.gmra.mrb[26].mxu0 %vm431_vm3, %v2069_v10 }
 0xe7f   :  { %6221 = vmatpush3.bf16.msra.mxu0 %v6218_v37 }
 0xe80   :  { %6223 = vmatprep.subr.bf16.mxu0 %v6222_v41 }
 0xe83   :  { %6225 = vmatpush3.bf16.msra.mxu0 %v6222_v41 }
 0xf51   :  { %v5776_v11 = vpop.f32.mrb[26].mxu0 }
 0xf52   :  { %v2142_v12 = vpop.f32.mrb[27].mxu0 }
 0xf53   :  { %5779 = vmatprep.mubr.msk.f32.mxu1 %vm343_vm1, %v2142_v12 }
 0xf54   :  { %5780 = vmatmul.mubr.msk.f32.vlgmr.msra.gmra.mrb[6].mxu1 %vm343_vm1, %v5776_v11 }
 0xf55   :  { %6229 = vmatpush3.bf16.msra.mxu1 %v6226_v45  ;;  %v5128_v45 = vld [vmem:[%s7573_s20 + $0x80] sm:$0xff] }
 0xf56   :  { %6231 = vmatprep.subr.bf16.mxu1 %v6230_v47 }
 0xf59   :  { %6233 = vmatpush3.bf16.msra.mxu1 %v6230_v47  ;;  %v6258_v47 = vpack.c.bf16 %v5129_v46, %v5128_v45  ;;  %v7209_v46 = vld [vmem:[%s7578_s26 + $0x8] sm:$0xff] }
 0xf5a   :  { %6235 = vmatprep.subr.bf16.mxu1 %v6234_v50 }
 0xf5b   :  { %6259 = vmatprep.subr.bf16.mxu0 %v6258_v47 }
 0xf5d   :  { %6237 = vmatpush3.bf16.msra.mxu1 %v6234_v50  ;;  %v6262_v50 = vpack.c.bf16 %v5131_v49, %v5130_v48  ;;  %v7215_v49 = vld [vmem:[%s7578_s26] sm:$0xff] }
 0xf5e   :  { %6239 = vmatprep.subr.bf16.mxu1 %v6238_v53 }
 0xf61   :  { %6241 = vmatpush3.bf16.msra.mxu1 %v6238_v53  ;;  %v6266_v53 = vpack.c.bf16 %v5137_v52, %v5136_v51 }
 0xf62   :  { %6243 = vmatprep.subr.bf16.mxu1 %v6242_v56 }
 0xf65   :  { %6245 = vmatpush3.bf16.msra.mxu1 %v6242_v56 }
 0xf66   :  { %6247 = vmatprep.subr.bf16.mxu1 %v6246_v59 }
 0xf69   :  { %6249 = vmatpush3.bf16.msra.mxu1 %v6246_v59 }
 0xf6a   :  { %6251 = vmatprep.subr.bf16.mxu1 %v6250_v36 }
 0xf6d   :  { %6253 = vmatpush3.bf16.msra.mxu1 %v6250_v36 }
0x1027   :  { %v5781_v17 = vpop.f32.mrb[6].mxu1 }
0x1028   :  { %v6435_v18 = vadd.f32 %v5781_v17, %v618_v14  ;;  %v2225_v19 = vpop.f32.mrb[7].mxu1  ;;  %v2391_v14 = vld [vmem:[%s7560_s15 + $0x70] sm:$0xff] }
0x1029   :  { %v6437_v20 = vadd.f32 %v2225_v19, %v617_v15  ;;  %v2392_v15 = vld [vmem:[%s7560_s15 + $0x78] sm:$0xff] }
0x102a   :  { %v2237_v21 = vadd.f32 %v6435_v18, %v6702_v16  ;;  %v6254_v17 = vpack.c.bf16 %v2392_v15, %v2391_v14  ;;  %v5120_v18 = vld [vmem:[%s7559_s14] ss:$0 sm:$0xff]  ;;  %v5133_v14 = vld [vmem:[%s7549_s4 + $0x4] ss:$0 sm:$0xff] }
0x102b   :  { %v2236_v22 = vadd.f32 %v6437_v20, %v6680_v8 }
0x102c   :  { %v2243_v23 = vsel %vm89_vm0, %v2237_v21, 0.0  ;;  %6255 = vmatprep.subr.bf16.mxu1 %v6254_v17 }
0x102d   :  { %2244 = vadd.xlane.f32.xlu1 %v2243_v23  ;;  %v2240_v24 = vsel %vm89_vm0, %v2236_v22, 0.0  ;;  %6257 = vmatpush3.bf16.msra.mxu1 %v6254_v17 }
0x102e   :  { %2241 = vadd.xlane.f32.xlu0 %v2240_v24 }
0x10ba   :  { %v2245_v28 = vpop.xlane.xlu1 %2244 }
0x10bb   :  { %v2248_v29 = vmul.f32 0.03125, %v2245_v28  ;;  %v2242_v30 = vpop.xlane.xlu0 %2241  ;;  %v5123_v28 = vld [vmem:[%s7561_s16] ss:$0 sm:$0xff] }
0x10bc   :  { %v2247_v25 = vmul.f32 0.03125, %v2242_v30 }
0x10bd   :  { %v7011_v31 = vsub.f32 %v2237_v21, %v2248_v29 }
0x10be   :  { %v7013_v26 = vsub.f32 %v2236_v22, %v2247_v25 }
0x10bf   :  { %v2252_v32 = vmul.f32 %v7011_v31, %v7011_v31 }
0x10c0   :  { %v2251_v8 = vmul.f32 %v7013_v26, %v7013_v26 }
0x10c1   :  { %v2256_v16 = vsel %vm89_vm0, %v2252_v32, 0.0 }
0x10c2   :  { %2257 = vadd.xlane.f32.xlu1 %v2256_v16  ;;  %v2253_v33 = vsel %vm89_vm0, %v2251_v8, 0.0 }
0x10c3   :  { %2254 = vadd.xlane.f32.xlu0 %v2253_v33 }
0x114f   :  { %v2258_v61 = vpop.xlane.xlu1 %2257 }
0x1150   :  { %v2260_v62 = vmul.f32 0.03125, %v2258_v61  ;;  %v2255_v63 = vpop.xlane.xlu0 %2254 }
0x1151   :  { %v2259_v0 = vmul.f32 0.03125, %v2255_v63  ;;  %v5125_v63 = vld [vmem:[%s7563_s18] ss:$0 sm:$0xff] }
0x1152   :  { %v2262_v1 = vadd.f32 1e-05, %v2260_v62 }
0x1153   :  { %v2261_v2 = vadd.f32 1e-05, %v2259_v0 }
0x1154   :  { %6485 = vrsqrt.f32 %v2262_v1 }
0x1155   :  { %6487 = vrsqrt.f32 %v2261_v2  ;;  %v5138_v2 = vld [vmem:[%s7550_s5 + $0x90] sm:$0xff] }
0x115e   :  { %v6486_v3 = vpop.eup %6485 }
0x115f   :  { %v6488_v5 = vpop.eup %6487  ;;  %v2266_v6 = vmul.f32 %v6486_v3, %v7011_v31  ;;  %v5139_v3 = vld [vmem:[%s7550_s5 + $0x98] sm:$0xff] }
0x1160   :  { %v2265_v7 = vmul.f32 %v6488_v5, %v7013_v26 }
0x1161   :  { %v2274_v10 = vmul.f32 %v5118_v4, %v2266_v6  ;;  %v6270_v6 = vpack.c.bf16 %v5139_v3, %v5138_v2 }
0x1162   :  { %v2273_v11 = vmul.f32 %v5118_v4, %v2265_v7  ;;  %v5144_v7 = vld [vmem:[%s7552_s7 + $0x80] sm:$0xff] }
0x1163   :  { %v2282_v13 = vadd.f32 %v5119_v9, %v2274_v10 }
0x1164   :  { %v2281_v12 = vadd.f32 %v5119_v9, %v2273_v11  ;;  %v5145_v9 = vld [vmem:[%s7552_s7 + $0x88] sm:$0xff]  ;;  %v5146_v11 = vld [vmem:[%s7552_s7 + $0x90] sm:$0xff] }
0x1165   :  { %v6274_v10 = vpack.c.bf16 %v5145_v9, %v5144_v7 }
0x1166   :  { %5790 = vmatprep.mubr.msk.f32.mxu0 %vm89_vm0, %v2281_v12 }
0x1167   :  { %5791 = vmatmul.mubr.msk.f32.vlgmr.msra.gmra.mrb[28].mxu0 %vm89_vm0, %v2282_v13 }
0x1168   :  { %6261 = vmatpush3.bf16.msra.mxu0 %v6258_v47 }
0x1169   :  { %6263 = vmatprep.subr.bf16.mxu0 %v6262_v50 }
0x116c   :  { %6265 = vmatpush3.bf16.msra.mxu0 %v6262_v50 }
0x116d   :  { %6267 = vmatprep.subr.bf16.mxu0 %v6266_v53 }
0x123a   :  { %v5792_v19 = vpop.f32.mrb[28].mxu0 }
0x123b   :  { %v2372_v20 = vadd.f32 %v5792_v19, %v5120_v18  ;;  %v2366_v21 = vpop.f32.mrb[29].mxu0  ;;  %v5141_v19 = vld [vmem:[%s7551_s6 + $0x4] ss:$0 sm:$0xff] }
0x123c   :  { %v2367_v22 = vadd.f32 %v5120_v18, %v2366_v21 }
0x123d   :  { %v2376_v24 = vmax.f32 %v2372_v20, 0.0 }
0x123e   :  { %v2375_v23 = vmax.f32 %v2367_v22, 0.0 }
0x1240   :  { %5825 = vmatprep.mubr.f32.mxu1 %v2375_v23  ;;  %v5161_v23 = vld [vmem:[%s7573_s20 + $0xa0] sm:$0xff] }
0x1241   :  { %5826 = vmatmul.mubr.f32.vlgmr.msra.gmra.mrb[16].mxu1 %v2376_v24  ;;  %v5162_v24 = vld [vmem:[%s7573_s20 + $0xa8] sm:$0xff] }
0x1314   :  { %v5827_v29 = vpop.f32.mrb[16].mxu1 }
0x1315   :  { %v2472_v30 = vadd.f32 %v5827_v29, %v5123_v28  ;;  %v2466_v25 = vpop.f32.mrb[17].mxu1 }
0x1316   :  { %v2467_v31 = vadd.f32 %v5123_v28, %v2466_v25  ;;  %v5149_v25 = vld [vmem:[%s7553_s8 + $0x4] ss:$0 sm:$0xff] }
0x1317   :  { %v2476_v26 = vadd.f32 %v2472_v30, %v2282_v13  ;;  %v6292_v30 = vpack.c.bf16 %v5162_v24, %v5161_v23 }
0x1318   :  { %v2475_v32 = vadd.f32 %v2467_v31, %v2281_v12  ;;  %v5147_v12 = vld [vmem:[%s7552_s7 + $0x98] sm:$0xff] }
0x1319   :  { %v2482_v8 = vsel %vm89_vm0, %v2476_v26, 0.0  ;;  %v6278_v13 = vpack.c.bf16 %v5147_v12, %v5146_v11 }
0x131a   :  { %2483 = vadd.xlane.f32.xlu1 %v2482_v8  ;;  %v2479_v16 = vsel %vm89_vm0, %v2475_v32, 0.0  ;;  %v5163_v8 = vld [vmem:[%s7573_s20 + $0xb0] sm:$0xff] }
0x131b   :  { %2480 = vadd.xlane.f32.xlu0 %v2479_v16  ;;  %v5164_v16 = vld [vmem:[%s7573_s20 + $0xb8] sm:$0xff] }
0x13a7   :  { %v2484_v33 = vpop.xlane.xlu1 %2483 }
0x13a8   :  { %v2486_v34 = vmul.f32 0.03125, %v2484_v33  ;;  %v2481_v35 = vpop.xlane.xlu0 %2480 }
0x13a9   :  { %v2485_v37 = vmul.f32 0.03125, %v2481_v35 }
0x13aa   :  { %v2488_v39 = vsub.f32 %v2476_v26, %v2486_v34 }
0x13ab   :  { %v2487_v40 = vsub.f32 %v2475_v32, %v2485_v37  ;;  %v6296_v37 = vpack.c.bf16 %v5164_v16, %v5163_v8 }
0x13ac   :  { %v2490_v41 = vmul.f32 %v2488_v39, %v2488_v39 }
0x13ad   :  { %v2489_v42 = vmul.f32 %v2487_v40, %v2487_v40 }
0x13ae   :  { %v2494_v43 = vsel %vm89_vm0, %v2490_v41, 0.0 }
0x13af   :  { %2495 = vadd.xlane.f32.xlu1 %v2494_v43  ;;  %v2491_v44 = vsel %vm89_vm0, %v2489_v42, 0.0  ;;  %v5179_v42 = vld [vmem:[%s7552_s7 + $0xb0] sm:$0xff]  ;;  %v5180_v43 = vld [vmem:[%s7552_s7 + $0xb8] sm:$0xff] }
0x13b0   :  { %2492 = vadd.xlane.f32.xlu0 %v2491_v44  ;;  %v6312_v44 = vpack.c.bf16 %v5180_v43, %v5179_v42 }
0x143c   :  { %v2496_v54 = vpop.xlane.xlu1 %2495 }
0x143d   :  { %v2498_v55 = vmul.f32 0.03125, %v2496_v54  ;;  %v2493_v56 = vpop.xlane.xlu0 %2492 }
0x143e   :  { %v2497_v57 = vmul.f32 0.03125, %v2493_v56 }
0x143f   :  { %v2500_v58 = vadd.f32 1e-05, %v2498_v55 }
0x1440   :  { %v2499_v59 = vadd.f32 1e-05, %v2497_v57  ;;  %v5182_v57 = vld [vmem:[%s7553_s8 + $0x5] ss:$0 sm:$0xff] }
0x1441   :  { %6489 = vrsqrt.f32 %v2500_v58 }
0x1442   :  { %6491 = vrsqrt.f32 %v2499_v59 }
0x144b   :  { %v6490_v60 = vpop.eup %6489 }
0x144c   :  { %v6492_v36 = vpop.eup %6491  ;;  %v2504_v61 = vmul.f32 %v6490_v60, %v2488_v39  ;;  %v5177_v39 = vld [vmem:[%s7552_s7 + $0xa0] sm:$0xff] }
0x144d   :  { %v2503_v62 = vmul.f32 %v6492_v36, %v2487_v40  ;;  %v5178_v40 = vld [vmem:[%s7552_s7 + $0xa8] sm:$0xff] }
0x144e   :  { %v2512_v0 = vmul.f32 %v5124_v38, %v2504_v61  ;;  %v6308_v41 = vpack.c.bf16 %v5178_v40, %v5177_v39 }
0x144f   :  { %v2511_v1 = vmul.f32 %v5124_v38, %v2503_v62 }
0x1450   :  { %v7133_v5 = vadd.f32 %v5125_v63, %v2512_v0 }
0x1451   :  { %v7131_v4 = vadd.f32 %v5125_v63, %v2511_v1 }
0x1453   :  { %5836 = vmatprep.mubr.msk.f32.mxu0 %vm89_vm0, %v7131_v4 }
0x1454   :  { %5837 = vmatmul.mubr.msk.f32.vlgmr.msra.gmra.mrb[30].mxu0 %vm89_vm0, %v7133_v5 }
0x1455   :  { %6269 = vmatpush3.bf16.msra.mxu0 %v6266_v53  ;;  %5847 = vmatprep.mubr.msk.f32.mxu0 %vm89_vm0, %v7131_v4  ;;  %v5166_v53 = vld [vmem:[%s7549_s4 + $0x5] ss:$0 sm:$0xff] }
0x1456   :  { %6271 = vmatprep.subr.bf16.mxu0 %v6270_v6 }
0x1459   :  { %6273 = vmatpush3.bf16.msra.mxu0 %v6270_v6 }
0x145a   :  { %6275 = vmatprep.subr.bf16.mxu0 %v6274_v10 }
0x145c   :  { %5848 = vmatmul.mubr.msk.f32.vlgmr.msra.gmra.mrb[32].mxu0 %vm89_vm0, %v7133_v5 }
0x145d   :  { %6277 = vmatpush3.bf16.msra.mxu0 %v6274_v10  ;;  %5858 = vmatprep.mubr.msk.f32.mxu0 %vm89_vm0, %v7131_v4  ;;  %v5158_v10 = vld [vmem:[%s7554_s9 + $0x20] sm:$0xff] }
0x145e   :  { %6279 = vmatprep.subr.bf16.mxu0 %v6278_v13 }
0x1461   :  { %6281 = vmatpush3.bf16.msra.mxu0 %v6278_v13 }
0x1464   :  { %5859 = vmatmul.mubr.msk.f32.vlgmr.msra.gmra.mrb[34].mxu0 %vm89_vm0, %v7133_v5 }
0x1527   :  { %v5838_v15 = vpop.f32.mrb[30].mxu0 }
0x1528   :  { %v2614_v17 = vpop.f32.mrb[31].mxu0  ;;  %v2620_v34 = vadd.f32 %v5838_v15, %v5133_v14 }
0x1529   :  { %v2615_v18 = vadd.f32 %v5133_v14, %v2614_v17 }
0x152b   :  { %5865 = vmatprep.mubr.msk.f32.mxu0 %vm343_vm1, %v2615_v18  ;;  %v5169_v18 = vld [vmem:[%s7550_s5 + $0xa0] sm:$0xff] }
0x152f   :  { %v5849_v20 = vpop.f32.mrb[32].mxu0 }
0x1530   :  { %v2708_v21 = vadd.f32 %v5849_v20, %v5141_v19  ;;  %v2702_v22 = vpop.f32.mrb[33].mxu0 }
0x1531   :  { %v2703_v28 = vadd.f32 %v5141_v19, %v2702_v22  ;;  %v5170_v19 = vld [vmem:[%s7550_s5 + $0xa8] sm:$0xff]  ;;  %v5172_v22 = vld [vmem:[%s7550_s5 + $0xb8] sm:$0xff] }
0x1532   :  { %v6300_v20 = vpack.c.bf16 %v5170_v19, %v5169_v18 }
0x1533   :  { %v6282_v29 = vpack.c.bf16 %v2708_v21, %v2703_v28  ;;  %v5171_v21 = vld [vmem:[%s7550_s5 + $0xb0] sm:$0xff] }
0x1534   :  { %v6304_v28 = vpack.c.bf16 %v5172_v22, %v5171_v21  ;;  %v5215_v22 = vld [vmem:[%s7553_s8 + $0x6] ss:$0 sm:$0xff] }
0x1535   :  { %6284 = vmatprep.subr.msk.bf16.mxu0 %vm6721_vm2, %v6282_v29 }
0x1536   :  { %6287 = vmatpush3.bf16.xpose.msk.msra.mxu0 %vm6721_vm2, %v6282_v29 }
0x1537   :  { %v5860_v31 = vpop.f32.mrb[34].mxu0  ;;  %6293 = vmatprep.subr.bf16.mxu0 %v6292_v30 }
0x1538   :  { %v2796_v26 = vadd.f32 %v5860_v31, %v5149_v25  ;;  %v2790_v32 = vpop.f32.mrb[35].mxu0 }
0x1539   :  { %v2791_v33 = vadd.f32 %v5149_v25, %v2790_v32 }
0x153b   :  { %v6288_v35 = vpack.c.bf16 %v2796_v26, %v2791_v33 }
0x153d   :  { %5866 = vmatmul.mubr.msk.f32.vlgmr.msra.gmra.mrb[36].mxu0 %vm343_vm1, %v2620_v34  ;;  %6289 = vmatprep.subr.bf16.mxu1 %v6288_v35 }
0x153e   :  { %6291 = vmatpush3.bf16.msra.mxu1 %v6288_v35  ;;  %6295 = vmatpush3.bf16.msra.mxu0 %v6292_v30  ;;  %v5174_v30 = vld [vmem:[%s7551_s6 + $0x5] ss:$0 sm:$0xff] }
0x153f   :  { %5888 = vmatprep.mubr.msk.f32.mxu0 %vm89_vm0, %v7131_v4  ;;  %6297 = vmatprep.subr.bf16.mxu0 %v6296_v37 }
0x1540   :  { %5875 = vmatprep.subr.mxu1 %v5158_v10 }
0x1542   :  { %6299 = vmatpush3.bf16.msra.mxu0 %v6296_v37 }
0x1543   :  { %6309 = vmatprep.subr.bf16.mxu0 %v6308_v41 }
0x1545   :  { %5889 = vmatmul.mubr.msk.f32.vlgmr.msra.gmra.mrb[38].mxu0 %vm89_vm0, %v7133_v5 }
0x1546   :  { %6311 = vmatpush3.bf16.msra.mxu0 %v6308_v41  ;;  %5910 = vmatprep.mubr.msk.f32.mxu0 %vm89_vm0, %v7131_v4 }
0x1547   :  { %6313 = vmatprep.subr.bf16.mxu0 %v6312_v44 }
0x154a   :  { %6315 = vmatpush3.bf16.msra.mxu0 %v6312_v44 }
0x154d   :  { %5911 = vmatmul.mubr.msk.f32.vlgmr.msra.gmra.mrb[40].mxu0 %vm89_vm0, %v7133_v5 }
0x1610   :  { %v5867_v45 = vpop.f32.mrb[36].mxu0 }
0x1611   :  { %v2883_v47 = vadd.f32 %v7209_v46, %v5867_v45  ;;  %v2877_v48 = vpop.f32.mrb[37].mxu0 }
0x1612   :  { %v2878_v50 = vadd.f32 %v7215_v49, %v2877_v48 }
0x1613   :  { %v2889_v51 = vsel %vm431_vm3, %v2883_v47, -inf }
0x1614   :  { %2890 = vmax.xlane.f32.xlu1 %v2889_v51  ;;  %v2886_v52 = vsel %vm431_vm3, %v2878_v50, -inf }
0x1615   :  { %2887 = vmax.xlane.f32.xlu0 %v2886_v52  ;;  %v5194_v52 = vld [vmem:[%s7573_s20 + $0xc0] sm:$0xff] }
0x1618   :  { %v5890_v54 = vpop.f32.mrb[38].mxu0 }
0x1619   :  { %v7223_v55 = vadd.f32 %v5890_v54, %v5166_v53  ;;  %v3153_v56 = vpop.f32.mrb[39].mxu0 }
0x161a   :  { %v3154_v29 = vadd.f32 %v5166_v53, %v3153_v56  ;;  %v5195_v53 = vld [vmem:[%s7573_s20 + $0xc8] sm:$0xff] }
0x161b   :  { %v6326_v54 = vpack.c.bf16 %v5195_v53, %v5194_v52  ;;  %v5227_v53 = vld [vmem:[%s7573_s20 + $0xe0] sm:$0xff] }
0x1620   :  { %v5912_v58 = vpop.f32.mrb[40].mxu0 }
0x1621   :  { %v3335_v59 = vadd.f32 %v5912_v58, %v5182_v57  ;;  %v3329_v60 = vpop.f32.mrb[41].mxu0 }
0x1622   :  { %v3330_v38 = vadd.f32 %v5182_v57, %v3329_v60  ;;  %v5197_v60 = vld [vmem:[%s7573_s20 + $0xd8] sm:$0xff] }
0x1624   :  { %v6322_v36 = vpack.c.bf16 %v3335_v59, %v3330_v38  ;;  %v5196_v59 = vld [vmem:[%s7573_s20 + $0xd0] sm:$0xff] }
0x1626   :  { %6323 = vmatprep.subr.bf16.mxu0 %v6322_v36 }
0x1627   :  { %6325 = vmatpush3.bf16.msra.mxu0 %v6322_v36 }
0x1628   :  { %6327 = vmatprep.subr.bf16.mxu0 %v6326_v54 }
0x16a1   :  { %v2891_v61 = vpop.xlane.xlu1 %2890 }
0x16a2   :  { %v2893_v62 = vsub.f32 %v2883_v47, %v2891_v61  ;;  %v2888_v63 = vpop.xlane.xlu0 %2887 }
0x16a3   :  { %v2892_v0 = vsub.f32 %v2878_v50, %v2888_v63  ;;  %v5210_v63 = vld [vmem:[%s7552_s7 + $0xc0] sm:$0xff] }
0x16a4   :  { %v2896_v1 = vmul.f32 1.442695, %v2893_v62  ;;  %v6330_v62 = vpack.c.bf16 %v5197_v60, %v5196_v59  ;;  %v5229_v60 = vld [vmem:[%s7573_s20 + $0xf0] sm:$0xff] }
0x16a5   :  { %v2894_v2 = vmul.f32 1.442695, %v2892_v0  ;;  %v5211_v0 = vld [vmem:[%s7552_s7 + $0xc8] sm:$0xff] }
0x16a6   :  { %6493 = vpow2.f32 %v2896_v1  ;;  %v6342_v1 = vpack.c.bf16 %v5211_v0, %v5210_v63  ;;  %v5243_v0 = vld [vmem:[%s7552_s7 + $0xe0] sm:$0xff] }
0x16a7   :  { %6495 = vpow2.f32 %v2894_v2  ;;  %v5212_v2 = vld [vmem:[%s7552_s7 + $0xd0] sm:$0xff] }
0x16b0   :  { %v6494_v3 = vpop.eup %6493 }
0x16b1   :  { %v6496_v6 = vpop.eup %6495  ;;  %v2901_v7 = vsel %vm431_vm3, %v6494_v3, 0.0 }
0x16b2   :  { %2902 = vadd.xlane.f32.xlu1 %v2901_v7  ;;  %v2898_v9 = vsel %vm431_vm3, %v6496_v6, 0.0  ;;  %v5202_v7 = vld [vmem:[%s7550_s5 + $0xc0] sm:$0xff] }
0x16b3   :  { %2899 = vadd.xlane.f32.xlu0 %v2898_v9  ;;  %v5203_v9 = vld [vmem:[%s7550_s5 + $0xc8] sm:$0xff] }
0x173f   :  { %v2903_v11 = vpop.xlane.xlu1 %2902 }
0x1740   :  { %6497 = vrcp.f32 %v2903_v11  ;;  %v2900_v12 = vpop.xlane.xlu0 %2899  ;;  %v5204_v11 = vld [vmem:[%s7550_s5 + $0xd0] sm:$0xff] }
0x1741   :  { %6499 = vrcp.f32 %v2900_v12  ;;  %v5205_v12 = vld [vmem:[%s7550_s5 + $0xd8] sm:$0xff] }
0x174a   :  { %v6498_v13 = vpop.eup %6497 }
0x174b   :  { %v6500_v14 = vpop.eup %6499  ;;  %v2907_v17 = vmul.f32 %v6498_v13, %v6494_v3  ;;  %v5213_v3 = vld [vmem:[%s7552_s7 + $0xd8] sm:$0xff] }
0x174c   :  { %v2906_v15 = vmul.f32 %v6500_v14, %v6496_v6  ;;  %v6346_v6 = vpack.c.bf16 %v5213_v3, %v5212_v2  ;;  %v5245_v3 = vld [vmem:[%s7552_s7 + $0xf0] sm:$0xff] }
0x174e   :  { %5872 = vmatprep.mubr.msk.f32.mxu1 %vm431_vm3, %v2906_v15  ;;  %v6338_v15 = vpack.c.bf16 %v5205_v12, %v5204_v11  ;;  %v5237_v12 = vld [vmem:[%s7550_s5 + $0xf0] sm:$0xff] }
0x174f   :  { %5873 = vmatmul.mubr.msk.f32.vlgmr.msra.gmra.mrb[18].mxu1 %vm431_vm3, %v2907_v17  ;;  %v5199_v17 = vld [vmem:[%s7549_s4 + $0x6] ss:$0 sm:$0xff] }
0x1750   :  { %5876 = vmatpush3.msra.mxu1 %v5158_v10  ;;  %v6334_v10 = vpack.c.bf16 %v5203_v9, %v5202_v7  ;;  %v5235_v9 = vld [vmem:[%s7550_s5 + $0xe0] sm:$0xff] }
0x1751   :  { %6301 = vmatprep.subr.bf16.mxu1 %v6300_v20 }
0x1822   :  { %v5874_v23 = vpop.f32.mrb[18].mxu1 }
0x1823   :  { %v2980_v24 = vpop.f32.mrb[19].mxu1 }
0x1824   :  { %5877 = vmatprep.mubr.msk.f32.mxu1 %vm343_vm1, %v2980_v24 }
0x1825   :  { %5878 = vmatmul.mubr.msk.f32.vlgmr.msra.gmra.mrb[20].mxu1 %vm343_vm1, %v5874_v23 }
0x1826   :  { %6303 = vmatpush3.bf16.msra.mxu1 %v6300_v20  ;;  %5899 = vmatprep.mubr.msk.f32.mxu1 %vm89_vm0, %v7131_v4 }
0x1827   :  { %6305 = vmatprep.subr.bf16.mxu1 %v6304_v28 }
0x182a   :  { %6307 = vmatpush3.bf16.msra.mxu1 %v6304_v28 }
0x182d   :  { %5900 = vmatmul.mubr.msk.f32.vlgmr.msra.gmra.mrb[22].mxu1 %vm89_vm0, %v7133_v5 }
0x182e   :  { %5917 = vmatprep.mubr.msk.f32.mxu1 %vm343_vm1, %v3154_v29 }
0x1900   :  { %v5901_v25 = vpop.f32.mrb[22].mxu1 }
0x1901   :  { %v3247_v31 = vadd.f32 %v5901_v25, %v5174_v30  ;;  %v3241_v26 = vpop.f32.mrb[23].mxu1  ;;  %v5207_v25 = vld [vmem:[%s7551_s6 + $0x6] ss:$0 sm:$0xff] }
0x1902   :  { %v3242_v32 = vadd.f32 %v5174_v30, %v3241_v26 }
0x1904   :  { %v6316_v8 = vpack.c.bf16 %v3247_v31, %v3242_v32 }
0x1906   :  { %6318 = vmatprep.subr.msk.bf16.mxu1 %vm6721_vm2, %v6316_v8 }
0x1907   :  { %6321 = vmatpush3.bf16.xpose.msk.msra.mxu1 %vm6721_vm2, %v6316_v8 }
0x190e   :  { %5918 = vmatmul.mubr.msk.f32.vlgmr.msra.gmra.mrb[24].mxu1 %vm343_vm1, %v7223_v55  ;;  %v5191_v55 = vld [vmem:[%s7554_s9 + $0x28] sm:$0xff] }
0x190f   :  { %5927 = vmatprep.subr.mxu1 %v5191_v55 }
0x1910   :  { %5928 = vmatpush3.msra.mxu1 %v5191_v55 }
0x1911   :  { %6335 = vmatprep.subr.bf16.mxu1 %v6334_v10 }
0x19e1   :  { %v5919_v16 = vpop.f32.mrb[24].mxu1 }
0x19e2   :  { %v3422_v33 = vadd.f32 %v7209_v46, %v5919_v16  ;;  %v3416_v34 = vpop.f32.mrb[25].mxu1 }
0x19e3   :  { %v3417_v35 = vadd.f32 %v7215_v49, %v3416_v34 }
0x19e4   :  { %v3428_v37 = vsel %vm431_vm3, %v3422_v33, -inf }
0x19e5   :  { %3429 = vmax.xlane.f32.xlu1 %v3428_v37  ;;  %v3425_v39 = vsel %vm431_vm3, %v3417_v35, -inf }
0x19e6   :  { %3426 = vmax.xlane.f32.xlu0 %v3425_v39 }
0x1a72   :  { %v3430_v40 = vpop.xlane.xlu1 %3429 }
0x1a73   :  { %v3432_v41 = vsub.f32 %v3422_v33, %v3430_v40  ;;  %v3427_v42 = vpop.xlane.xlu0 %3426 }
0x1a74   :  { %v3431_v43 = vsub.f32 %v3417_v35, %v3427_v42 }
0x1a75   :  { %v3435_v44 = vmul.f32 1.442695, %v3432_v41 }
0x1a76   :  { %v3433_v45 = vmul.f32 1.442695, %v3431_v43 }
0x1a77   :  { %6501 = vpow2.f32 %v3435_v44 }
0x1a78   :  { %6503 = vpow2.f32 %v3433_v45 }
0x1a81   :  { %v6502_v47 = vpop.eup %6501 }
0x1a82   :  { %v6504_v48 = vpop.eup %6503  ;;  %v3440_v50 = vsel %vm431_vm3, %v6502_v47, 0.0 }
0x1a83   :  { %3441 = vadd.xlane.f32.xlu1 %v3440_v50  ;;  %v3437_v51 = vsel %vm431_vm3, %v6504_v48, 0.0 }
0x1a84   :  { %3438 = vadd.xlane.f32.xlu0 %v3437_v51 }
0x1b10   :  { %v3442_v56 = vpop.xlane.xlu1 %3441 }
0x1b11   :  { %6505 = vrcp.f32 %v3442_v56  ;;  %v3439_v57 = vpop.xlane.xlu0 %3438  ;;  %v5224_v56 = vld [vmem:[%s7554_s9 + $0x30] sm:$0xff] }
0x1b12   :  { %6507 = vrcp.f32 %v3439_v57 }
0x1b1b   :  { %v6506_v58 = vpop.eup %6505 }
0x1b1c   :  { %v6508_v38 = vpop.eup %6507  ;;  %v3446_v61 = vmul.f32 %v6506_v58, %v6502_v47 }
0x1b1d   :  { %v3445_v36 = vmul.f32 %v6508_v38, %v6504_v48  ;;  %v5230_v38 = vld [vmem:[%s7573_s20 + $0xf8] sm:$0xff] }
0x1b1e   :  { %v6364_v63 = vpack.c.bf16 %v5230_v38, %v5229_v60  ;;  %v5127_v60 = vld [vmem:[%s7555_s10 + $0x1] ss:$0 sm:$0xff] }
0x1b1f   :  { %5924 = vmatprep.mubr.msk.f32.mxu0 %vm431_vm3, %v3445_v36 }
0x1b20   :  { %5925 = vmatmul.mubr.msk.f32.vlgmr.msra.gmra.mrb[42].mxu0 %vm431_vm3, %v3446_v61 }
0x1b21   :  { %6329 = vmatpush3.bf16.msra.mxu0 %v6326_v54  ;;  %5940 = vmatprep.mubr.msk.f32.mxu0 %vm89_vm0, %v7131_v4  ;;  %v5228_v54 = vld [vmem:[%s7573_s20 + $0xe8] sm:$0xff] }
0x1b22   :  { %6331 = vmatprep.subr.bf16.mxu0 %v6330_v62  ;;  %v6360_v55 = vpack.c.bf16 %v5228_v54, %v5227_v53 }
0x1b25   :  { %6333 = vmatpush3.bf16.msra.mxu0 %v6330_v62 }
0x1b26   :  { %6343 = vmatprep.subr.bf16.mxu0 %v6342_v1 }
0x1b28   :  { %5941 = vmatmul.mubr.msk.f32.vlgmr.msra.gmra.mrb[44].mxu0 %vm89_vm0, %v7133_v5 }
0x1b29   :  { %6345 = vmatpush3.bf16.msra.mxu0 %v6342_v1  ;;  %5962 = vmatprep.mubr.msk.f32.mxu0 %vm89_vm0, %v7131_v4  ;;  %v5244_v1 = vld [vmem:[%s7552_s7 + $0xe8] sm:$0xff] }
0x1b2a   :  { %6347 = vmatprep.subr.bf16.mxu0 %v6346_v6  ;;  %v6376_v2 = vpack.c.bf16 %v5244_v1, %v5243_v0 }
0x1b2d   :  { %6349 = vmatpush3.bf16.msra.mxu0 %v6346_v6  ;;  %v5246_v6 = vld [vmem:[%s7552_s7 + $0xf8] sm:$0xff] }
0x1b2e   :  { %v6380_v7 = vpack.c.bf16 %v5246_v6, %v5245_v3 }
0x1b30   :  { %5963 = vmatmul.mubr.msk.f32.vlgmr.msra.gmra.mrb[46].mxu0 %vm89_vm0, %v7133_v5 }
0x1bf3   :  { %v5926_v13 = vpop.f32.mrb[42].mxu0 }
0x1bf4   :  { %v3519_v14 = vpop.f32.mrb[43].mxu0 }
0x1bf5   :  { %5929 = vmatprep.mubr.msk.f32.mxu1 %vm343_vm1, %v3519_v14 }
0x1bf6   :  { %5930 = vmatmul.mubr.msk.f32.vlgmr.msra.gmra.mrb[20].mxu1 %vm343_vm1, %v5926_v13  ;;  %v5238_v13 = vld [vmem:[%s7550_s5 + $0xf8] sm:$0xff] }
0x1bf7   :  { %6337 = vmatpush3.bf16.msra.mxu1 %v6334_v10  ;;  %5951 = vmatprep.mubr.msk.f32.mxu1 %vm89_vm0, %v7131_v4  ;;  %v5236_v10 = vld [vmem:[%s7550_s5 + $0xe8] sm:$0xff] }
0x1bf8   :  { %6339 = vmatprep.subr.bf16.mxu1 %v6338_v15  ;;  %v6368_v11 = vpack.c.bf16 %v5236_v10, %v5235_v9 }
0x1bfb   :  { %v5942_v18 = vpop.f32.mrb[44].mxu0  ;;  %6341 = vmatpush3.bf16.msra.mxu1 %v6338_v15 }
0x1bfc   :  { %v3698_v19 = vadd.f32 %v5942_v18, %v5199_v17  ;;  %v3692_v20 = vpop.f32.mrb[45].mxu0  ;;  %v5232_v18 = vld [vmem:[%s7549_s4 + $0x7] ss:$0 sm:$0xff] }
0x1bfd   :  { %v3693_v21 = vadd.f32 %v5199_v17, %v3692_v20  ;;  %v6372_v17 = vpack.c.bf16 %v5238_v13, %v5237_v12 }
0x1bfe   :  { %5952 = vmatmul.mubr.msk.f32.vlgmr.msra.gmra.mrb[26].mxu1 %vm89_vm0, %v7133_v5 }
0x1bff   :  { %5969 = vmatprep.mubr.msk.f32.mxu1 %vm343_vm1, %v3693_v21 }
0x1c03   :  { %v5964_v23 = vpop.f32.mrb[46].mxu0 }
0x1c04   :  { %v3874_v24 = vadd.f32 %v5964_v23, %v5215_v22  ;;  %v3868_v28 = vpop.f32.mrb[47].mxu0  ;;  %v5248_v23 = vld [vmem:[%s7553_s8 + $0x7] ss:$0 sm:$0xff] }
0x1c05   :  { %v3869_v29 = vadd.f32 %v5215_v22, %v3868_v28 }
0x1c07   :  { %v6356_v30 = vpack.c.bf16 %v3874_v24, %v3869_v29 }
0x1c09   :  { %6357 = vmatprep.subr.bf16.mxu0 %v6356_v30 }
0x1c0a   :  { %6359 = vmatpush3.bf16.msra.mxu0 %v6356_v30 }
0x1c0b   :  { %6361 = vmatprep.subr.bf16.mxu0 %v6360_v55 }
0x1cd1   :  { %v5953_v31 = vpop.f32.mrb[26].mxu1 }
0x1cd2   :  { %v3786_v26 = vadd.f32 %v5953_v31, %v5207_v25  ;;  %v3780_v32 = vpop.f32.mrb[27].mxu1  ;;  %v5240_v31 = vld [vmem:[%s7551_s6 + $0x7] ss:$0 sm:$0xff] }
0x1cd3   :  { %v3781_v8 = vadd.f32 %v5207_v25, %v3780_v32 }
0x1cd5   :  { %v6350_v16 = vpack.c.bf16 %v3786_v26, %v3781_v8 }
0x1cd7   :  { %6352 = vmatprep.subr.msk.bf16.mxu1 %vm6721_vm2, %v6350_v16 }
0x1cd8   :  { %6355 = vmatpush3.bf16.xpose.msk.msra.mxu1 %vm6721_vm2, %v6350_v16 }
0x1cd9   :  { %5979 = vmatprep.subr.mxu1 %v5224_v56 }
0x1cdf   :  { %5970 = vmatmul.mubr.msk.f32.vlgmr.msra.gmra.mrb[28].mxu1 %vm343_vm1, %v3698_v19 }
0x1ce0   :  { %5980 = vmatpush3.msra.mxu1 %v5224_v56 }
0x1ce1   :  { %6369 = vmatprep.subr.bf16.mxu1 %v6368_v11 }
0x1db2   :  { %v5971_v33 = vpop.f32.mrb[28].mxu1 }
0x1db3   :  { %v3961_v34 = vadd.f32 %v7209_v46, %v5971_v33  ;;  %v3955_v35 = vpop.f32.mrb[29].mxu1 }
0x1db4   :  { %v3956_v37 = vadd.f32 %v7215_v49, %v3955_v35 }
0x1db5   :  { %v3967_v39 = vsel %vm431_vm3, %v3961_v34, -inf }
0x1db6   :  { %3968 = vmax.xlane.f32.xlu1 %v3967_v39  ;;  %v3964_v40 = vsel %vm431_vm3, %v3956_v37, -inf }
0x1db7   :  { %3965 = vmax.xlane.f32.xlu0 %v3964_v40 }
0x1e43   :  { %v3969_v41 = vpop.xlane.xlu1 %3968 }
0x1e44   :  { %v3971_v42 = vsub.f32 %v3961_v34, %v3969_v41  ;;  %v3966_v43 = vpop.xlane.xlu0 %3965 }
0x1e45   :  { %v3970_v44 = vsub.f32 %v3956_v37, %v3966_v43 }
0x1e46   :  { %v3974_v45 = vmul.f32 1.442695, %v3971_v42 }
0x1e47   :  { %v3972_v47 = vmul.f32 1.442695, %v3970_v44 }
0x1e48   :  { %6509 = vpow2.f32 %v3974_v45 }
0x1e49   :  { %6511 = vpow2.f32 %v3972_v47 }
0x1e52   :  { %v6510_v48 = vpop.eup %6509 }
0x1e53   :  { %v6512_v50 = vpop.eup %6511  ;;  %v3979_v51 = vsel %vm431_vm3, %v6510_v48, 0.0 }
0x1e54   :  { %3980 = vadd.xlane.f32.xlu1 %v3979_v51  ;;  %v3976_v52 = vsel %vm431_vm3, %v6512_v50, 0.0  ;;  %v5257_v51 = vld [vmem:[%s7554_s9 + $0x38] sm:$0xff] }
0x1e55   :  { %3977 = vadd.xlane.f32.xlu0 %v3976_v52 }
0x1ee1   :  { %v3981_v57 = vpop.xlane.xlu1 %3980 }
0x1ee2   :  { %6513 = vrcp.f32 %v3981_v57  ;;  %v3978_v58 = vpop.xlane.xlu0 %3977 }
0x1ee3   :  { %6515 = vrcp.f32 %v3978_v58 }
0x1eec   :  { %v6514_v59 = vpop.eup %6513 }
0x1eed   :  { %v6516_v36 = vpop.eup %6515  ;;  %v3985_v62 = vmul.f32 %v6514_v59, %v6510_v48 }
0x1eee   :  { %v3984_v61 = vmul.f32 %v6516_v36, %v6512_v50 }
0x1ef0   :  { %5976 = vmatprep.mubr.msk.f32.mxu0 %vm431_vm3, %v3984_v61 }
0x1ef1   :  { %5977 = vmatmul.mubr.msk.f32.vlgmr.msra.gmra.mrb[48].mxu0 %vm431_vm3, %v3985_v62 }
0x1ef2   :  { %6363 = vmatpush3.bf16.msra.mxu0 %v6360_v55  ;;  %5992 = vmatprep.mubr.msk.f32.mxu0 %vm89_vm0, %v7131_v4 }
0x1ef3   :  { %6365 = vmatprep.subr.bf16.mxu0 %v6364_v63 }
0x1ef6   :  { %6367 = vmatpush3.bf16.msra.mxu0 %v6364_v63 }
0x1ef7   :  { %6377 = vmatprep.subr.bf16.mxu0 %v6376_v2 }
0x1ef9   :  { %5993 = vmatmul.mubr.msk.f32.vlgmr.msra.gmra.mrb[50].mxu0 %vm89_vm0, %v7133_v5 }
0x1efa   :  { %6379 = vmatpush3.bf16.msra.mxu0 %v6376_v2  ;;  %6014 = vmatprep.mubr.msk.f32.mxu0 %vm89_vm0, %v7131_v4 }
0x1efb   :  { %6381 = vmatprep.subr.bf16.mxu0 %v6380_v7 }
0x1efe   :  { %6383 = vmatpush3.bf16.msra.mxu0 %v6380_v7 }
0x1f01   :  { %6015 = vmatmul.mubr.msk.f32.vlgmr.msra.gmra.mrb[52].mxu0 %vm89_vm0, %v7133_v5 }
0x1fc4   :  { %v5978_v14 = vpop.f32.mrb[48].mxu0 }
0x1fc5   :  { %v4058_v15 = vpop.f32.mrb[49].mxu0 }
0x1fc6   :  { %5981 = vmatprep.mubr.msk.f32.mxu1 %vm343_vm1, %v4058_v15  ;;  %v5265_v15 = vld [vmem:[%s7558_s13 + $0x28] sm:$0xff] }
0x1fc7   :  { %5982 = vmatmul.mubr.msk.f32.vlgmr.msra.gmra.mrb[20].mxu1 %vm343_vm1, %v5978_v14  ;;  %v5264_v14 = vld [vmem:[%s7558_s13 + $0x20] sm:$0xff] }
0x1fc8   :  { %6371 = vmatpush3.bf16.msra.mxu1 %v6368_v11  ;;  %6003 = vmatprep.mubr.msk.f32.mxu1 %vm89_vm0, %v7131_v4 }
0x1fc9   :  { %6373 = vmatprep.subr.bf16.mxu1 %v6372_v17 }
0x1fcc   :  { %v5994_v19 = vpop.f32.mrb[50].mxu0  ;;  %6375 = vmatpush3.bf16.msra.mxu1 %v6372_v17  ;;  %v6394_v17 = vpack.c.bf16 %v5265_v15, %v5264_v14 }
0x1fcd   :  { %v4237_v20 = vadd.f32 %v5994_v19, %v5232_v18  ;;  %v4231_v21 = vpop.f32.mrb[51].mxu0  ;;  %v5267_v19 = vld [vmem:[%s7558_s13 + $0x38] sm:$0xff] }
0x1fce   :  { %v4232_v22 = vadd.f32 %v5232_v18, %v4231_v21  ;;  %v5266_v18 = vld [vmem:[%s7558_s13 + $0x30] sm:$0xff]  ;;  %v5272_v21 = vld [vmem:[%s7560_s15 + $0x80] sm:$0xff] }
0x1fcf   :  { %6004 = vmatmul.mubr.msk.f32.vlgmr.msra.gmra.mrb[30].mxu1 %vm89_vm0, %v7133_v5 }
0x1fd0   :  { %6021 = vmatprep.mubr.msk.f32.mxu1 %vm343_vm1, %v4232_v22  ;;  %v5273_v22 = vld [vmem:[%s7560_s15 + $0x88] sm:$0xff] }
0x1fd4   :  { %v6016_v24 = vpop.f32.mrb[52].mxu0 }
0x1fd5   :  { %v4413_v28 = vadd.f32 %v6016_v24, %v5248_v23  ;;  %v4407_v29 = vpop.f32.mrb[53].mxu0  ;;  %v6402_v24 = vpack.c.bf16 %v5273_v22, %v5272_v21 }
0x1fd6   :  { %v4408_v30 = vadd.f32 %v5248_v23, %v4407_v29  ;;  %v5274_v23 = vld [vmem:[%s7560_s15 + $0x90] sm:$0xff] }
0x1fd8   :  { %v6390_v25 = vpack.c.bf16 %v4413_v28, %v4408_v30  ;;  %v5275_v28 = vld [vmem:[%s7560_s15 + $0x98] sm:$0xff]  ;;  %v5276_v30 = vld [vmem:[%s7560_s15 + $0xa0] sm:$0xff] }
0x1fd9   :  { %v6406_v29 = vpack.c.bf16 %v5275_v28, %v5274_v23 }
0x1fda   :  { %6391 = vmatprep.subr.bf16.mxu0 %v6390_v25 }
0x1fdb   :  { %6393 = vmatpush3.bf16.msra.mxu0 %v6390_v25  ;;  %v5277_v25 = vld [vmem:[%s7560_s15 + $0xa8] sm:$0xff] }
0x1fdc   :  { %6395 = vmatprep.subr.bf16.mxu0 %v6394_v17 }
0x20a2   :  { %v6005_v26 = vpop.f32.mrb[30].mxu1 }
0x20a3   :  { %v4325_v32 = vadd.f32 %v6005_v26, %v5240_v31  ;;  %v4319_v8 = vpop.f32.mrb[31].mxu1  ;;  %v5278_v26 = vld [vmem:[%s7560_s15 + $0xb0] sm:$0xff] }
0x20a4   :  { %v4320_v16 = vadd.f32 %v5240_v31, %v4319_v8  ;;  %v6410_v31 = vpack.c.bf16 %v5277_v25, %v5276_v30 }
0x20a6   :  { %v6384_v33 = vpack.c.bf16 %v4325_v32, %v4320_v16  ;;  %v5279_v32 = vld [vmem:[%s7560_s15 + $0xb8] sm:$0xff]  ;;  %v5280_v16 = vld [vmem:[%s7560_s15 + $0xc0] sm:$0xff] }
0x20a7   :  { %v6414_v8 = vpack.c.bf16 %v5279_v32, %v5278_v26  ;;  %v5292_v26 = vld [vmem:[%s7562_s17 + $0x1] ss:$0 sm:$0xff] }
0x20a8   :  { %6386 = vmatprep.subr.msk.bf16.mxu1 %vm6721_vm2, %v6384_v33 }
0x20a9   :  { %6389 = vmatpush3.bf16.xpose.msk.msra.mxu1 %vm6721_vm2, %v6384_v33  ;;  %v5281_v33 = vld [vmem:[%s7560_s15 + $0xc8] sm:$0xff] }
0x20aa   :  { %6031 = vmatprep.subr.mxu1 %v5257_v51 }
0x20b0   :  { %6022 = vmatmul.mubr.msk.f32.vlgmr.msra.gmra.mrb[32].mxu1 %vm343_vm1, %v4237_v20  ;;  %v6398_v20 = vpack.c.bf16 %v5267_v19, %v5266_v18 }
0x20b1   :  { %6032 = vmatpush3.msra.mxu1 %v5257_v51 }
0x20b2   :  { %6403 = vmatprep.subr.bf16.mxu1 %v6402_v24 }
0x2183   :  { %v6023_v34 = vpop.f32.mrb[32].mxu1 }
0x2184   :  { %v4500_v35 = vadd.f32 %v7209_v46, %v6023_v34  ;;  %v4494_v37 = vpop.f32.mrb[33].mxu1  ;;  %v6418_v34 = vpack.c.bf16 %v5281_v33, %v5280_v16  ;;  %v5293_v33 = vld [vmem:[%s7563_s18 + $0x1] ss:$0 sm:$0xff] }
0x2185   :  { %v4495_v39 = vadd.f32 %v7215_v49, %v4494_v37  ;;  %v5283_v37 = vld [vmem:[%s7560_s15 + $0xd8] sm:$0xff] }
0x2186   :  { %v4506_v40 = vsel %vm431_vm3, %v4500_v35, -inf }
0x2187   :  { %4507 = vmax.xlane.f32.xlu1 %v4506_v40  ;;  %v4503_v41 = vsel %vm431_vm3, %v4495_v39, -inf  ;;  %v5284_v40 = vld [vmem:[%s7560_s15 + $0xe0] sm:$0xff] }
0x2188   :  { %4504 = vmax.xlane.f32.xlu0 %v4503_v41  ;;  %v5285_v41 = vld [vmem:[%s7560_s15 + $0xe8] sm:$0xff] }
0x2214   :  { %v4508_v42 = vpop.xlane.xlu1 %4507 }
0x2215   :  { %v4510_v43 = vsub.f32 %v4500_v35, %v4508_v42  ;;  %v4505_v44 = vpop.xlane.xlu0 %4504  ;;  %v5282_v35 = vld [vmem:[%s7560_s15 + $0xd0] sm:$0xff]  ;;  %v6426_v42 = vpack.c.bf16 %v5285_v41, %v5284_v40 }
0x2216   :  { %v4509_v45 = vsub.f32 %v4495_v39, %v4505_v44  ;;  %v6422_v39 = vpack.c.bf16 %v5283_v37, %v5282_v35 }
0x2217   :  { %v4513_v27 = vmul.f32 1.442695, %v4510_v43 }
0x2218   :  { %v4511_v47 = vmul.f32 1.442695, %v4509_v45 }
0x2219   :  { %6517 = vpow2.f32 %v4513_v27 }
0x221a   :  { %6519 = vpow2.f32 %v4511_v47 }
0x2223   :  { %v6518_v48 = vpop.eup %6517 }
0x2224   :  { %v6520_v50 = vpop.eup %6519  ;;  %v4518_v46 = vsel %vm431_vm3, %v6518_v48, 0.0 }
0x2225   :  { %4519 = vadd.xlane.f32.xlu1 %v4518_v46  ;;  %v4515_v49 = vsel %vm431_vm3, %v6520_v50, 0.0  ;;  %v5262_v46 = vld [vmem:[%s7556_s11 + $0x1] ss:$0 sm:$0xff] }
0x2226   :  { %4516 = vadd.xlane.f32.xlu0 %v4515_v49 }
0x22b2   :  { %v4520_v52 = vpop.xlane.xlu1 %4519 }
0x22b3   :  { %6521 = vrcp.f32 %v4520_v52  ;;  %v4517_v53 = vpop.xlane.xlu0 %4516 }
0x22b4   :  { %6523 = vrcp.f32 %v4517_v53  ;;  %v5263_v53 = vld [vmem:[%s7557_s12 + $0x1] ss:$0 sm:$0xff] }
0x22bd   :  { %v6522_v54 = vpop.eup %6521 }
0x22be   :  { %v6524_v55 = vpop.eup %6523  ;;  %v4524_v57 = vmul.f32 %v6522_v54, %v6518_v48 }
0x22bf   :  { %v4523_v56 = vmul.f32 %v6524_v55, %v6520_v50 }
0x22c1   :  { %6028 = vmatprep.mubr.msk.f32.mxu0 %vm431_vm3, %v4523_v56 }
0x22c2   :  { %6029 = vmatmul.mubr.msk.f32.vlgmr.msra.gmra.mrb[54].mxu0 %vm431_vm3, %v4524_v57 }
0x22c3   :  { %6397 = vmatpush3.bf16.msra.mxu0 %v6394_v17 }
0x22c4   :  { %6399 = vmatprep.subr.bf16.mxu0 %v6398_v20 }
0x22c7   :  { %6401 = vmatpush3.bf16.msra.mxu0 %v6398_v20 }
0x2395   :  { %v6030_v58 = vpop.f32.mrb[54].mxu0 }
0x2396   :  { %v4597_v59 = vpop.f32.mrb[55].mxu0 }
0x2397   :  { %6033 = vmatprep.mubr.msk.f32.mxu1 %vm343_vm1, %v4597_v59  ;;  %v5287_v59 = vld [vmem:[%s7560_s15 + $0xf8] sm:$0xff] }
0x2398   :  { %6034 = vmatmul.mubr.msk.f32.vlgmr.msra.gmra.mrb[20].mxu1 %vm343_vm1, %v6030_v58  ;;  %v5286_v58 = vld [vmem:[%s7560_s15 + $0xf0] sm:$0xff] }
0x2399   :  { %6405 = vmatpush3.bf16.msra.mxu1 %v6402_v24 }
0x239a   :  { %6407 = vmatprep.subr.bf16.mxu1 %v6406_v29 }
0x239d   :  { %6409 = vmatpush3.bf16.msra.mxu1 %v6406_v29 }
0x239e   :  { %6411 = vmatprep.subr.bf16.mxu1 %v6410_v31 }
0x23a1   :  { %6413 = vmatpush3.bf16.msra.mxu1 %v6410_v31 }
0x23a2   :  { %6415 = vmatprep.subr.bf16.mxu1 %v6414_v8 }
0x23a5   :  { %6417 = vmatpush3.bf16.msra.mxu1 %v6414_v8 }
0x23a6   :  { %6419 = vmatprep.subr.bf16.mxu1 %v6418_v34 }
0x23a9   :  { %6421 = vmatpush3.bf16.msra.mxu1 %v6418_v34 }
0x23aa   :  { %6423 = vmatprep.subr.bf16.mxu1 %v6422_v39 }
0x23ad   :  { %6425 = vmatpush3.bf16.msra.mxu1 %v6422_v39 }
0x23ae   :  { %6427 = vmatprep.subr.bf16.mxu1 %v6426_v42 }
0x23b1   :  { %6429 = vmatpush3.bf16.msra.mxu1 %v6426_v42 }
0x246b   :  { %v6035_v38 = vpop.f32.mrb[20].mxu1 }
0x246c   :  { %v6438_v36 = vadd.f32 %v6035_v38, %v5127_v60  ;;  %v4680_v61 = vpop.f32.mrb[21].mxu1  ;;  %v5269_v38 = vld [vmem:[%s7559_s14 + $0x1] ss:$0 sm:$0xff] }
0x246d   :  { %v6439_v62 = vadd.f32 %v5127_v60, %v4680_v61  ;;  %v6430_v60 = vpack.c.bf16 %v5287_v59, %v5286_v58 }
0x246e   :  { %v4692_v63 = vadd.f32 %v6438_v36, %v7133_v5 }
0x246f   :  { %v4691_v0 = vadd.f32 %v6439_v62, %v7131_v4  ;;  %6431 = vmatprep.subr.bf16.mxu1 %v6430_v60 }
0x2470   :  { %v4700_v1 = vsel %vm89_vm0, %v4692_v63, 0.0  ;;  %6433 = vmatpush3.bf16.msra.mxu1 %v6430_v60 }
0x2471   :  { %4701 = vadd.xlane.f32.xlu1 %v4700_v1  ;;  %v4697_v2 = vsel %vm89_vm0, %v4691_v0, 0.0 }
0x2472   :  { %4698 = vadd.xlane.f32.xlu0 %v4697_v2  ;;  %v5289_v2 = vld [vmem:[%s7561_s16 + $0x1] ss:$0 sm:$0xff] }
0x24fe   :  { %v4702_v3 = vpop.xlane.xlu1 %4701 }
0x24ff   :  { %v4704_v6 = vmul.f32 0.03125, %v4702_v3  ;;  %v4699_v7 = vpop.xlane.xlu0 %4698 }
0x2500   :  { %v4703_v9 = vmul.f32 0.03125, %v4699_v7 }
0x2501   :  { %v7435_v10 = vsub.f32 %v4692_v63, %v4704_v6 }
0x2502   :  { %v7437_v11 = vsub.f32 %v4691_v0, %v4703_v9 }
0x2503   :  { %v4708_v12 = vmul.f32 %v7435_v10, %v7435_v10 }
0x2504   :  { %v4707_v4 = vmul.f32 %v7437_v11, %v7437_v11 }
0x2505   :  { %v4712_v5 = vsel %vm89_vm0, %v4708_v12, 0.0 }
0x2506   :  { %4713 = vadd.xlane.f32.xlu1 %v4712_v5  ;;  %v4709_v13 = vsel %vm89_vm0, %v4707_v4, 0.0 }
0x2507   :  { %4710 = vadd.xlane.f32.xlu0 %v4709_v13 }
0x2593   :  { %v4714_v43 = vpop.xlane.xlu1 %4713 }
0x2594   :  { %v4716_v44 = vmul.f32 0.03125, %v4714_v43  ;;  %v4711_v45 = vpop.xlane.xlu0 %4710 }
0x2595   :  { %v4715_v27 = vmul.f32 0.03125, %v4711_v45 }
0x2596   :  { %v4718_v47 = vadd.f32 1e-05, %v4716_v44 }
0x2597   :  { %v4717_v48 = vadd.f32 1e-05, %v4715_v27 }
0x2598   :  { %6525 = vrsqrt.f32 %v4718_v47 }
0x2599   :  { %6527 = vrsqrt.f32 %v4717_v48 }
0x25a2   :  { %v6526_v50 = vpop.eup %6525 }
0x25a3   :  { %v6528_v49 = vpop.eup %6527  ;;  %v4722_v51 = vmul.f32 %v6526_v50, %v7435_v10 }
0x25a4   :  { %v4721_v52 = vmul.f32 %v6528_v49, %v7437_v11 }
0x25a5   :  { %v4730_v54 = vmul.f32 %v5262_v46, %v4722_v51 }
0x25a6   :  { %v4729_v55 = vmul.f32 %v5262_v46, %v4721_v52 }
0x25a7   :  { %v4738_v57 = vadd.f32 %v5263_v53, %v4730_v54 }
0x25a8   :  { %v4737_v56 = vadd.f32 %v5263_v53, %v4729_v55 }
0x25aa   :  { %6044 = vmatprep.mubr.msk.f32.mxu0 %vm89_vm0, %v4737_v56 }
0x25ab   :  { %6045 = vmatmul.mubr.msk.f32.vlgmr.msra.gmra.mrb[56].mxu0 %vm89_vm0, %v4738_v57 }
0x267e   :  { %v6046_v36 = vpop.f32.mrb[56].mxu0 }
0x267f   :  { %v4830_v61 = vadd.f32 %v6046_v36, %v5269_v38  ;;  %v4824_v62 = vpop.f32.mrb[57].mxu0 }
0x2680   :  { %v4825_v63 = vadd.f32 %v5269_v38, %v4824_v62 }
0x2681   :  { %v4834_v1 = vmax.f32 %v4830_v61, 0.0 }
0x2682   :  { %v4833_v0 = vmax.f32 %v4825_v63, 0.0 }
0x2684   :  { %6079 = vmatprep.mubr.f32.mxu1 %v4833_v0 }
0x2685   :  { %6080 = vmatmul.mubr.f32.vlgmr.msra.gmra.mrb[34].mxu1 %v4834_v1 }
0x2758   :  { %v6081_v3 = vpop.f32.mrb[34].mxu1 }
0x2759   :  { %v4932_v6 = vadd.f32 %v6081_v3, %v5289_v2  ;;  %v4926_v7 = vpop.f32.mrb[35].mxu1 }
0x275a   :  { %v4927_v9 = vadd.f32 %v5289_v2, %v4926_v7 }
0x275b   :  { %v4936_v10 = vadd.f32 %v4932_v6, %v4738_v57 }
0x275c   :  { %v4935_v11 = vadd.f32 %v4927_v9, %v4737_v56 }
0x275d   :  { %v4944_v12 = vsel %vm89_vm0, %v4936_v10, 0.0 }
0x275e   :  { %4945 = vadd.xlane.f32.xlu1 %v4944_v12  ;;  %v4941_v4 = vsel %vm89_vm0, %v4935_v11, 0.0 }
0x275f   :  { %4942 = vadd.xlane.f32.xlu0 %v4941_v4 }
0x27eb   :  { %v4946_v5 = vpop.xlane.xlu1 %4945 }
0x27ec   :  { %v4948_v13 = vmul.f32 0.03125, %v4946_v5  ;;  %v4943_v14 = vpop.xlane.xlu0 %4942 }
0x27ed   :  { %v4947_v15 = vmul.f32 0.03125, %v4943_v14 }
0x27ee   :  { %v4950_v17 = vsub.f32 %v4936_v10, %v4948_v13 }
0x27ef   :  { %v4949_v18 = vsub.f32 %v4935_v11, %v4947_v15 }
0x27f0   :  { %v4952_v19 = vmul.f32 %v4950_v17, %v4950_v17 }
0x27f1   :  { %v4951_v20 = vmul.f32 %v4949_v18, %v4949_v18 }
0x27f2   :  { %v4956_v21 = vsel %vm89_vm0, %v4952_v19, 0.0 }
0x27f3   :  { %4957 = vadd.xlane.f32.xlu1 %v4956_v21  ;;  %v4953_v22 = vsel %vm89_vm0, %v4951_v20, 0.0 }
0x27f4   :  { %4954 = vadd.xlane.f32.xlu0 %v4953_v22 }
0x2880   :  { %v4958_v23 = vpop.xlane.xlu1 %4957 }
0x2881   :  { %v4960_v24 = vmul.f32 0.03125, %v4958_v23  ;;  %v4955_v28 = vpop.xlane.xlu0 %4954 }
0x2882   :  { %v4959_v29 = vmul.f32 0.03125, %v4955_v28 }
0x2883   :  { %v4962_v30 = vadd.f32 1e-05, %v4960_v24 }
0x2884   :  { %v4961_v25 = vadd.f32 1e-05, %v4959_v29 }
0x2885   :  { %6529 = vrsqrt.f32 %v4962_v30 }
0x2886   :  { %6531 = vrsqrt.f32 %v4961_v25 }
0x288f   :  { %v6530_v31 = vpop.eup %6529 }
0x2890   :  { %v6532_v32 = vpop.eup %6531  ;;  %v4966_v8 = vmul.f32 %v6530_v31, %v4950_v17 }
0x2891   :  { %v4965_v16 = vmul.f32 %v6532_v32, %v4949_v18 }
0x2892   :  { %v4974_v34 = vmul.f32 %v5292_v26, %v4966_v8 }
0x2893   :  { %v4973_v35 = vmul.f32 %v5292_v26, %v4965_v16 }
0x2894   :  { %v4982_v37 = vadd.f32 %v5293_v33, %v4974_v34 }
0x2895   :  { %v4981_v39 = vadd.f32 %v5293_v33, %v4973_v35 }
0x2896   :  { %4984 = vst.msk [vmem:[#allocation2 + $0x8] sm:$0xff] %vm89_vm0, %v4982_v37 }
0x2897   :  { %4983 = vst.msk [vmem:[#allocation2] sm:$0xff] %vm89_vm0, %v4981_v39 }
0x2898   :  { %6546 = shalt.err (!%p6543_p4)
}
0x2899   :  { %s6547_s2 = scalar_lea.hbm %s7564_s19, 256 }
0x289a   :  { %p6548_p5 = scmp.ne.s32.totalorder %s7564_s19, %s6547_s2  ;;  %p6551_p6 = scmp.lt.u32.totalorder %s6547_s2, %s7564_s19 }
0x289c   :  { %p6553_p7 = pnand %p6551_p6, %p6548_p5 }
0x289e   :  { %6556 = shalt.err (!%p6553_p7)
}
0x289f   :  { %s6560_s3 = smov 128   ;;  %s6561_s27 = smov 8  }
0x28a0   :  { %4996 = dma.vmem_to_hbm [thread:$0]  %s4991_s1, 256, %s7564_s19, [#allocation3], %s6560_s3, %s6560_s3, %s6561_s27  }
0x28a1   :  { %6557 = dma.done.wait [#allocation3], 256  }
0x28a2   :  { %6558 = vsyncadd [#allocation3], 4294967040 }
0x28a3   :  { %5000 = vsyncpa [#allocation3], 1 }

</bundles_post_ra>
